<compile_context>
chip_gen: v6e
topology: v6e:2x2x1
jax: 0.10.0
libtpu: 0.0.40
codegen_flags: <defaults>
</compile_context>

<pallas_src>
import numpy as np
import jax
import jax.numpy as jnp
from jax.experimental import pallas as pl
from jax.experimental.pallas import tpu as pltpu


# tap order: row-major over the 3x3 window, (dy, dx) = (ky-1, kx-1)
TAPS = tuple((dy, dx) for dy in (-1, 0, 1) for dx in (-1, 0, 1))


# ------------------------------ in-kernel helpers ------------------------------ #

def _shift_lanes(a, d):
    """b[:, p] = a[:, p + d], zero-filled where p + d is outside [0, L)."""
    C, L = a.shape
    if d == 0:
        return a
    if abs(d) >= L:
        return jnp.zeros_like(a)
    z = jnp.zeros((C, abs(d)), a.dtype)
    if d > 0:
        return jnp.concatenate([a[:, d:], z], axis=1)
    return jnp.concatenate([z, a[:, :d]], axis=1)


def _im2col(a, masks, W, need_mask):
    """(C, L) -> (9*C, L): 9 lane-shifted copies; boundary masks only where needed."""
    cols = []
    for t, (dy, dx) in enumerate(TAPS):
        sh = _shift_lanes(a, dy * W + dx)
        if t in need_mask:
            sh = sh * masks[t:t + 1, :]          # precomputed 0/1 mask row
        cols.append(sh)
    return jnp.concatenate(cols, axis=0)


def _make_kernel(cfg):
    """cfg: compile-time per-block (W, pool, need_mask) for the 4 spatial blocks."""

    def kernel(*refs):
        x_ref, o_ref = refs[0], refs[-1]
        it = iter(refs[1:-1])

        a = x_ref[0]                                          # (C0p, ips*H0*W0) f32

        # ---- blocks 1-4: [conv3x3+BN]  [grouped3x3 (.) 1x1+BN composed]  [pool] ----
        for c in cfg:
            W, need = c["W"], c["need_mask"]
            w1 = next(it)[...]; b1 = next(it)[...]            # (Co,9Ci) bf16, (Co,1) f32
            w2 = next(it)[...]; b2 = next(it)[...]            # (Co,9Co) bf16, (Co,1) f32
            masks = next(it)[...]                             # (9, L) f32, precomputed
            sel = next(it)[...]                               # (L, L/4) bf16, pool select

            col = _im2col(a, masks, W, need)
            a = jnp.dot(w1, col.astype(jnp.bfloat16),
                        preferred_element_type=jnp.float32) + b1
            col = _im2col(a, masks, W, need)
            a = jnp.dot(w2, col.astype(jnp.bfloat16),
                        preferred_element_type=jnp.float32) + b2

            if c["pool"] == "max":
                v = jnp.maximum(a, _shift_lanes(a, 1))
                v = jnp.maximum(v, _shift_lanes(v, W))
            else:                                             # avg (0.25 folded in sel)
                v = a + _shift_lanes(a, 1)
                v = v + _shift_lanes(v, W)
            a = jnp.dot(v.astype(jnp.bfloat16), sel,
                        preferred_element_type=jnp.float32)

        # ---- block 5 (1x1 spatial): centre-tap dense matmuls only ----
        w1 = next(it)[...]; b1 = next(it)[...]                # (64,32) bf16
        w2 = next(it)[...]; b2 = next(it)[...]                # (64,64) bf16
        a = jnp.dot(w1, a.astype(jnp.bfloat16), preferred_element_type=jnp.float32) + b1
        a = jnp.dot(w2, a.astype(jnp.bfloat16), preferred_element_type=jnp.float32) + b2

        # ---- classifier: GAP(1x1)=identity; row-vector form -> lane-dense logits ----
        w1r = next(it)[...]; b1r = next(it)[...]
        w2r = next(it)[...]; b2r = next(it)[...]
        w3r = next(it)[...]; b3r = next(it)[...]
        dn = (((0,), (0,)), ((), ()))                         # (C,B) x (C,O) -> (B,O)
        h = jax.lax.dot_general(a.astype(jnp.bfloat16), w1r, dn,
                                preferred_element_type=jnp.float32) + b1r
        h = jnp.maximum(h, 0.0)
        h = jnp.dot(h.astype(jnp.bfloat16), w2r,
                    preferred_element_type=jnp.float32) + b2r
        h = jnp.maximum(h, 0.0)
        out = jnp.dot(h.astype(jnp.bfloat16), w3r,
                      preferred_element_type=jnp.float32) + b3r
        o_ref[0] = out                                        # (ips, num_classes)

    return kernel


def _const_index_map(rank):
    return lambda s: (0,) * rank


# ------------------------------ host-side constants ---------------------------- #

def _split_batch(N):
    # At most 2 grid steps (one per v7x TensorCore); lane-pack the rest per step.
    if N >= 2 and N % 2 == 0:
        return 2, N // 2
    return N, 1


def _need_mask(ips):
    # centre tap never needs a mask; dx==0 taps only need one when several
    # images are lane-packed (zero-fill at the array edge handles ips == 1).
    return tuple(t for t, (dy, dx) in enumerate(TAPS)
                 if dx != 0 or (dy != 0 and ips > 1))


def _build_masks(H, W, ips):
    L = ips * H * W
    pix = np.arange(L) % (H * W)
    y, x = pix // W, pix % W
    m = np.zeros((9, L), np.float32)
    for t, (dy, dx) in enumerate(TAPS):
        m[t] = ((x + dx >= 0) & (x + dx < W) & (y + dy >= 0) & (y + dy < H))
    return jnp.asarray(m)


def _build_pool_sel(H, W, ips, mode):
    Ho, Wo = H // 2, W // 2
    L, Lo = ips * H * W, ips * Ho * Wo
    sel = np.zeros((L, Lo), np.float32)
    q = np.arange(Lo)
    b, qq = q // (Ho * Wo), q % (Ho * Wo)
    src = b * (H * W) + (2 * (qq // Wo)) * W + 2 * (qq % Wo)
    sel[src, q] = 1.0 if mode == "max" else 0.25              # avg's 1/4 folded in
    return jnp.asarray(sel).astype(jnp.bfloat16)


# ------------------------------ parameter setup -------------------------------- #

def _fold_bn(bias, gamma, beta, mean=0.0, var=1.0, eps=1e-5):
    """Eval-mode BN folded onto the preceding conv/linear: returns (scale, shift)."""
    s = gamma / jnp.sqrt(var + eps)
    return s, beta + (bias - mean) * s


def init_wafernet_params(key, in_channel, num_classes=38):
    keys = iter(jax.random.split(key, 64))

    def nrm(shape, s=0.1):
        return jax.random.normal(next(keys), shape, jnp.float32) * s

    c0p = max(8, ((in_channel + 7) // 8) * 8)     # pad input channels to sublane mult

    blocks_cfg = [  # (cin, cout, groups) — matches the PyTorch module
        (in_channel, 8, 8), (8, 16, 16), (16, 16, 16), (16, 32, 8), (32, 64, 64),
    ]

    blocks = []
    for bi, (cin, cout, groups) in enumerate(blocks_cfg):
        cin_p = c0p if bi == 0 else cin

        # conv3x3 (pad=1) + BatchNorm2d (eval); Dropout2d = identity
        w1, b1 = nrm((cout, cin, 3, 3)), nrm((cout,))
        s1, t1 = _fold_bn(b1, 1.0 + nrm((cout,)), nrm((cout,)))
        W1_otc = jnp.transpose(w1 * s1[:, None, None, None], (0, 2, 3, 1)).reshape(cout, 9, cin)
        if cin_p > cin:
            W1_otc = jnp.pad(W1_otc, ((0, 0), (0, 0), (0, cin_p - cin)))

        # grouped conv3x3 (bias) composed with conv1x1 + BatchNorm2d (eval)
        ipg = cout // groups
        wg, bg = nrm((cout, ipg, 3, 3)), nrm((cout,))
        wg_t = jnp.transpose(wg, (0, 2, 3, 1)).reshape(cout, 9, ipg)
        same_grp = (jnp.arange(cout)[:, None] // ipg) == (jnp.arange(cout)[None, :] // ipg)
        Wg_dense = wg_t[:, :, jnp.arange(cout) % ipg] * same_grp[:, None, :]   # (O,9,C)

        wpw, bpw = nrm((cout, cout)), nrm((cout,))
        s2, t2 = _fold_bn(wpw @ bg + bpw, 1.0 + nrm((cout,)), nrm((cout,)))
        W2_otc = jnp.einsum("om,mtc->otc", wpw, Wg_dense) * s2[:, None, None]

        if bi == 4:   # block 5 runs at 1x1 spatial: only the centre tap contributes
            W1, W2 = W1_otc[:, 4, :], W2_otc[:, 4, :]
        else:
            W1, W2 = W1_otc.reshape(cout, 9 * cin_p), W2_otc.reshape(cout, 9 * cout)

        blocks.append(dict(W1=W1.astype(jnp.bfloat16), b1=t1[:, None],
                           W2=W2.astype(jnp.bfloat16), b2=t2[:, None]))

    # classifier: GAP -> Linear(64,64)+BN+ReLU -> Linear(64,128)+BN+ReLU -> Linear(128,nc)
    wl1, bl1 = nrm((64, 64)), nrm((64,))
    sl1, tl1 = _fold_bn(bl1, 1.0 + nrm((64,)), nrm((64,)))
    wl2, bl2 = nrm((128, 64)), nrm((128,))
    sl2, tl2 = _fold_bn(bl2, 1.0 + nrm((128,)), nrm((128,)))
    wl3, bl3 = nrm((num_classes, 128)), nrm((num_classes,))
    cls = dict(W1=(wl1 * sl1[:, None]).T.astype(jnp.bfloat16), b1=tl1[None, :],
               W2=(wl2 * sl2[:, None]).T.astype(jnp.bfloat16), b2=tl2[None, :],
               W3=wl3.T.astype(jnp.bfloat16), b3=bl3[None, :])

    return dict(blocks=blocks, cls=cls, cin_pad=c0p,
                in_channel=in_channel, num_classes=num_classes)


# --------------------------------- forward ------------------------------------- #

def wafernet_forward(x_nchw, params):
    N, C0, H0, W0 = x_nchw.shape
    nc, C0p = params["num_classes"], params["cin_pad"]
    assert C0 == params["in_channel"]
    # TODO(synk): spatial sizes other than 16x16 (final feature map > 1x1) not supported.
    assert (H0, W0) == (16, 16), "fused wafernet kernel is specialised for 16x16 inputs"

    steps, ips = _split_batch(N)
    HW = H0 * W0

    # NCHW -> (steps, C, ips*H*W): lane-pack `ips` images per grid step.
    x = x_nchw.astype(jnp.float32).reshape(N, C0, HW)
    if C0p > C0:
        x = jnp.pad(x, ((0, 0), (0, C0p - C0), (0, 0)))
    x = x.reshape(steps, ips, C0p, HW).transpose(0, 2, 1, 3).reshape(steps, C0p, ips * HW)

    need = _need_mask(ips)
    pools = ("max", "max", "max", "avg")
    cfg, flat, H, W = [], [x], H0, W0
    for bi in range(4):
        blk = params["blocks"][bi]
        flat += [blk["W1"], blk["b1"], blk["W2"], blk["b2"],
                 _build_masks(H, W, ips), _build_pool_sel(H, W, ips, pools[bi])]
        cfg.append(dict(W=W, pool=pools[bi], need_mask=need))
        H, W = H // 2, W // 2
    blk5 = params["blocks"][4]
    flat += [blk5["W1"], blk5["b1"], blk5["W2"], blk5["b2"]]
    cl = params["cls"]
    flat += [cl["W1"], cl["b1"], cl["W2"], cl["b2"], cl["W3"], cl["b3"]]

    in_specs = [pl.BlockSpec((1, C0p, ips * HW), lambda s: (s, 0, 0))]
    for arr in flat[1:]:
        in_specs.append(pl.BlockSpec(arr.shape, _const_index_map(arr.ndim)))

    out = pl.pallas_call(
        _make_kernel(tuple(cfg)),
        out_shape=jax.ShapeDtypeStruct((steps, ips, nc), jnp.float32),
        grid_spec=pltpu.PrefetchScalarGridSpec(
            num_scalar_prefetch=0,
            grid=(steps,),
            in_specs=in_specs,
            out_specs=pl.BlockSpec((1, ips, nc), lambda s: (s, 0, 0)),
        ),
        compiler_params=pltpu.CompilerParams(dimension_semantics=("parallel",)),
    )(*flat)
    return out.reshape(N, nc)


if __name__ == "__main__":
    key = jax.random.PRNGKey(0)
    pkey, xkey = jax.random.split(key)

    in_channel, num_classes = 4, 38
    params = init_wafernet_params(pkey, in_channel, num_classes)

    x = jax.random.normal(xkey, (2, in_channel, 16, 16), jnp.float32)   # NCHW like PyTorch

    fwd = jax.jit(lambda xx: wafernet_forward(xx, params))
    logits = fwd(x)
    jax.block_until_ready(logits)

    assert logits.shape == (2, num_classes)
    assert bool(jnp.all(jnp.isfinite(logits)))
    print("KERNEL_OK")
</pallas_src>

<mosaic_0001>
module attributes {stable_mosaic.version = 11 : i64} {
  func.func @kernel(%arg0: i32, %arg1: memref<1x8x256xf32, #tpu.memory_space<vmem>>, %arg2: memref<8x72xbf16, #tpu.memory_space<vmem>>, %arg3: memref<8x1xf32, #tpu.memory_space<vmem>>, %arg4: memref<8x72xbf16, #tpu.memory_space<vmem>>, %arg5: memref<8x1xf32, #tpu.memory_space<vmem>>, %arg6: memref<9x256xf32, #tpu.memory_space<vmem>>, %arg7: memref<256x64xbf16, #tpu.memory_space<vmem>>, %arg8: memref<16x72xbf16, #tpu.memory_space<vmem>>, %arg9: memref<16x1xf32, #tpu.memory_space<vmem>>, %arg10: memref<16x144xbf16, #tpu.memory_space<vmem>>, %arg11: memref<16x1xf32, #tpu.memory_space<vmem>>, %arg12: memref<9x64xf32, #tpu.memory_space<vmem>>, %arg13: memref<64x16xbf16, #tpu.memory_space<vmem>>, %arg14: memref<16x144xbf16, #tpu.memory_space<vmem>>, %arg15: memref<16x1xf32, #tpu.memory_space<vmem>>, %arg16: memref<16x144xbf16, #tpu.memory_space<vmem>>, %arg17: memref<16x1xf32, #tpu.memory_space<vmem>>, %arg18: memref<9x16xf32, #tpu.memory_space<vmem>>, %arg19: memref<16x4xbf16, #tpu.memory_space<vmem>>, %arg20: memref<32x144xbf16, #tpu.memory_space<vmem>>, %arg21: memref<32x1xf32, #tpu.memory_space<vmem>>, %arg22: memref<32x288xbf16, #tpu.memory_space<vmem>>, %arg23: memref<32x1xf32, #tpu.memory_space<vmem>>, %arg24: memref<9x4xf32, #tpu.memory_space<vmem>>, %arg25: memref<4x1xbf16, #tpu.memory_space<vmem>>, %arg26: memref<64x32xbf16, #tpu.memory_space<vmem>>, %arg27: memref<64x1xf32, #tpu.memory_space<vmem>>, %arg28: memref<64x64xbf16, #tpu.memory_space<vmem>>, %arg29: memref<64x1xf32, #tpu.memory_space<vmem>>, %arg30: memref<64x64xbf16, #tpu.memory_space<vmem>>, %arg31: memref<1x64xf32, #tpu.memory_space<vmem>>, %arg32: memref<64x128xbf16, #tpu.memory_space<vmem>>, %arg33: memref<1x128xf32, #tpu.memory_space<vmem>>, %arg34: memref<128x38xbf16, #tpu.memory_space<vmem>>, %arg35: memref<1x38xf32, #tpu.memory_space<vmem>>, %arg36: memref<1x1x38xf32, #tpu.memory_space<vmem>>) attributes {dimension_semantics = [#tpu.dimension_semantics<parallel>], iteration_bounds = array<i64: 2>, scalar_prefetch = 0 : i64, scratch_operands = 0 : i64, tpu.core_type = #tpu.core_type<tc>, window_params = [{transform_indices = @transform_0, window_bounds = array<i64: 1, 8, 256>}, {pipeline_mode = #tpu.pipeline_mode<synchronous>, transform_indices = @transform_1, window_bounds = array<i64: 8, 72>}, {pipeline_mode = #tpu.pipeline_mode<synchronous>, transform_indices = @transform_2, window_bounds = array<i64: 8, 1>}, {pipeline_mode = #tpu.pipeline_mode<synchronous>, transform_indices = @transform_3, window_bounds = array<i64: 8, 72>}, {pipeline_mode = #tpu.pipeline_mode<synchronous>, transform_indices = @transform_4, window_bounds = array<i64: 8, 1>}, {pipeline_mode = #tpu.pipeline_mode<synchronous>, transform_indices = @transform_5, window_bounds = array<i64: 9, 256>}, {pipeline_mode = #tpu.pipeline_mode<synchronous>, transform_indices = @transform_6, window_bounds = array<i64: 256, 64>}, {pipeline_mode = #tpu.pipeline_mode<synchronous>, transform_indices = @transform_7, window_bounds = array<i64: 16, 72>}, {pipeline_mode = #tpu.pipeline_mode<synchronous>, transform_indices = @transform_8, window_bounds = array<i64: 16, 1>}, {pipeline_mode = #tpu.pipeline_mode<synchronous>, transform_indices = @transform_9, window_bounds = array<i64: 16, 144>}, {pipeline_mode = #tpu.pipeline_mode<synchronous>, transform_indices = @transform_10, window_bounds = array<i64: 16, 1>}, {pipeline_mode = #tpu.pipeline_mode<synchronous>, transform_indices = @transform_11, window_bounds = array<i64: 9, 64>}, {pipeline_mode = #tpu.pipeline_mode<synchronous>, transform_indices = @transform_12, window_bounds = array<i64: 64, 16>}, {pipeline_mode = #tpu.pipeline_mode<synchronous>, transform_indices = @transform_13, window_bounds = array<i64: 16, 144>}, {pipeline_mode = #tpu.pipeline_mode<synchronous>, transform_indices = @transform_14, window_bounds = array<i64: 16, 1>}, {pipeline_mode = #tpu.pipeline_mode<synchronous>, transform_indices = @transform_15, window_bounds = array<i64: 16, 144>}, {pipeline_mode = #tpu.pipeline_mode<synchronous>, transform_indices = @transform_16, window_bounds = array<i64: 16, 1>}, {pipeline_mode = #tpu.pipeline_mode<synchronous>, transform_indices = @transform_17, window_bounds = array<i64: 9, 16>}, {pipeline_mode = #tpu.pipeline_mode<synchronous>, transform_indices = @transform_18, window_bounds = array<i64: 16, 4>}, {pipeline_mode = #tpu.pipeline_mode<synchronous>, transform_indices = @transform_19, window_bounds = array<i64: 32, 144>}, {pipeline_mode = #tpu.pipeline_mode<synchronous>, transform_indices = @transform_20, window_bounds = array<i64: 32, 1>}, {pipeline_mode = #tpu.pipeline_mode<synchronous>, transform_indices = @transform_21, window_bounds = array<i64: 32, 288>}, {pipeline_mode = #tpu.pipeline_mode<synchronous>, transform_indices = @transform_22, window_bounds = array<i64: 32, 1>}, {pipeline_mode = #tpu.pipeline_mode<synchronous>, transform_indices = @transform_23, window_bounds = array<i64: 9, 4>}, {pipeline_mode = #tpu.pipeline_mode<synchronous>, transform_indices = @transform_24, window_bounds = array<i64: 4, 1>}, {pipeline_mode = #tpu.pipeline_mode<synchronous>, transform_indices = @transform_25, window_bounds = array<i64: 64, 32>}, {pipeline_mode = #tpu.pipeline_mode<synchronous>, transform_indices = @transform_26, window_bounds = array<i64: 64, 1>}, {pipeline_mode = #tpu.pipeline_mode<synchronous>, transform_indices = @transform_27, window_bounds = array<i64: 64, 64>}, {pipeline_mode = #tpu.pipeline_mode<synchronous>, transform_indices = @transform_28, window_bounds = array<i64: 64, 1>}, {pipeline_mode = #tpu.pipeline_mode<synchronous>, transform_indices = @transform_29, window_bounds = array<i64: 64, 64>}, {pipeline_mode = #tpu.pipeline_mode<synchronous>, transform_indices = @transform_30, window_bounds = array<i64: 1, 64>}, {pipeline_mode = #tpu.pipeline_mode<synchronous>, transform_indices = @transform_31, window_bounds = array<i64: 64, 128>}, {pipeline_mode = #tpu.pipeline_mode<synchronous>, transform_indices = @transform_32, window_bounds = array<i64: 1, 128>}, {pipeline_mode = #tpu.pipeline_mode<synchronous>, transform_indices = @transform_33, window_bounds = array<i64: 128, 38>}, {pipeline_mode = #tpu.pipeline_mode<synchronous>, transform_indices = @transform_34, window_bounds = array<i64: 1, 38>}, {transform_indices = @transform_35, window_bounds = array<i64: 1, 1, 38>}]} {
    %c0 = arith.constant 0 : index
    %c0_0 = arith.constant 0 : index
    %c0_1 = arith.constant 0 : index
    %0 = vector.load %arg1[%c0, %c0_0, %c0_1] : memref<1x8x256xf32, #tpu.memory_space<vmem>>, vector<1x8x256xf32>
    %1 = vector.shape_cast %0 : vector<1x8x256xf32> to vector<8x256xf32>
    %c0_2 = arith.constant 0 : index
    %c0_3 = arith.constant 0 : index
    %2 = vector.load %arg2[%c0_2, %c0_3] : memref<8x72xbf16, #tpu.memory_space<vmem>>, vector<8x72xbf16>
    %c0_4 = arith.constant 0 : index
    %c0_5 = arith.constant 0 : index
    %3 = vector.load %arg3[%c0_4, %c0_5] : memref<8x1xf32, #tpu.memory_space<vmem>>, vector<8x1xf32>
    %c0_6 = arith.constant 0 : index
    %c0_7 = arith.constant 0 : index
    %4 = vector.load %arg4[%c0_6, %c0_7] : memref<8x72xbf16, #tpu.memory_space<vmem>>, vector<8x72xbf16>
    %c0_8 = arith.constant 0 : index
    %c0_9 = arith.constant 0 : index
    %5 = vector.load %arg5[%c0_8, %c0_9] : memref<8x1xf32, #tpu.memory_space<vmem>>, vector<8x1xf32>
    %c0_10 = arith.constant 0 : index
    %c0_11 = arith.constant 0 : index
    %6 = vector.load %arg6[%c0_10, %c0_11] : memref<9x256xf32, #tpu.memory_space<vmem>>, vector<9x256xf32>
    %c0_12 = arith.constant 0 : index
    %c0_13 = arith.constant 0 : index
    %7 = vector.load %arg7[%c0_12, %c0_13] : memref<256x64xbf16, #tpu.memory_space<vmem>>, vector<256x64xbf16>
    %cst = arith.constant 0.000000e+00 : f32
    %8 = vector.broadcast %cst : f32 to vector<8x17xf32>
    %9 = vector.extract_strided_slice %1 {offsets = [0, 0], sizes = [8, 239], strides = [1, 1]} : vector<8x256xf32> to vector<8x239xf32>
    %10 = tpu.concatenate %8, %9 in 1 : vector<8x17xf32>, vector<8x239xf32> -> vector<8x256xf32>
    %11 = vector.extract_strided_slice %6 {offsets = [0, 0], sizes = [1, 256], strides = [1, 1]} : vector<9x256xf32> to vector<1x256xf32>
    %12 = vector.broadcast %11 : vector<1x256xf32> to vector<8x256xf32>
    %13 = arith.mulf %10, %12 : vector<8x256xf32>
    %cst_14 = arith.constant 0.000000e+00 : f32
    %14 = vector.broadcast %cst_14 : f32 to vector<8x16xf32>
    %15 = vector.extract_strided_slice %1 {offsets = [0, 0], sizes = [8, 240], strides = [1, 1]} : vector<8x256xf32> to vector<8x240xf32>
    %16 = tpu.concatenate %14, %15 in 1 : vector<8x16xf32>, vector<8x240xf32> -> vector<8x256xf32>
    %cst_15 = arith.constant 0.000000e+00 : f32
    %17 = vector.broadcast %cst_15 : f32 to vector<8x15xf32>
    %18 = vector.extract_strided_slice %1 {offsets = [0, 0], sizes = [8, 241], strides = [1, 1]} : vector<8x256xf32> to vector<8x241xf32>
    %19 = tpu.concatenate %17, %18 in 1 : vector<8x15xf32>, vector<8x241xf32> -> vector<8x256xf32>
    %20 = vector.extract_strided_slice %6 {offsets = [2, 0], sizes = [1, 256], strides = [1, 1]} : vector<9x256xf32> to vector<1x256xf32>
    %21 = vector.broadcast %20 : vector<1x256xf32> to vector<8x256xf32>
    %22 = arith.mulf %19, %21 : vector<8x256xf32>
    %cst_16 = arith.constant 0.000000e+00 : f32
    %23 = vector.broadcast %cst_16 : f32 to vector<8x1xf32>
    %24 = vector.extract_strided_slice %1 {offsets = [0, 0], sizes = [8, 255], strides = [1, 1]} : vector<8x256xf32> to vector<8x255xf32>
    %25 = tpu.concatenate %23, %24 in 1 : vector<8x1xf32>, vector<8x255xf32> -> vector<8x256xf32>
    %26 = vector.extract_strided_slice %6 {offsets = [3, 0], sizes = [1, 256], strides = [1, 1]} : vector<9x256xf32> to vector<1x256xf32>
    %27 = vector.broadcast %26 : vector<1x256xf32> to vector<8x256xf32>
    %28 = arith.mulf %25, %27 : vector<8x256xf32>
    %cst_17 = arith.constant 0.000000e+00 : f32
    %29 = vector.broadcast %cst_17 : f32 to vector<8x1xf32>
    %30 = vector.extract_strided_slice %1 {offsets = [0, 1], sizes = [8, 255], strides = [1, 1]} : vector<8x256xf32> to vector<8x255xf32>
    %31 = tpu.concatenate %30, %29 in 1 : vector<8x255xf32>, vector<8x1xf32> -> vector<8x256xf32>
    %32 = vector.extract_strided_slice %6 {offsets = [5, 0], sizes = [1, 256], strides = [1, 1]} : vector<9x256xf32> to vector<1x256xf32>
    %33 = vector.broadcast %32 : vector<1x256xf32> to vector<8x256xf32>
    %34 = arith.mulf %31, %33 : vector<8x256xf32>
    %cst_18 = arith.constant 0.000000e+00 : f32
    %35 = vector.broadcast %cst_18 : f32 to vector<8x15xf32>
    %36 = vector.extract_strided_slice %1 {offsets = [0, 15], sizes = [8, 241], strides = [1, 1]} : vector<8x256xf32> to vector<8x241xf32>
    %37 = tpu.concatenate %36, %35 in 1 : vector<8x241xf32>, vector<8x15xf32> -> vector<8x256xf32>
    %38 = vector.extract_strided_slice %6 {offsets = [6, 0], sizes = [1, 256], strides = [1, 1]} : vector<9x256xf32> to vector<1x256xf32>
    %39 = vector.broadcast %38 : vector<1x256xf32> to vector<8x256xf32>
    %40 = arith.mulf %37, %39 : vector<8x256xf32>
    %cst_19 = arith.constant 0.000000e+00 : f32
    %41 = vector.broadcast %cst_19 : f32 to vector<8x16xf32>
    %42 = vector.extract_strided_slice %1 {offsets = [0, 16], sizes = [8, 240], strides = [1, 1]} : vector<8x256xf32> to vector<8x240xf32>
    %43 = tpu.concatenate %42, %41 in 1 : vector<8x240xf32>, vector<8x16xf32> -> vector<8x256xf32>
    %cst_20 = arith.constant 0.000000e+00 : f32
    %44 = vector.broadcast %cst_20 : f32 to vector<8x17xf32>
    %45 = vector.extract_strided_slice %1 {offsets = [0, 17], sizes = [8, 239], strides = [1, 1]} : vector<8x256xf32> to vector<8x239xf32>
    %46 = tpu.concatenate %45, %44 in 1 : vector<8x239xf32>, vector<8x17xf32> -> vector<8x256xf32>
    %47 = vector.extract_strided_slice %6 {offsets = [8, 0], sizes = [1, 256], strides = [1, 1]} : vector<9x256xf32> to vector<1x256xf32>
    %48 = vector.broadcast %47 : vector<1x256xf32> to vector<8x256xf32>
    %49 = arith.mulf %46, %48 : vector<8x256xf32>
    %50 = tpu.concatenate %13, %16, %22, %28, %1, %34, %40, %43, %49 in 0 : vector<8x256xf32>, vector<8x256xf32>, vector<8x256xf32>, vector<8x256xf32>, vector<8x256xf32>, vector<8x256xf32>, vector<8x256xf32>, vector<8x256xf32>, vector<8x256xf32> -> vector<72x256xf32>
    %51 = arith.truncf %50 : vector<72x256xf32> to vector<72x256xbf16>
    %cst_21 = arith.constant dense<0.000000e+00> : vector<8x256xf32>
    %52 = tpu.matmul %2, %51, %cst_21 {dimension_numbers = #tpu.dot_dimension_numbers<[1], [0], [0], [1], [0, 0, 1, 1], [], []>} : vector<8x72xbf16>, vector<72x256xbf16>, vector<8x256xf32> -> vector<8x256xf32>
    %53 = vector.broadcast %3 : vector<8x1xf32> to vector<8x256xf32>
    %54 = arith.addf %52, %53 : vector<8x256xf32>
    %cst_22 = arith.constant 0.000000e+00 : f32
    %55 = vector.broadcast %cst_22 : f32 to vector<8x17xf32>
    %56 = vector.extract_strided_slice %54 {offsets = [0, 0], sizes = [8, 239], strides = [1, 1]} : vector<8x256xf32> to vector<8x239xf32>
    %57 = tpu.concatenate %55, %56 in 1 : vector<8x17xf32>, vector<8x239xf32> -> vector<8x256xf32>
    %58 = vector.extract_strided_slice %6 {offsets = [0, 0], sizes = [1, 256], strides = [1, 1]} : vector<9x256xf32> to vector<1x256xf32>
    %59 = vector.broadcast %58 : vector<1x256xf32> to vector<8x256xf32>
    %60 = arith.mulf %57, %59 : vector<8x256xf32>
    %cst_23 = arith.constant 0.000000e+00 : f32
    %61 = vector.broadcast %cst_23 : f32 to vector<8x16xf32>
    %62 = vector.extract_strided_slice %54 {offsets = [0, 0], sizes = [8, 240], strides = [1, 1]} : vector<8x256xf32> to vector<8x240xf32>
    %63 = tpu.concatenate %61, %62 in 1 : vector<8x16xf32>, vector<8x240xf32> -> vector<8x256xf32>
    %cst_24 = arith.constant 0.000000e+00 : f32
    %64 = vector.broadcast %cst_24 : f32 to vector<8x15xf32>
    %65 = vector.extract_strided_slice %54 {offsets = [0, 0], sizes = [8, 241], strides = [1, 1]} : vector<8x256xf32> to vector<8x241xf32>
    %66 = tpu.concatenate %64, %65 in 1 : vector<8x15xf32>, vector<8x241xf32> -> vector<8x256xf32>
    %67 = vector.extract_strided_slice %6 {offsets = [2, 0], sizes = [1, 256], strides = [1, 1]} : vector<9x256xf32> to vector<1x256xf32>
    %68 = vector.broadcast %67 : vector<1x256xf32> to vector<8x256xf32>
    %69 = arith.mulf %66, %68 : vector<8x256xf32>
    %cst_25 = arith.constant 0.000000e+00 : f32
    %70 = vector.broadcast %cst_25 : f32 to vector<8x1xf32>
    %71 = vector.extract_strided_slice %54 {offsets = [0, 0], sizes = [8, 255], strides = [1, 1]} : vector<8x256xf32> to vector<8x255xf32>
    %72 = tpu.concatenate %70, %71 in 1 : vector<8x1xf32>, vector<8x255xf32> -> vector<8x256xf32>
    %73 = vector.extract_strided_slice %6 {offsets = [3, 0], sizes = [1, 256], strides = [1, 1]} : vector<9x256xf32> to vector<1x256xf32>
    %74 = vector.broadcast %73 : vector<1x256xf32> to vector<8x256xf32>
    %75 = arith.mulf %72, %74 : vector<8x256xf32>
    %cst_26 = arith.constant 0.000000e+00 : f32
    %76 = vector.broadcast %cst_26 : f32 to vector<8x1xf32>
    %77 = vector.extract_strided_slice %54 {offsets = [0, 1], sizes = [8, 255], strides = [1, 1]} : vector<8x256xf32> to vector<8x255xf32>
    %78 = tpu.concatenate %77, %76 in 1 : vector<8x255xf32>, vector<8x1xf32> -> vector<8x256xf32>
    %79 = vector.extract_strided_slice %6 {offsets = [5, 0], sizes = [1, 256], strides = [1, 1]} : vector<9x256xf32> to vector<1x256xf32>
    %80 = vector.broadcast %79 : vector<1x256xf32> to vector<8x256xf32>
    %81 = arith.mulf %78, %80 : vector<8x256xf32>
    %cst_27 = arith.constant 0.000000e+00 : f32
    %82 = vector.broadcast %cst_27 : f32 to vector<8x15xf32>
    %83 = vector.extract_strided_slice %54 {offsets = [0, 15], sizes = [8, 241], strides = [1, 1]} : vector<8x256xf32> to vector<8x241xf32>
    %84 = tpu.concatenate %83, %82 in 1 : vector<8x241xf32>, vector<8x15xf32> -> vector<8x256xf32>
    %85 = vector.extract_strided_slice %6 {offsets = [6, 0], sizes = [1, 256], strides = [1, 1]} : vector<9x256xf32> to vector<1x256xf32>
    %86 = vector.broadcast %85 : vector<1x256xf32> to vector<8x256xf32>
    %87 = arith.mulf %84, %86 : vector<8x256xf32>
    %cst_28 = arith.constant 0.000000e+00 : f32
    %88 = vector.broadcast %cst_28 : f32 to vector<8x16xf32>
    %89 = vector.extract_strided_slice %54 {offsets = [0, 16], sizes = [8, 240], strides = [1, 1]} : vector<8x256xf32> to vector<8x240xf32>
    %90 = tpu.concatenate %89, %88 in 1 : vector<8x240xf32>, vector<8x16xf32> -> vector<8x256xf32>
    %cst_29 = arith.constant 0.000000e+00 : f32
    %91 = vector.broadcast %cst_29 : f32 to vector<8x17xf32>
    %92 = vector.extract_strided_slice %54 {offsets = [0, 17], sizes = [8, 239], strides = [1, 1]} : vector<8x256xf32> to vector<8x239xf32>
    %93 = tpu.concatenate %92, %91 in 1 : vector<8x239xf32>, vector<8x17xf32> -> vector<8x256xf32>
    %94 = vector.extract_strided_slice %6 {offsets = [8, 0], sizes = [1, 256], strides = [1, 1]} : vector<9x256xf32> to vector<1x256xf32>
    %95 = vector.broadcast %94 : vector<1x256xf32> to vector<8x256xf32>
    %96 = arith.mulf %93, %95 : vector<8x256xf32>
    %97 = tpu.concatenate %60, %63, %69, %75, %54, %81, %87, %90, %96 in 0 : vector<8x256xf32>, vector<8x256xf32>, vector<8x256xf32>, vector<8x256xf32>, vector<8x256xf32>, vector<8x256xf32>, vector<8x256xf32>, vector<8x256xf32>, vector<8x256xf32> -> vector<72x256xf32>
    %98 = arith.truncf %97 : vector<72x256xf32> to vector<72x256xbf16>
    %cst_30 = arith.constant dense<0.000000e+00> : vector<8x256xf32>
    %99 = tpu.matmul %4, %98, %cst_30 {dimension_numbers = #tpu.dot_dimension_numbers<[1], [0], [0], [1], [0, 0, 1, 1], [], []>} : vector<8x72xbf16>, vector<72x256xbf16>, vector<8x256xf32> -> vector<8x256xf32>
    %100 = vector.broadcast %5 : vector<8x1xf32> to vector<8x256xf32>
    %101 = arith.addf %99, %100 : vector<8x256xf32>
    %cst_31 = arith.constant 0.000000e+00 : f32
    %102 = vector.broadcast %cst_31 : f32 to vector<8x1xf32>
    %103 = vector.extract_strided_slice %101 {offsets = [0, 1], sizes = [8, 255], strides = [1, 1]} : vector<8x256xf32> to vector<8x255xf32>
    %104 = tpu.concatenate %103, %102 in 1 : vector<8x255xf32>, vector<8x1xf32> -> vector<8x256xf32>
    %105 = arith.maximumf %101, %104 : vector<8x256xf32>
    %cst_32 = arith.constant 0.000000e+00 : f32
    %106 = vector.broadcast %cst_32 : f32 to vector<8x16xf32>
    %107 = vector.extract_strided_slice %105 {offsets = [0, 16], sizes = [8, 240], strides = [1, 1]} : vector<8x256xf32> to vector<8x240xf32>
    %108 = tpu.concatenate %107, %106 in 1 : vector<8x240xf32>, vector<8x16xf32> -> vector<8x256xf32>
    %109 = arith.maximumf %105, %108 : vector<8x256xf32>
    %110 = arith.truncf %109 : vector<8x256xf32> to vector<8x256xbf16>
    %cst_33 = arith.constant dense<0.000000e+00> : vector<8x64xf32>
    %111 = tpu.matmul %110, %7, %cst_33 {dimension_numbers = #tpu.dot_dimension_numbers<[1], [0], [0], [1], [0, 0, 1, 1], [], []>} : vector<8x256xbf16>, vector<256x64xbf16>, vector<8x64xf32> -> vector<8x64xf32>
    %c0_34 = arith.constant 0 : index
    %c0_35 = arith.constant 0 : index
    %112 = vector.load %arg8[%c0_34, %c0_35] : memref<16x72xbf16, #tpu.memory_space<vmem>>, vector<16x72xbf16>
    %c0_36 = arith.constant 0 : index
    %c0_37 = arith.constant 0 : index
    %113 = vector.load %arg9[%c0_36, %c0_37] : memref<16x1xf32, #tpu.memory_space<vmem>>, vector<16x1xf32>
    %c0_38 = arith.constant 0 : index
    %c0_39 = arith.constant 0 : index
    %114 = vector.load %arg10[%c0_38, %c0_39] : memref<16x144xbf16, #tpu.memory_space<vmem>>, vector<16x144xbf16>
    %c0_40 = arith.constant 0 : index
    %c0_41 = arith.constant 0 : index
    %115 = vector.load %arg11[%c0_40, %c0_41] : memref<16x1xf32, #tpu.memory_space<vmem>>, vector<16x1xf32>
    %c0_42 = arith.constant 0 : index
    %c0_43 = arith.constant 0 : index
    %116 = vector.load %arg12[%c0_42, %c0_43] : memref<9x64xf32, #tpu.memory_space<vmem>>, vector<9x64xf32>
    %c0_44 = arith.constant 0 : index
    %c0_45 = arith.constant 0 : index
    %117 = vector.load %arg13[%c0_44, %c0_45] : memref<64x16xbf16, #tpu.memory_space<vmem>>, vector<64x16xbf16>
    %cst_46 = arith.constant 0.000000e+00 : f32
    %118 = vector.broadcast %cst_46 : f32 to vector<8x9xf32>
    %119 = vector.extract_strided_slice %111 {offsets = [0, 0], sizes = [8, 55], strides = [1, 1]} : vector<8x64xf32> to vector<8x55xf32>
    %120 = tpu.concatenate %118, %119 in 1 : vector<8x9xf32>, vector<8x55xf32> -> vector<8x64xf32>
    %121 = vector.extract_strided_slice %116 {offsets = [0, 0], sizes = [1, 64], strides = [1, 1]} : vector<9x64xf32> to vector<1x64xf32>
    %122 = vector.broadcast %121 : vector<1x64xf32> to vector<8x64xf32>
    %123 = arith.mulf %120, %122 : vector<8x64xf32>
    %cst_47 = arith.constant 0.000000e+00 : f32
    %124 = vector.broadcast %cst_47 : f32 to vector<8x8xf32>
    %125 = vector.extract_strided_slice %111 {offsets = [0, 0], sizes = [8, 56], strides = [1, 1]} : vector<8x64xf32> to vector<8x56xf32>
    %126 = tpu.concatenate %124, %125 in 1 : vector<8x8xf32>, vector<8x56xf32> -> vector<8x64xf32>
    %cst_48 = arith.constant 0.000000e+00 : f32
    %127 = vector.broadcast %cst_48 : f32 to vector<8x7xf32>
    %128 = vector.extract_strided_slice %111 {offsets = [0, 0], sizes = [8, 57], strides = [1, 1]} : vector<8x64xf32> to vector<8x57xf32>
    %129 = tpu.concatenate %127, %128 in 1 : vector<8x7xf32>, vector<8x57xf32> -> vector<8x64xf32>
    %130 = vector.extract_strided_slice %116 {offsets = [2, 0], sizes = [1, 64], strides = [1, 1]} : vector<9x64xf32> to vector<1x64xf32>
    %131 = vector.broadcast %130 : vector<1x64xf32> to vector<8x64xf32>
    %132 = arith.mulf %129, %131 : vector<8x64xf32>
    %cst_49 = arith.constant 0.000000e+00 : f32
    %133 = vector.broadcast %cst_49 : f32 to vector<8x1xf32>
    %134 = vector.extract_strided_slice %111 {offsets = [0, 0], sizes = [8, 63], strides = [1, 1]} : vector<8x64xf32> to vector<8x63xf32>
    %135 = tpu.concatenate %133, %134 in 1 : vector<8x1xf32>, vector<8x63xf32> -> vector<8x64xf32>
    %136 = vector.extract_strided_slice %116 {offsets = [3, 0], sizes = [1, 64], strides = [1, 1]} : vector<9x64xf32> to vector<1x64xf32>
    %137 = vector.broadcast %136 : vector<1x64xf32> to vector<8x64xf32>
    %138 = arith.mulf %135, %137 : vector<8x64xf32>
    %cst_50 = arith.constant 0.000000e+00 : f32
    %139 = vector.broadcast %cst_50 : f32 to vector<8x1xf32>
    %140 = vector.extract_strided_slice %111 {offsets = [0, 1], sizes = [8, 63], strides = [1, 1]} : vector<8x64xf32> to vector<8x63xf32>
    %141 = tpu.concatenate %140, %139 in 1 : vector<8x63xf32>, vector<8x1xf32> -> vector<8x64xf32>
    %142 = vector.extract_strided_slice %116 {offsets = [5, 0], sizes = [1, 64], strides = [1, 1]} : vector<9x64xf32> to vector<1x64xf32>
    %143 = vector.broadcast %142 : vector<1x64xf32> to vector<8x64xf32>
    %144 = arith.mulf %141, %143 : vector<8x64xf32>
    %cst_51 = arith.constant 0.000000e+00 : f32
    %145 = vector.broadcast %cst_51 : f32 to vector<8x7xf32>
    %146 = vector.extract_strided_slice %111 {offsets = [0, 7], sizes = [8, 57], strides = [1, 1]} : vector<8x64xf32> to vector<8x57xf32>
    %147 = tpu.concatenate %146, %145 in 1 : vector<8x57xf32>, vector<8x7xf32> -> vector<8x64xf32>
    %148 = vector.extract_strided_slice %116 {offsets = [6, 0], sizes = [1, 64], strides = [1, 1]} : vector<9x64xf32> to vector<1x64xf32>
    %149 = vector.broadcast %148 : vector<1x64xf32> to vector<8x64xf32>
    %150 = arith.mulf %147, %149 : vector<8x64xf32>
    %cst_52 = arith.constant 0.000000e+00 : f32
    %151 = vector.broadcast %cst_52 : f32 to vector<8x8xf32>
    %152 = vector.extract_strided_slice %111 {offsets = [0, 8], sizes = [8, 56], strides = [1, 1]} : vector<8x64xf32> to vector<8x56xf32>
    %153 = tpu.concatenate %152, %151 in 1 : vector<8x56xf32>, vector<8x8xf32> -> vector<8x64xf32>
    %cst_53 = arith.constant 0.000000e+00 : f32
    %154 = vector.broadcast %cst_53 : f32 to vector<8x9xf32>
    %155 = vector.extract_strided_slice %111 {offsets = [0, 9], sizes = [8, 55], strides = [1, 1]} : vector<8x64xf32> to vector<8x55xf32>
    %156 = tpu.concatenate %155, %154 in 1 : vector<8x55xf32>, vector<8x9xf32> -> vector<8x64xf32>
    %157 = vector.extract_strided_slice %116 {offsets = [8, 0], sizes = [1, 64], strides = [1, 1]} : vector<9x64xf32> to vector<1x64xf32>
    %158 = vector.broadcast %157 : vector<1x64xf32> to vector<8x64xf32>
    %159 = arith.mulf %156, %158 : vector<8x64xf32>
    %160 = tpu.concatenate %123, %126, %132, %138, %111, %144, %150, %153, %159 in 0 : vector<8x64xf32>, vector<8x64xf32>, vector<8x64xf32>, vector<8x64xf32>, vector<8x64xf32>, vector<8x64xf32>, vector<8x64xf32>, vector<8x64xf32>, vector<8x64xf32> -> vector<72x64xf32>
    %161 = arith.truncf %160 : vector<72x64xf32> to vector<72x64xbf16>
    %cst_54 = arith.constant dense<0.000000e+00> : vector<16x64xf32>
    %162 = tpu.matmul %112, %161, %cst_54 {dimension_numbers = #tpu.dot_dimension_numbers<[1], [0], [0], [1], [0, 0, 1, 1], [], []>} : vector<16x72xbf16>, vector<72x64xbf16>, vector<16x64xf32> -> vector<16x64xf32>
    %163 = vector.broadcast %113 : vector<16x1xf32> to vector<16x64xf32>
    %164 = arith.addf %162, %163 : vector<16x64xf32>
    %cst_55 = arith.constant 0.000000e+00 : f32
    %165 = vector.broadcast %cst_55 : f32 to vector<16x9xf32>
    %166 = vector.extract_strided_slice %164 {offsets = [0, 0], sizes = [16, 55], strides = [1, 1]} : vector<16x64xf32> to vector<16x55xf32>
    %167 = tpu.concatenate %165, %166 in 1 : vector<16x9xf32>, vector<16x55xf32> -> vector<16x64xf32>
    %168 = vector.extract_strided_slice %116 {offsets = [0, 0], sizes = [1, 64], strides = [1, 1]} : vector<9x64xf32> to vector<1x64xf32>
    %169 = vector.broadcast %168 : vector<1x64xf32> to vector<16x64xf32>
    %170 = arith.mulf %167, %169 : vector<16x64xf32>
    %cst_56 = arith.constant 0.000000e+00 : f32
    %171 = vector.broadcast %cst_56 : f32 to vector<16x8xf32>
    %172 = vector.extract_strided_slice %164 {offsets = [0, 0], sizes = [16, 56], strides = [1, 1]} : vector<16x64xf32> to vector<16x56xf32>
    %173 = tpu.concatenate %171, %172 in 1 : vector<16x8xf32>, vector<16x56xf32> -> vector<16x64xf32>
    %cst_57 = arith.constant 0.000000e+00 : f32
    %174 = vector.broadcast %cst_57 : f32 to vector<16x7xf32>
    %175 = vector.extract_strided_slice %164 {offsets = [0, 0], sizes = [16, 57], strides = [1, 1]} : vector<16x64xf32> to vector<16x57xf32>
    %176 = tpu.concatenate %174, %175 in 1 : vector<16x7xf32>, vector<16x57xf32> -> vector<16x64xf32>
    %177 = vector.extract_strided_slice %116 {offsets = [2, 0], sizes = [1, 64], strides = [1, 1]} : vector<9x64xf32> to vector<1x64xf32>
    %178 = vector.broadcast %177 : vector<1x64xf32> to vector<16x64xf32>
    %179 = arith.mulf %176, %178 : vector<16x64xf32>
    %cst_58 = arith.constant 0.000000e+00 : f32
    %180 = vector.broadcast %cst_58 : f32 to vector<16x1xf32>
    %181 = vector.extract_strided_slice %164 {offsets = [0, 0], sizes = [16, 63], strides = [1, 1]} : vector<16x64xf32> to vector<16x63xf32>
    %182 = tpu.concatenate %180, %181 in 1 : vector<16x1xf32>, vector<16x63xf32> -> vector<16x64xf32>
    %183 = vector.extract_strided_slice %116 {offsets = [3, 0], sizes = [1, 64], strides = [1, 1]} : vector<9x64xf32> to vector<1x64xf32>
    %184 = vector.broadcast %183 : vector<1x64xf32> to vector<16x64xf32>
    %185 = arith.mulf %182, %184 : vector<16x64xf32>
    %cst_59 = arith.constant 0.000000e+00 : f32
    %186 = vector.broadcast %cst_59 : f32 to vector<16x1xf32>
    %187 = vector.extract_strided_slice %164 {offsets = [0, 1], sizes = [16, 63], strides = [1, 1]} : vector<16x64xf32> to vector<16x63xf32>
    %188 = tpu.concatenate %187, %186 in 1 : vector<16x63xf32>, vector<16x1xf32> -> vector<16x64xf32>
    %189 = vector.extract_strided_slice %116 {offsets = [5, 0], sizes = [1, 64], strides = [1, 1]} : vector<9x64xf32> to vector<1x64xf32>
    %190 = vector.broadcast %189 : vector<1x64xf32> to vector<16x64xf32>
    %191 = arith.mulf %188, %190 : vector<16x64xf32>
    %cst_60 = arith.constant 0.000000e+00 : f32
    %192 = vector.broadcast %cst_60 : f32 to vector<16x7xf32>
    %193 = vector.extract_strided_slice %164 {offsets = [0, 7], sizes = [16, 57], strides = [1, 1]} : vector<16x64xf32> to vector<16x57xf32>
    %194 = tpu.concatenate %193, %192 in 1 : vector<16x57xf32>, vector<16x7xf32> -> vector<16x64xf32>
    %195 = vector.extract_strided_slice %116 {offsets = [6, 0], sizes = [1, 64], strides = [1, 1]} : vector<9x64xf32> to vector<1x64xf32>
    %196 = vector.broadcast %195 : vector<1x64xf32> to vector<16x64xf32>
    %197 = arith.mulf %194, %196 : vector<16x64xf32>
    %cst_61 = arith.constant 0.000000e+00 : f32
    %198 = vector.broadcast %cst_61 : f32 to vector<16x8xf32>
    %199 = vector.extract_strided_slice %164 {offsets = [0, 8], sizes = [16, 56], strides = [1, 1]} : vector<16x64xf32> to vector<16x56xf32>
    %200 = tpu.concatenate %199, %198 in 1 : vector<16x56xf32>, vector<16x8xf32> -> vector<16x64xf32>
    %cst_62 = arith.constant 0.000000e+00 : f32
    %201 = vector.broadcast %cst_62 : f32 to vector<16x9xf32>
    %202 = vector.extract_strided_slice %164 {offsets = [0, 9], sizes = [16, 55], strides = [1, 1]} : vector<16x64xf32> to vector<16x55xf32>
    %203 = tpu.concatenate %202, %201 in 1 : vector<16x55xf32>, vector<16x9xf32> -> vector<16x64xf32>
    %204 = vector.extract_strided_slice %116 {offsets = [8, 0], sizes = [1, 64], strides = [1, 1]} : vector<9x64xf32> to vector<1x64xf32>
    %205 = vector.broadcast %204 : vector<1x64xf32> to vector<16x64xf32>
    %206 = arith.mulf %203, %205 : vector<16x64xf32>
    %207 = tpu.concatenate %170, %173, %179, %185, %164, %191, %197, %200, %206 in 0 : vector<16x64xf32>, vector<16x64xf32>, vector<16x64xf32>, vector<16x64xf32>, vector<16x64xf32>, vector<16x64xf32>, vector<16x64xf32>, vector<16x64xf32>, vector<16x64xf32> -> vector<144x64xf32>
    %208 = arith.truncf %207 : vector<144x64xf32> to vector<144x64xbf16>
    %cst_63 = arith.constant dense<0.000000e+00> : vector<16x64xf32>
    %209 = tpu.matmul %114, %208, %cst_63 {dimension_numbers = #tpu.dot_dimension_numbers<[1], [0], [0], [1], [0, 0, 1, 1], [], []>} : vector<16x144xbf16>, vector<144x64xbf16>, vector<16x64xf32> -> vector<16x64xf32>
    %210 = vector.broadcast %115 : vector<16x1xf32> to vector<16x64xf32>
    %211 = arith.addf %209, %210 : vector<16x64xf32>
    %cst_64 = arith.constant 0.000000e+00 : f32
    %212 = vector.broadcast %cst_64 : f32 to vector<16x1xf32>
    %213 = vector.extract_strided_slice %211 {offsets = [0, 1], sizes = [16, 63], strides = [1, 1]} : vector<16x64xf32> to vector<16x63xf32>
    %214 = tpu.concatenate %213, %212 in 1 : vector<16x63xf32>, vector<16x1xf32> -> vector<16x64xf32>
    %215 = arith.maximumf %211, %214 : vector<16x64xf32>
    %cst_65 = arith.constant 0.000000e+00 : f32
    %216 = vector.broadcast %cst_65 : f32 to vector<16x8xf32>
    %217 = vector.extract_strided_slice %215 {offsets = [0, 8], sizes = [16, 56], strides = [1, 1]} : vector<16x64xf32> to vector<16x56xf32>
    %218 = tpu.concatenate %217, %216 in 1 : vector<16x56xf32>, vector<16x8xf32> -> vector<16x64xf32>
    %219 = arith.maximumf %215, %218 : vector<16x64xf32>
    %220 = arith.truncf %219 : vector<16x64xf32> to vector<16x64xbf16>
    %cst_66 = arith.constant dense<0.000000e+00> : vector<16x16xf32>
    %221 = tpu.matmul %220, %117, %cst_66 {dimension_numbers = #tpu.dot_dimension_numbers<[1], [0], [0], [1], [0, 0, 1, 1], [], []>} : vector<16x64xbf16>, vector<64x16xbf16>, vector<16x16xf32> -> vector<16x16xf32>
    %c0_67 = arith.constant 0 : index
    %c0_68 = arith.constant 0 : index
    %222 = vector.load %arg14[%c0_67, %c0_68] : memref<16x144xbf16, #tpu.memory_space<vmem>>, vector<16x144xbf16>
    %c0_69 = arith.constant 0 : index
    %c0_70 = arith.constant 0 : index
    %223 = vector.load %arg15[%c0_69, %c0_70] : memref<16x1xf32, #tpu.memory_space<vmem>>, vector<16x1xf32>
    %c0_71 = arith.constant 0 : index
    %c0_72 = arith.constant 0 : index
    %224 = vector.load %arg16[%c0_71, %c0_72] : memref<16x144xbf16, #tpu.memory_space<vmem>>, vector<16x144xbf16>
    %c0_73 = arith.constant 0 : index
    %c0_74 = arith.constant 0 : index
    %225 = vector.load %arg17[%c0_73, %c0_74] : memref<16x1xf32, #tpu.memory_space<vmem>>, vector<16x1xf32>
    %c0_75 = arith.constant 0 : index
    %c0_76 = arith.constant 0 : index
    %226 = vector.load %arg18[%c0_75, %c0_76] : memref<9x16xf32, #tpu.memory_space<vmem>>, vector<9x16xf32>
    %c0_77 = arith.constant 0 : index
    %c0_78 = arith.constant 0 : index
    %227 = vector.load %arg19[%c0_77, %c0_78] : memref<16x4xbf16, #tpu.memory_space<vmem>>, vector<16x4xbf16>
    %cst_79 = arith.constant 0.000000e+00 : f32
    %228 = vector.broadcast %cst_79 : f32 to vector<16x5xf32>
    %229 = vector.extract_strided_slice %221 {offsets = [0, 0], sizes = [16, 11], strides = [1, 1]} : vector<16x16xf32> to vector<16x11xf32>
    %230 = tpu.concatenate %228, %229 in 1 : vector<16x5xf32>, vector<16x11xf32> -> vector<16x16xf32>
    %231 = vector.extract_strided_slice %226 {offsets = [0, 0], sizes = [1, 16], strides = [1, 1]} : vector<9x16xf32> to vector<1x16xf32>
    %232 = vector.broadcast %231 : vector<1x16xf32> to vector<16x16xf32>
    %233 = arith.mulf %230, %232 : vector<16x16xf32>
    %cst_80 = arith.constant 0.000000e+00 : f32
    %234 = vector.broadcast %cst_80 : f32 to vector<16x4xf32>
    %235 = vector.extract_strided_slice %221 {offsets = [0, 0], sizes = [16, 12], strides = [1, 1]} : vector<16x16xf32> to vector<16x12xf32>
    %236 = tpu.concatenate %234, %235 in 1 : vector<16x4xf32>, vector<16x12xf32> -> vector<16x16xf32>
    %cst_81 = arith.constant 0.000000e+00 : f32
    %237 = vector.broadcast %cst_81 : f32 to vector<16x3xf32>
    %238 = vector.extract_strided_slice %221 {offsets = [0, 0], sizes = [16, 13], strides = [1, 1]} : vector<16x16xf32> to vector<16x13xf32>
    %239 = tpu.concatenate %237, %238 in 1 : vector<16x3xf32>, vector<16x13xf32> -> vector<16x16xf32>
    %240 = vector.extract_strided_slice %226 {offsets = [2, 0], sizes = [1, 16], strides = [1, 1]} : vector<9x16xf32> to vector<1x16xf32>
    %241 = vector.broadcast %240 : vector<1x16xf32> to vector<16x16xf32>
    %242 = arith.mulf %239, %241 : vector<16x16xf32>
    %cst_82 = arith.constant 0.000000e+00 : f32
    %243 = vector.broadcast %cst_82 : f32 to vector<16x1xf32>
    %244 = vector.extract_strided_slice %221 {offsets = [0, 0], sizes = [16, 15], strides = [1, 1]} : vector<16x16xf32> to vector<16x15xf32>
    %245 = tpu.concatenate %243, %244 in 1 : vector<16x1xf32>, vector<16x15xf32> -> vector<16x16xf32>
    %246 = vector.extract_strided_slice %226 {offsets = [3, 0], sizes = [1, 16], strides = [1, 1]} : vector<9x16xf32> to vector<1x16xf32>
    %247 = vector.broadcast %246 : vector<1x16xf32> to vector<16x16xf32>
    %248 = arith.mulf %245, %247 : vector<16x16xf32>
    %cst_83 = arith.constant 0.000000e+00 : f32
    %249 = vector.broadcast %cst_83 : f32 to vector<16x1xf32>
    %250 = vector.extract_strided_slice %221 {offsets = [0, 1], sizes = [16, 15], strides = [1, 1]} : vector<16x16xf32> to vector<16x15xf32>
    %251 = tpu.concatenate %250, %249 in 1 : vector<16x15xf32>, vector<16x1xf32> -> vector<16x16xf32>
    %252 = vector.extract_strided_slice %226 {offsets = [5, 0], sizes = [1, 16], strides = [1, 1]} : vector<9x16xf32> to vector<1x16xf32>
    %253 = vector.broadcast %252 : vector<1x16xf32> to vector<16x16xf32>
    %254 = arith.mulf %251, %253 : vector<16x16xf32>
    %cst_84 = arith.constant 0.000000e+00 : f32
    %255 = vector.broadcast %cst_84 : f32 to vector<16x3xf32>
    %256 = vector.extract_strided_slice %221 {offsets = [0, 3], sizes = [16, 13], strides = [1, 1]} : vector<16x16xf32> to vector<16x13xf32>
    %257 = tpu.concatenate %256, %255 in 1 : vector<16x13xf32>, vector<16x3xf32> -> vector<16x16xf32>
    %258 = vector.extract_strided_slice %226 {offsets = [6, 0], sizes = [1, 16], strides = [1, 1]} : vector<9x16xf32> to vector<1x16xf32>
    %259 = vector.broadcast %258 : vector<1x16xf32> to vector<16x16xf32>
    %260 = arith.mulf %257, %259 : vector<16x16xf32>
    %cst_85 = arith.constant 0.000000e+00 : f32
    %261 = vector.broadcast %cst_85 : f32 to vector<16x4xf32>
    %262 = vector.extract_strided_slice %221 {offsets = [0, 4], sizes = [16, 12], strides = [1, 1]} : vector<16x16xf32> to vector<16x12xf32>
    %263 = tpu.concatenate %262, %261 in 1 : vector<16x12xf32>, vector<16x4xf32> -> vector<16x16xf32>
    %cst_86 = arith.constant 0.000000e+00 : f32
    %264 = vector.broadcast %cst_86 : f32 to vector<16x5xf32>
    %265 = vector.extract_strided_slice %221 {offsets = [0, 5], sizes = [16, 11], strides = [1, 1]} : vector<16x16xf32> to vector<16x11xf32>
    %266 = tpu.concatenate %265, %264 in 1 : vector<16x11xf32>, vector<16x5xf32> -> vector<16x16xf32>
    %267 = vector.extract_strided_slice %226 {offsets = [8, 0], sizes = [1, 16], strides = [1, 1]} : vector<9x16xf32> to vector<1x16xf32>
    %268 = vector.broadcast %267 : vector<1x16xf32> to vector<16x16xf32>
    %269 = arith.mulf %266, %268 : vector<16x16xf32>
    %270 = tpu.concatenate %233, %236, %242, %248, %221, %254, %260, %263, %269 in 0 : vector<16x16xf32>, vector<16x16xf32>, vector<16x16xf32>, vector<16x16xf32>, vector<16x16xf32>, vector<16x16xf32>, vector<16x16xf32>, vector<16x16xf32>, vector<16x16xf32> -> vector<144x16xf32>
    %271 = arith.truncf %270 : vector<144x16xf32> to vector<144x16xbf16>
    %cst_87 = arith.constant dense<0.000000e+00> : vector<16x16xf32>
    %272 = tpu.matmul %222, %271, %cst_87 {dimension_numbers = #tpu.dot_dimension_numbers<[1], [0], [0], [1], [0, 0, 1, 1], [], []>} : vector<16x144xbf16>, vector<144x16xbf16>, vector<16x16xf32> -> vector<16x16xf32>
    %273 = vector.broadcast %223 : vector<16x1xf32> to vector<16x16xf32>
    %274 = arith.addf %272, %273 : vector<16x16xf32>
    %cst_88 = arith.constant 0.000000e+00 : f32
    %275 = vector.broadcast %cst_88 : f32 to vector<16x5xf32>
    %276 = vector.extract_strided_slice %274 {offsets = [0, 0], sizes = [16, 11], strides = [1, 1]} : vector<16x16xf32> to vector<16x11xf32>
    %277 = tpu.concatenate %275, %276 in 1 : vector<16x5xf32>, vector<16x11xf32> -> vector<16x16xf32>
    %278 = vector.extract_strided_slice %226 {offsets = [0, 0], sizes = [1, 16], strides = [1, 1]} : vector<9x16xf32> to vector<1x16xf32>
    %279 = vector.broadcast %278 : vector<1x16xf32> to vector<16x16xf32>
    %280 = arith.mulf %277, %279 : vector<16x16xf32>
    %cst_89 = arith.constant 0.000000e+00 : f32
    %281 = vector.broadcast %cst_89 : f32 to vector<16x4xf32>
    %282 = vector.extract_strided_slice %274 {offsets = [0, 0], sizes = [16, 12], strides = [1, 1]} : vector<16x16xf32> to vector<16x12xf32>
    %283 = tpu.concatenate %281, %282 in 1 : vector<16x4xf32>, vector<16x12xf32> -> vector<16x16xf32>
    %cst_90 = arith.constant 0.000000e+00 : f32
    %284 = vector.broadcast %cst_90 : f32 to vector<16x3xf32>
    %285 = vector.extract_strided_slice %274 {offsets = [0, 0], sizes = [16, 13], strides = [1, 1]} : vector<16x16xf32> to vector<16x13xf32>
    %286 = tpu.concatenate %284, %285 in 1 : vector<16x3xf32>, vector<16x13xf32> -> vector<16x16xf32>
    %287 = vector.extract_strided_slice %226 {offsets = [2, 0], sizes = [1, 16], strides = [1, 1]} : vector<9x16xf32> to vector<1x16xf32>
    %288 = vector.broadcast %287 : vector<1x16xf32> to vector<16x16xf32>
    %289 = arith.mulf %286, %288 : vector<16x16xf32>
    %cst_91 = arith.constant 0.000000e+00 : f32
    %290 = vector.broadcast %cst_91 : f32 to vector<16x1xf32>
    %291 = vector.extract_strided_slice %274 {offsets = [0, 0], sizes = [16, 15], strides = [1, 1]} : vector<16x16xf32> to vector<16x15xf32>
    %292 = tpu.concatenate %290, %291 in 1 : vector<16x1xf32>, vector<16x15xf32> -> vector<16x16xf32>
    %293 = vector.extract_strided_slice %226 {offsets = [3, 0], sizes = [1, 16], strides = [1, 1]} : vector<9x16xf32> to vector<1x16xf32>
    %294 = vector.broadcast %293 : vector<1x16xf32> to vector<16x16xf32>
    %295 = arith.mulf %292, %294 : vector<16x16xf32>
    %cst_92 = arith.constant 0.000000e+00 : f32
    %296 = vector.broadcast %cst_92 : f32 to vector<16x1xf32>
    %297 = vector.extract_strided_slice %274 {offsets = [0, 1], sizes = [16, 15], strides = [1, 1]} : vector<16x16xf32> to vector<16x15xf32>
    %298 = tpu.concatenate %297, %296 in 1 : vector<16x15xf32>, vector<16x1xf32> -> vector<16x16xf32>
    %299 = vector.extract_strided_slice %226 {offsets = [5, 0], sizes = [1, 16], strides = [1, 1]} : vector<9x16xf32> to vector<1x16xf32>
    %300 = vector.broadcast %299 : vector<1x16xf32> to vector<16x16xf32>
    %301 = arith.mulf %298, %300 : vector<16x16xf32>
    %cst_93 = arith.constant 0.000000e+00 : f32
    %302 = vector.broadcast %cst_93 : f32 to vector<16x3xf32>
    %303 = vector.extract_strided_slice %274 {offsets = [0, 3], sizes = [16, 13], strides = [1, 1]} : vector<16x16xf32> to vector<16x13xf32>
    %304 = tpu.concatenate %303, %302 in 1 : vector<16x13xf32>, vector<16x3xf32> -> vector<16x16xf32>
    %305 = vector.extract_strided_slice %226 {offsets = [6, 0], sizes = [1, 16], strides = [1, 1]} : vector<9x16xf32> to vector<1x16xf32>
    %306 = vector.broadcast %305 : vector<1x16xf32> to vector<16x16xf32>
    %307 = arith.mulf %304, %306 : vector<16x16xf32>
    %cst_94 = arith.constant 0.000000e+00 : f32
    %308 = vector.broadcast %cst_94 : f32 to vector<16x4xf32>
    %309 = vector.extract_strided_slice %274 {offsets = [0, 4], sizes = [16, 12], strides = [1, 1]} : vector<16x16xf32> to vector<16x12xf32>
    %310 = tpu.concatenate %309, %308 in 1 : vector<16x12xf32>, vector<16x4xf32> -> vector<16x16xf32>
    %cst_95 = arith.constant 0.000000e+00 : f32
    %311 = vector.broadcast %cst_95 : f32 to vector<16x5xf32>
    %312 = vector.extract_strided_slice %274 {offsets = [0, 5], sizes = [16, 11], strides = [1, 1]} : vector<16x16xf32> to vector<16x11xf32>
    %313 = tpu.concatenate %312, %311 in 1 : vector<16x11xf32>, vector<16x5xf32> -> vector<16x16xf32>
    %314 = vector.extract_strided_slice %226 {offsets = [8, 0], sizes = [1, 16], strides = [1, 1]} : vector<9x16xf32> to vector<1x16xf32>
    %315 = vector.broadcast %314 : vector<1x16xf32> to vector<16x16xf32>
    %316 = arith.mulf %313, %315 : vector<16x16xf32>
    %317 = tpu.concatenate %280, %283, %289, %295, %274, %301, %307, %310, %316 in 0 : vector<16x16xf32>, vector<16x16xf32>, vector<16x16xf32>, vector<16x16xf32>, vector<16x16xf32>, vector<16x16xf32>, vector<16x16xf32>, vector<16x16xf32>, vector<16x16xf32> -> vector<144x16xf32>
    %318 = arith.truncf %317 : vector<144x16xf32> to vector<144x16xbf16>
    %cst_96 = arith.constant dense<0.000000e+00> : vector<16x16xf32>
    %319 = tpu.matmul %224, %318, %cst_96 {dimension_numbers = #tpu.dot_dimension_numbers<[1], [0], [0], [1], [0, 0, 1, 1], [], []>} : vector<16x144xbf16>, vector<144x16xbf16>, vector<16x16xf32> -> vector<16x16xf32>
    %320 = vector.broadcast %225 : vector<16x1xf32> to vector<16x16xf32>
    %321 = arith.addf %319, %320 : vector<16x16xf32>
    %cst_97 = arith.constant 0.000000e+00 : f32
    %322 = vector.broadcast %cst_97 : f32 to vector<16x1xf32>
    %323 = vector.extract_strided_slice %321 {offsets = [0, 1], sizes = [16, 15], strides = [1, 1]} : vector<16x16xf32> to vector<16x15xf32>
    %324 = tpu.concatenate %323, %322 in 1 : vector<16x15xf32>, vector<16x1xf32> -> vector<16x16xf32>
    %325 = arith.maximumf %321, %324 : vector<16x16xf32>
    %cst_98 = arith.constant 0.000000e+00 : f32
    %326 = vector.broadcast %cst_98 : f32 to vector<16x4xf32>
    %327 = vector.extract_strided_slice %325 {offsets = [0, 4], sizes = [16, 12], strides = [1, 1]} : vector<16x16xf32> to vector<16x12xf32>
    %328 = tpu.concatenate %327, %326 in 1 : vector<16x12xf32>, vector<16x4xf32> -> vector<16x16xf32>
    %329 = arith.maximumf %325, %328 : vector<16x16xf32>
    %330 = arith.truncf %329 : vector<16x16xf32> to vector<16x16xbf16>
    %cst_99 = arith.constant dense<0.000000e+00> : vector<16x4xf32>
    %331 = tpu.matmul %330, %227, %cst_99 {dimension_numbers = #tpu.dot_dimension_numbers<[1], [0], [0], [1], [0, 0, 1, 1], [], []>} : vector<16x16xbf16>, vector<16x4xbf16>, vector<16x4xf32> -> vector<16x4xf32>
    %c0_100 = arith.constant 0 : index
    %c0_101 = arith.constant 0 : index
    %332 = vector.load %arg20[%c0_100, %c0_101] : memref<32x144xbf16, #tpu.memory_space<vmem>>, vector<32x144xbf16>
    %c0_102 = arith.constant 0 : index
    %c0_103 = arith.constant 0 : index
    %333 = vector.load %arg21[%c0_102, %c0_103] : memref<32x1xf32, #tpu.memory_space<vmem>>, vector<32x1xf32>
    %c0_104 = arith.constant 0 : index
    %c0_105 = arith.constant 0 : index
    %334 = vector.load %arg22[%c0_104, %c0_105] : memref<32x288xbf16, #tpu.memory_space<vmem>>, vector<32x288xbf16>
    %c0_106 = arith.constant 0 : index
    %c0_107 = arith.constant 0 : index
    %335 = vector.load %arg23[%c0_106, %c0_107] : memref<32x1xf32, #tpu.memory_space<vmem>>, vector<32x1xf32>
    %c0_108 = arith.constant 0 : index
    %c0_109 = arith.constant 0 : index
    %336 = vector.load %arg24[%c0_108, %c0_109] : memref<9x4xf32, #tpu.memory_space<vmem>>, vector<9x4xf32>
    %c0_110 = arith.constant 0 : index
    %c0_111 = arith.constant 0 : index
    %337 = vector.load %arg25[%c0_110, %c0_111] : memref<4x1xbf16, #tpu.memory_space<vmem>>, vector<4x1xbf16>
    %cst_112 = arith.constant 0.000000e+00 : f32
    %338 = vector.broadcast %cst_112 : f32 to vector<16x3xf32>
    %339 = vector.extract_strided_slice %331 {offsets = [0, 0], sizes = [16, 1], strides = [1, 1]} : vector<16x4xf32> to vector<16x1xf32>
    %340 = tpu.concatenate %338, %339 in 1 : vector<16x3xf32>, vector<16x1xf32> -> vector<16x4xf32>
    %341 = vector.extract_strided_slice %336 {offsets = [0, 0], sizes = [1, 4], strides = [1, 1]} : vector<9x4xf32> to vector<1x4xf32>
    %342 = vector.broadcast %341 : vector<1x4xf32> to vector<16x4xf32>
    %343 = arith.mulf %340, %342 : vector<16x4xf32>
    %cst_113 = arith.constant 0.000000e+00 : f32
    %344 = vector.broadcast %cst_113 : f32 to vector<16x2xf32>
    %345 = vector.extract_strided_slice %331 {offsets = [0, 0], sizes = [16, 2], strides = [1, 1]} : vector<16x4xf32> to vector<16x2xf32>
    %346 = tpu.concatenate %344, %345 in 1 : vector<16x2xf32>, vector<16x2xf32> -> vector<16x4xf32>
    %cst_114 = arith.constant 0.000000e+00 : f32
    %347 = vector.broadcast %cst_114 : f32 to vector<16x1xf32>
    %348 = vector.extract_strided_slice %331 {offsets = [0, 0], sizes = [16, 3], strides = [1, 1]} : vector<16x4xf32> to vector<16x3xf32>
    %349 = tpu.concatenate %347, %348 in 1 : vector<16x1xf32>, vector<16x3xf32> -> vector<16x4xf32>
    %350 = vector.extract_strided_slice %336 {offsets = [2, 0], sizes = [1, 4], strides = [1, 1]} : vector<9x4xf32> to vector<1x4xf32>
    %351 = vector.broadcast %350 : vector<1x4xf32> to vector<16x4xf32>
    %352 = arith.mulf %349, %351 : vector<16x4xf32>
    %cst_115 = arith.constant 0.000000e+00 : f32
    %353 = vector.broadcast %cst_115 : f32 to vector<16x1xf32>
    %354 = vector.extract_strided_slice %331 {offsets = [0, 0], sizes = [16, 3], strides = [1, 1]} : vector<16x4xf32> to vector<16x3xf32>
    %355 = tpu.concatenate %353, %354 in 1 : vector<16x1xf32>, vector<16x3xf32> -> vector<16x4xf32>
    %356 = vector.extract_strided_slice %336 {offsets = [3, 0], sizes = [1, 4], strides = [1, 1]} : vector<9x4xf32> to vector<1x4xf32>
    %357 = vector.broadcast %356 : vector<1x4xf32> to vector<16x4xf32>
    %358 = arith.mulf %355, %357 : vector<16x4xf32>
    %cst_116 = arith.constant 0.000000e+00 : f32
    %359 = vector.broadcast %cst_116 : f32 to vector<16x1xf32>
    %360 = vector.extract_strided_slice %331 {offsets = [0, 1], sizes = [16, 3], strides = [1, 1]} : vector<16x4xf32> to vector<16x3xf32>
    %361 = tpu.concatenate %360, %359 in 1 : vector<16x3xf32>, vector<16x1xf32> -> vector<16x4xf32>
    %362 = vector.extract_strided_slice %336 {offsets = [5, 0], sizes = [1, 4], strides = [1, 1]} : vector<9x4xf32> to vector<1x4xf32>
    %363 = vector.broadcast %362 : vector<1x4xf32> to vector<16x4xf32>
    %364 = arith.mulf %361, %363 : vector<16x4xf32>
    %cst_117 = arith.constant 0.000000e+00 : f32
    %365 = vector.broadcast %cst_117 : f32 to vector<16x1xf32>
    %366 = vector.extract_strided_slice %331 {offsets = [0, 1], sizes = [16, 3], strides = [1, 1]} : vector<16x4xf32> to vector<16x3xf32>
    %367 = tpu.concatenate %366, %365 in 1 : vector<16x3xf32>, vector<16x1xf32> -> vector<16x4xf32>
    %368 = vector.extract_strided_slice %336 {offsets = [6, 0], sizes = [1, 4], strides = [1, 1]} : vector<9x4xf32> to vector<1x4xf32>
    %369 = vector.broadcast %368 : vector<1x4xf32> to vector<16x4xf32>
    %370 = arith.mulf %367, %369 : vector<16x4xf32>
    %cst_118 = arith.constant 0.000000e+00 : f32
    %371 = vector.broadcast %cst_118 : f32 to vector<16x2xf32>
    %372 = vector.extract_strided_slice %331 {offsets = [0, 2], sizes = [16, 2], strides = [1, 1]} : vector<16x4xf32> to vector<16x2xf32>
    %373 = tpu.concatenate %372, %371 in 1 : vector<16x2xf32>, vector<16x2xf32> -> vector<16x4xf32>
    %cst_119 = arith.constant 0.000000e+00 : f32
    %374 = vector.broadcast %cst_119 : f32 to vector<16x3xf32>
    %375 = vector.extract_strided_slice %331 {offsets = [0, 3], sizes = [16, 1], strides = [1, 1]} : vector<16x4xf32> to vector<16x1xf32>
    %376 = tpu.concatenate %375, %374 in 1 : vector<16x1xf32>, vector<16x3xf32> -> vector<16x4xf32>
    %377 = vector.extract_strided_slice %336 {offsets = [8, 0], sizes = [1, 4], strides = [1, 1]} : vector<9x4xf32> to vector<1x4xf32>
    %378 = vector.broadcast %377 : vector<1x4xf32> to vector<16x4xf32>
    %379 = arith.mulf %376, %378 : vector<16x4xf32>
    %380 = tpu.concatenate %343, %346, %352, %358, %331, %364, %370, %373, %379 in 0 : vector<16x4xf32>, vector<16x4xf32>, vector<16x4xf32>, vector<16x4xf32>, vector<16x4xf32>, vector<16x4xf32>, vector<16x4xf32>, vector<16x4xf32>, vector<16x4xf32> -> vector<144x4xf32>
    %381 = arith.truncf %380 : vector<144x4xf32> to vector<144x4xbf16>
    %cst_120 = arith.constant dense<0.000000e+00> : vector<32x4xf32>
    %382 = tpu.matmul %332, %381, %cst_120 {dimension_numbers = #tpu.dot_dimension_numbers<[1], [0], [0], [1], [0, 0, 1, 1], [], []>} : vector<32x144xbf16>, vector<144x4xbf16>, vector<32x4xf32> -> vector<32x4xf32>
    %383 = vector.broadcast %333 : vector<32x1xf32> to vector<32x4xf32>
    %384 = arith.addf %382, %383 : vector<32x4xf32>
    %cst_121 = arith.constant 0.000000e+00 : f32
    %385 = vector.broadcast %cst_121 : f32 to vector<32x3xf32>
    %386 = vector.extract_strided_slice %384 {offsets = [0, 0], sizes = [32, 1], strides = [1, 1]} : vector<32x4xf32> to vector<32x1xf32>
    %387 = tpu.concatenate %385, %386 in 1 : vector<32x3xf32>, vector<32x1xf32> -> vector<32x4xf32>
    %388 = vector.extract_strided_slice %336 {offsets = [0, 0], sizes = [1, 4], strides = [1, 1]} : vector<9x4xf32> to vector<1x4xf32>
    %389 = vector.broadcast %388 : vector<1x4xf32> to vector<32x4xf32>
    %390 = arith.mulf %387, %389 : vector<32x4xf32>
    %cst_122 = arith.constant 0.000000e+00 : f32
    %391 = vector.broadcast %cst_122 : f32 to vector<32x2xf32>
    %392 = vector.extract_strided_slice %384 {offsets = [0, 0], sizes = [32, 2], strides = [1, 1]} : vector<32x4xf32> to vector<32x2xf32>
    %393 = tpu.concatenate %391, %392 in 1 : vector<32x2xf32>, vector<32x2xf32> -> vector<32x4xf32>
    %cst_123 = arith.constant 0.000000e+00 : f32
    %394 = vector.broadcast %cst_123 : f32 to vector<32x1xf32>
    %395 = vector.extract_strided_slice %384 {offsets = [0, 0], sizes = [32, 3], strides = [1, 1]} : vector<32x4xf32> to vector<32x3xf32>
    %396 = tpu.concatenate %394, %395 in 1 : vector<32x1xf32>, vector<32x3xf32> -> vector<32x4xf32>
    %397 = vector.extract_strided_slice %336 {offsets = [2, 0], sizes = [1, 4], strides = [1, 1]} : vector<9x4xf32> to vector<1x4xf32>
    %398 = vector.broadcast %397 : vector<1x4xf32> to vector<32x4xf32>
    %399 = arith.mulf %396, %398 : vector<32x4xf32>
    %cst_124 = arith.constant 0.000000e+00 : f32
    %400 = vector.broadcast %cst_124 : f32 to vector<32x1xf32>
    %401 = vector.extract_strided_slice %384 {offsets = [0, 0], sizes = [32, 3], strides = [1, 1]} : vector<32x4xf32> to vector<32x3xf32>
    %402 = tpu.concatenate %400, %401 in 1 : vector<32x1xf32>, vector<32x3xf32> -> vector<32x4xf32>
    %403 = vector.extract_strided_slice %336 {offsets = [3, 0], sizes = [1, 4], strides = [1, 1]} : vector<9x4xf32> to vector<1x4xf32>
    %404 = vector.broadcast %403 : vector<1x4xf32> to vector<32x4xf32>
    %405 = arith.mulf %402, %404 : vector<32x4xf32>
    %cst_125 = arith.constant 0.000000e+00 : f32
    %406 = vector.broadcast %cst_125 : f32 to vector<32x1xf32>
    %407 = vector.extract_strided_slice %384 {offsets = [0, 1], sizes = [32, 3], strides = [1, 1]} : vector<32x4xf32> to vector<32x3xf32>
    %408 = tpu.concatenate %407, %406 in 1 : vector<32x3xf32>, vector<32x1xf32> -> vector<32x4xf32>
    %409 = vector.extract_strided_slice %336 {offsets = [5, 0], sizes = [1, 4], strides = [1, 1]} : vector<9x4xf32> to vector<1x4xf32>
    %410 = vector.broadcast %409 : vector<1x4xf32> to vector<32x4xf32>
    %411 = arith.mulf %408, %410 : vector<32x4xf32>
    %cst_126 = arith.constant 0.000000e+00 : f32
    %412 = vector.broadcast %cst_126 : f32 to vector<32x1xf32>
    %413 = vector.extract_strided_slice %384 {offsets = [0, 1], sizes = [32, 3], strides = [1, 1]} : vector<32x4xf32> to vector<32x3xf32>
    %414 = tpu.concatenate %413, %412 in 1 : vector<32x3xf32>, vector<32x1xf32> -> vector<32x4xf32>
    %415 = vector.extract_strided_slice %336 {offsets = [6, 0], sizes = [1, 4], strides = [1, 1]} : vector<9x4xf32> to vector<1x4xf32>
    %416 = vector.broadcast %415 : vector<1x4xf32> to vector<32x4xf32>
    %417 = arith.mulf %414, %416 : vector<32x4xf32>
    %cst_127 = arith.constant 0.000000e+00 : f32
    %418 = vector.broadcast %cst_127 : f32 to vector<32x2xf32>
    %419 = vector.extract_strided_slice %384 {offsets = [0, 2], sizes = [32, 2], strides = [1, 1]} : vector<32x4xf32> to vector<32x2xf32>
    %420 = tpu.concatenate %419, %418 in 1 : vector<32x2xf32>, vector<32x2xf32> -> vector<32x4xf32>
    %cst_128 = arith.constant 0.000000e+00 : f32
    %421 = vector.broadcast %cst_128 : f32 to vector<32x3xf32>
    %422 = vector.extract_strided_slice %384 {offsets = [0, 3], sizes = [32, 1], strides = [1, 1]} : vector<32x4xf32> to vector<32x1xf32>
    %423 = tpu.concatenate %422, %421 in 1 : vector<32x1xf32>, vector<32x3xf32> -> vector<32x4xf32>
    %424 = vector.extract_strided_slice %336 {offsets = [8, 0], sizes = [1, 4], strides = [1, 1]} : vector<9x4xf32> to vector<1x4xf32>
    %425 = vector.broadcast %424 : vector<1x4xf32> to vector<32x4xf32>
    %426 = arith.mulf %423, %425 : vector<32x4xf32>
    %427 = tpu.concatenate %390, %393, %399, %405, %384, %411, %417, %420, %426 in 0 : vector<32x4xf32>, vector<32x4xf32>, vector<32x4xf32>, vector<32x4xf32>, vector<32x4xf32>, vector<32x4xf32>, vector<32x4xf32>, vector<32x4xf32>, vector<32x4xf32> -> vector<288x4xf32>
    %428 = arith.truncf %427 : vector<288x4xf32> to vector<288x4xbf16>
    %cst_129 = arith.constant dense<0.000000e+00> : vector<32x4xf32>
    %429 = tpu.matmul %334, %428, %cst_129 {dimension_numbers = #tpu.dot_dimension_numbers<[1], [0], [0], [1], [0, 0, 1, 1], [], []>} : vector<32x288xbf16>, vector<288x4xbf16>, vector<32x4xf32> -> vector<32x4xf32>
    %430 = vector.broadcast %335 : vector<32x1xf32> to vector<32x4xf32>
    %431 = arith.addf %429, %430 : vector<32x4xf32>
    %cst_130 = arith.constant 0.000000e+00 : f32
    %432 = vector.broadcast %cst_130 : f32 to vector<32x1xf32>
    %433 = vector.extract_strided_slice %431 {offsets = [0, 1], sizes = [32, 3], strides = [1, 1]} : vector<32x4xf32> to vector<32x3xf32>
    %434 = tpu.concatenate %433, %432 in 1 : vector<32x3xf32>, vector<32x1xf32> -> vector<32x4xf32>
    %435 = arith.addf %431, %434 : vector<32x4xf32>
    %cst_131 = arith.constant 0.000000e+00 : f32
    %436 = vector.broadcast %cst_131 : f32 to vector<32x2xf32>
    %437 = vector.extract_strided_slice %435 {offsets = [0, 2], sizes = [32, 2], strides = [1, 1]} : vector<32x4xf32> to vector<32x2xf32>
    %438 = tpu.concatenate %437, %436 in 1 : vector<32x2xf32>, vector<32x2xf32> -> vector<32x4xf32>
    %439 = arith.addf %435, %438 : vector<32x4xf32>
    %440 = arith.truncf %439 : vector<32x4xf32> to vector<32x4xbf16>
    %cst_132 = arith.constant dense<0.000000e+00> : vector<32x1xf32>
    %441 = tpu.matmul %440, %337, %cst_132 {dimension_numbers = #tpu.dot_dimension_numbers<[1], [0], [0], [1], [0, 0, 1, 1], [], []>} : vector<32x4xbf16>, vector<4x1xbf16>, vector<32x1xf32> -> vector<32x1xf32>
    %c0_133 = arith.constant 0 : index
    %c0_134 = arith.constant 0 : index
    %442 = vector.load %arg26[%c0_133, %c0_134] : memref<64x32xbf16, #tpu.memory_space<vmem>>, vector<64x32xbf16>
    %c0_135 = arith.constant 0 : index
    %c0_136 = arith.constant 0 : index
    %443 = vector.load %arg27[%c0_135, %c0_136] : memref<64x1xf32, #tpu.memory_space<vmem>>, vector<64x1xf32>
    %c0_137 = arith.constant 0 : index
    %c0_138 = arith.constant 0 : index
    %444 = vector.load %arg28[%c0_137, %c0_138] : memref<64x64xbf16, #tpu.memory_space<vmem>>, vector<64x64xbf16>
    %c0_139 = arith.constant 0 : index
    %c0_140 = arith.constant 0 : index
    %445 = vector.load %arg29[%c0_139, %c0_140] : memref<64x1xf32, #tpu.memory_space<vmem>>, vector<64x1xf32>
    %446 = arith.truncf %441 : vector<32x1xf32> to vector<32x1xbf16>
    %cst_141 = arith.constant dense<0.000000e+00> : vector<64x1xf32>
    %447 = tpu.matmul %442, %446, %cst_141 {dimension_numbers = #tpu.dot_dimension_numbers<[1], [0], [0], [1], [0, 0, 1, 1], [], []>} : vector<64x32xbf16>, vector<32x1xbf16>, vector<64x1xf32> -> vector<64x1xf32>
    %448 = arith.addf %447, %443 : vector<64x1xf32>
    %449 = arith.truncf %448 : vector<64x1xf32> to vector<64x1xbf16>
    %cst_142 = arith.constant dense<0.000000e+00> : vector<64x1xf32>
    %450 = tpu.matmul %444, %449, %cst_142 {dimension_numbers = #tpu.dot_dimension_numbers<[1], [0], [0], [1], [0, 0, 1, 1], [], []>} : vector<64x64xbf16>, vector<64x1xbf16>, vector<64x1xf32> -> vector<64x1xf32>
    %451 = arith.addf %450, %445 : vector<64x1xf32>
    %c0_143 = arith.constant 0 : index
    %c0_144 = arith.constant 0 : index
    %452 = vector.load %arg30[%c0_143, %c0_144] : memref<64x64xbf16, #tpu.memory_space<vmem>>, vector<64x64xbf16>
    %c0_145 = arith.constant 0 : index
    %c0_146 = arith.constant 0 : index
    %453 = vector.load %arg31[%c0_145, %c0_146] : memref<1x64xf32, #tpu.memory_space<vmem>>, vector<1x64xf32>
    %c0_147 = arith.constant 0 : index
    %c0_148 = arith.constant 0 : index
    %454 = vector.load %arg32[%c0_147, %c0_148] : memref<64x128xbf16, #tpu.memory_space<vmem>>, vector<64x128xbf16>
    %c0_149 = arith.constant 0 : index
    %c0_150 = arith.constant 0 : index
    %455 = vector.load %arg33[%c0_149, %c0_150] : memref<1x128xf32, #tpu.memory_space<vmem>>, vector<1x128xf32>
    %c0_151 = arith.constant 0 : index
    %c0_152 = arith.constant 0 : index
    %456 = vector.load %arg34[%c0_151, %c0_152] : memref<128x38xbf16, #tpu.memory_space<vmem>>, vector<128x38xbf16>
    %c0_153 = arith.constant 0 : index
    %c0_154 = arith.constant 0 : index
    %457 = vector.load %arg35[%c0_153, %c0_154] : memref<1x38xf32, #tpu.memory_space<vmem>>, vector<1x38xf32>
    %458 = arith.truncf %451 : vector<64x1xf32> to vector<64x1xbf16>
    %cst_155 = arith.constant dense<0.000000e+00> : vector<1x64xf32>
    %459 = tpu.matmul %458, %452, %cst_155 {dimension_numbers = #tpu.dot_dimension_numbers<[0], [0], [1], [1], [0, 1, 1, 1], [], []>} : vector<64x1xbf16>, vector<64x64xbf16>, vector<1x64xf32> -> vector<1x64xf32>
    %460 = arith.addf %459, %453 : vector<1x64xf32>
    %cst_156 = arith.constant 0.000000e+00 : f32
    %461 = vector.broadcast %cst_156 : f32 to vector<1x64xf32>
    %462 = arith.maximumf %460, %461 : vector<1x64xf32>
    %463 = arith.truncf %462 : vector<1x64xf32> to vector<1x64xbf16>
    %cst_157 = arith.constant dense<0.000000e+00> : vector<1x128xf32>
    %464 = tpu.matmul %463, %454, %cst_157 {dimension_numbers = #tpu.dot_dimension_numbers<[1], [0], [0], [1], [0, 0, 1, 1], [], []>} : vector<1x64xbf16>, vector<64x128xbf16>, vector<1x128xf32> -> vector<1x128xf32>
    %465 = arith.addf %464, %455 : vector<1x128xf32>
    %cst_158 = arith.constant 0.000000e+00 : f32
    %466 = vector.broadcast %cst_158 : f32 to vector<1x128xf32>
    %467 = arith.maximumf %465, %466 : vector<1x128xf32>
    %468 = arith.truncf %467 : vector<1x128xf32> to vector<1x128xbf16>
    %cst_159 = arith.constant dense<0.000000e+00> : vector<1x38xf32>
    %469 = tpu.matmul %468, %456, %cst_159 {dimension_numbers = #tpu.dot_dimension_numbers<[1], [0], [0], [1], [0, 0, 1, 1], [], []>} : vector<1x128xbf16>, vector<128x38xbf16>, vector<1x38xf32> -> vector<1x38xf32>
    %470 = arith.addf %469, %457 : vector<1x38xf32>
    %c0_160 = arith.constant 0 : index
    %c0_161 = arith.constant 0 : index
    %c0_162 = arith.constant 0 : index
    %471 = vector.load %arg36[%c0_160, %c0_161, %c0_162] : memref<1x1x38xf32, #tpu.memory_space<vmem>>, vector<1x1x38xf32>
    %472 = vector.shape_cast %471 : vector<1x1x38xf32> to vector<1x38xf32>
    %473 = vector.shape_cast %470 : vector<1x38xf32> to vector<1x1x38xf32>
    tpu.vector_store %arg36[%c0_160, %c0_161, %c0_162], %473 {strides = array<i32>} : memref<1x1x38xf32, #tpu.memory_space<vmem>>, vector<1x1x38xf32>,
    return
  }
  func.func @transform_0(%arg0: i32) -> (i32, i32, i32) {
    %c0_i32 = arith.constant 0 : i32
    %c0_i32_0 = arith.constant 0 : i32
    %c0_i32_1 = arith.constant 0 : i32
    return %arg0, %c0_i32, %c0_i32_0 : i32, i32, i32
  }
  func.func @transform_1(%arg0: i32) -> (i32, i32) {
    %c0_i32 = arith.constant 0 : i32
    %c0_i32_0 = arith.constant 0 : i32
    %c0_i32_1 = arith.constant 0 : i32
    return %c0_i32, %c0_i32_0 : i32, i32
  }
  func.func @transform_2(%arg0: i32) -> (i32, i32) {
    %c0_i32 = arith.constant 0 : i32
    %c0_i32_0 = arith.constant 0 : i32
    %c0_i32_1 = arith.constant 0 : i32
    return %c0_i32, %c0_i32_0 : i32, i32
  }
  func.func @transform_3(%arg0: i32) -> (i32, i32) {
    %c0_i32 = arith.constant 0 : i32
    %c0_i32_0 = arith.constant 0 : i32
    %c0_i32_1 = arith.constant 0 : i32
    return %c0_i32, %c0_i32_0 : i32, i32
  }
  func.func @transform_4(%arg0: i32) -> (i32, i32) {
    %c0_i32 = arith.constant 0 : i32
    %c0_i32_0 = arith.constant 0 : i32
    %c0_i32_1 = arith.constant 0 : i32
    return %c0_i32, %c0_i32_0 : i32, i32
  }
  func.func @transform_5(%arg0: i32) -> (i32, i32) {
    %c0_i32 = arith.constant 0 : i32
    %c0_i32_0 = arith.constant 0 : i32
    %c0_i32_1 = arith.constant 0 : i32
    return %c0_i32, %c0_i32_0 : i32, i32
  }
  func.func @transform_6(%arg0: i32) -> (i32, i32) {
    %c0_i32 = arith.constant 0 : i32
    %c0_i32_0 = arith.constant 0 : i32
    %c0_i32_1 = arith.constant 0 : i32
    return %c0_i32, %c0_i32_0 : i32, i32
  }
  func.func @transform_7(%arg0: i32) -> (i32, i32) {
    %c0_i32 = arith.constant 0 : i32
    %c0_i32_0 = arith.constant 0 : i32
    %c0_i32_1 = arith.constant 0 : i32
    return %c0_i32, %c0_i32_0 : i32, i32
  }
  func.func @transform_8(%arg0: i32) -> (i32, i32) {
    %c0_i32 = arith.constant 0 : i32
    %c0_i32_0 = arith.constant 0 : i32
    %c0_i32_1 = arith.constant 0 : i32
    return %c0_i32, %c0_i32_0 : i32, i32
  }
  func.func @transform_9(%arg0: i32) -> (i32, i32) {
    %c0_i32 = arith.constant 0 : i32
    %c0_i32_0 = arith.constant 0 : i32
    %c0_i32_1 = arith.constant 0 : i32
    return %c0_i32, %c0_i32_0 : i32, i32
  }
  func.func @transform_10(%arg0: i32) -> (i32, i32) {
    %c0_i32 = arith.constant 0 : i32
    %c0_i32_0 = arith.constant 0 : i32
    %c0_i32_1 = arith.constant 0 : i32
    return %c0_i32, %c0_i32_0 : i32, i32
  }
  func.func @transform_11(%arg0: i32) -> (i32, i32) {
    %c0_i32 = arith.constant 0 : i32
    %c0_i32_0 = arith.constant 0 : i32
    %c0_i32_1 = arith.constant 0 : i32
    return %c0_i32, %c0_i32_0 : i32, i32
  }
  func.func @transform_12(%arg0: i32) -> (i32, i32) {
    %c0_i32 = arith.constant 0 : i32
    %c0_i32_0 = arith.constant 0 : i32
    %c0_i32_1 = arith.constant 0 : i32
    return %c0_i32, %c0_i32_0 : i32, i32
  }
  func.func @transform_13(%arg0: i32) -> (i32, i32) {
    %c0_i32 = arith.constant 0 : i32
    %c0_i32_0 = arith.constant 0 : i32
    %c0_i32_1 = arith.constant 0 : i32
    return %c0_i32, %c0_i32_0 : i32, i32
  }
  func.func @transform_14(%arg0: i32) -> (i32, i32) {
    %c0_i32 = arith.constant 0 : i32
    %c0_i32_0 = arith.constant 0 : i32
    %c0_i32_1 = arith.constant 0 : i32
    return %c0_i32, %c0_i32_0 : i32, i32
  }
  func.func @transform_15(%arg0: i32) -> (i32, i32) {
    %c0_i32 = arith.constant 0 : i32
    %c0_i32_0 = arith.constant 0 : i32
    %c0_i32_1 = arith.constant 0 : i32
    return %c0_i32, %c0_i32_0 : i32, i32
  }
  func.func @transform_16(%arg0: i32) -> (i32, i32) {
    %c0_i32 = arith.constant 0 : i32
    %c0_i32_0 = arith.constant 0 : i32
    %c0_i32_1 = arith.constant 0 : i32
    return %c0_i32, %c0_i32_0 : i32, i32
  }
  func.func @transform_17(%arg0: i32) -> (i32, i32) {
    %c0_i32 = arith.constant 0 : i32
    %c0_i32_0 = arith.constant 0 : i32
    %c0_i32_1 = arith.constant 0 : i32
    return %c0_i32, %c0_i32_0 : i32, i32
  }
  func.func @transform_18(%arg0: i32) -> (i32, i32) {
    %c0_i32 = arith.constant 0 : i32
    %c0_i32_0 = arith.constant 0 : i32
    %c0_i32_1 = arith.constant 0 : i32
    return %c0_i32, %c0_i32_0 : i32, i32
  }
  func.func @transform_19(%arg0: i32) -> (i32, i32) {
    %c0_i32 = arith.constant 0 : i32
    %c0_i32_0 = arith.constant 0 : i32
    %c0_i32_1 = arith.constant 0 : i32
    return %c0_i32, %c0_i32_0 : i32, i32
  }
  func.func @transform_20(%arg0: i32) -> (i32, i32) {
    %c0_i32 = arith.constant 0 : i32
    %c0_i32_0 = arith.constant 0 : i32
    %c0_i32_1 = arith.constant 0 : i32
    return %c0_i32, %c0_i32_0 : i32, i32
  }
  func.func @transform_21(%arg0: i32) -> (i32, i32) {
    %c0_i32 = arith.constant 0 : i32
    %c0_i32_0 = arith.constant 0 : i32
    %c0_i32_1 = arith.constant 0 : i32
    return %c0_i32, %c0_i32_0 : i32, i32
  }
  func.func @transform_22(%arg0: i32) -> (i32, i32) {
    %c0_i32 = arith.constant 0 : i32
    %c0_i32_0 = arith.constant 0 : i32
    %c0_i32_1 = arith.constant 0 : i32
    return %c0_i32, %c0_i32_0 : i32, i32
  }
  func.func @transform_23(%arg0: i32) -> (i32, i32) {
    %c0_i32 = arith.constant 0 : i32
    %c0_i32_0 = arith.constant 0 : i32
    %c0_i32_1 = arith.constant 0 : i32
    return %c0_i32, %c0_i32_0 : i32, i32
  }
  func.func @transform_24(%arg0: i32) -> (i32, i32) {
    %c0_i32 = arith.constant 0 : i32
    %c0_i32_0 = arith.constant 0 : i32
    %c0_i32_1 = arith.constant 0 : i32
    return %c0_i32, %c0_i32_0 : i32, i32
  }
  func.func @transform_25(%arg0: i32) -> (i32, i32) {
    %c0_i32 = arith.constant 0 : i32
    %c0_i32_0 = arith.constant 0 : i32
    %c0_i32_1 = arith.constant 0 : i32
    return %c0_i32, %c0_i32_0 : i32, i32
  }
  func.func @transform_26(%arg0: i32) -> (i32, i32) {
    %c0_i32 = arith.constant 0 : i32
    %c0_i32_0 = arith.constant 0 : i32
    %c0_i32_1 = arith.constant 0 : i32
    return %c0_i32, %c0_i32_0 : i32, i32
  }
  func.func @transform_27(%arg0: i32) -> (i32, i32) {
    %c0_i32 = arith.constant 0 : i32
    %c0_i32_0 = arith.constant 0 : i32
    %c0_i32_1 = arith.constant 0 : i32
    return %c0_i32, %c0_i32_0 : i32, i32
  }
  func.func @transform_28(%arg0: i32) -> (i32, i32) {
    %c0_i32 = arith.constant 0 : i32
    %c0_i32_0 = arith.constant 0 : i32
    %c0_i32_1 = arith.constant 0 : i32
    return %c0_i32, %c0_i32_0 : i32, i32
  }
  func.func @transform_29(%arg0: i32) -> (i32, i32) {
    %c0_i32 = arith.constant 0 : i32
    %c0_i32_0 = arith.constant 0 : i32
    %c0_i32_1 = arith.constant 0 : i32
    return %c0_i32, %c0_i32_0 : i32, i32
  }
  func.func @transform_30(%arg0: i32) -> (i32, i32) {
    %c0_i32 = arith.constant 0 : i32
    %c0_i32_0 = arith.constant 0 : i32
    %c0_i32_1 = arith.constant 0 : i32
    return %c0_i32, %c0_i32_0 : i32, i32
  }
  func.func @transform_31(%arg0: i32) -> (i32, i32) {
    %c0_i32 = arith.constant 0 : i32
    %c0_i32_0 = arith.constant 0 : i32
    %c0_i32_1 = arith.constant 0 : i32
    return %c0_i32, %c0_i32_0 : i32, i32
  }
  func.func @transform_32(%arg0: i32) -> (i32, i32) {
    %c0_i32 = arith.constant 0 : i32
    %c0_i32_0 = arith.constant 0 : i32
    %c0_i32_1 = arith.constant 0 : i32
    return %c0_i32, %c0_i32_0 : i32, i32
  }
  func.func @transform_33(%arg0: i32) -> (i32, i32) {
    %c0_i32 = arith.constant 0 : i32
    %c0_i32_0 = arith.constant 0 : i32
    %c0_i32_1 = arith.constant 0 : i32
    return %c0_i32, %c0_i32_0 : i32, i32
  }
  func.func @transform_34(%arg0: i32) -> (i32, i32) {
    %c0_i32 = arith.constant 0 : i32
    %c0_i32_0 = arith.constant 0 : i32
    %c0_i32_1 = arith.constant 0 : i32
    return %c0_i32, %c0_i32_0 : i32, i32
  }
  func.func @transform_35(%arg0: i32) -> (i32, i32, i32) {
    %c0_i32 = arith.constant 0 : i32
    %c0_i32_0 = arith.constant 0 : i32
    %c0_i32_1 = arith.constant 0 : i32
    return %arg0, %c0_i32, %c0_i32_0 : i32, i32, i32
  }
}

</mosaic_0001>

<bundles_post_ra>
// kernel: _lambda_.1
= control target key start
LH: loop header
LB: loop body
LE: loop exit
PB: predicated region body
PF: predicated region fallthrough
CT: control target
= control target key end

     0   :  { %s6205_s6 = smov 1   ;;  %s6206_s10 = smov 2   ;;  %s7659_s0 = inlined_call_operand.smem [shape: u32[36], index: -1, kind: input, shape index: {}] }
   0x1   :  { %s6311_s5 = sld [smem:[%s7659_s0]]   ;;  %s6207_s14 = smov 3  }
   0x2   :  { %s6316_s9 = sld [smem:[%s7659_s0 + %s6205_s6]]   ;;  %s6208_s18 = smov 4  }
   0x3   :  { %s6321_s13 = sld [smem:[%s7659_s0 + %s6206_s10]]   ;;  %s6209_s22 = smov 5  }
   0x4   :  { %s6326_s17 = sld [smem:[%s7659_s0 + %s6207_s14]]   ;;  %s6210_s26 = smov 6  }
   0x5   :  { %s6331_s21 = sld [smem:[%s7659_s0 + %s6208_s18]]   ;;  %s6211_s30 = smov 7  }
   0x6   :  { %s6336_s25 = sld [smem:[%s7659_s0 + %s6209_s22]]   ;;  %s6212_s4 = smov 8  }
   0x7   :  { %7679 = sst [smem:[#allocation63_spill]] %s6311_s5  ;;  %s6213_s10 = smov 9  }
   0x8   :  { %s6341_s29 = sld [smem:[%s7659_s0 + %s6210_s26]]   ;;  %s6214_s15 = smov 10  }
   0x9   :  { %7680 = sst [smem:[#allocation64_spill]] %s6321_s13  ;;  %s6215_s20 = smov 11  }
   0xa   :  { %7681 = sst [smem:[#allocation65_spill]] %s6326_s17  ;;  %s6216_s26 = smov 12  }
   0xb   :  { %7682 = sst [smem:[#allocation66_spill]] %s6331_s21  ;;  %s6217_s1 = smov 13  }
   0xc   :  { %7683 = sst [smem:[#allocation67_spill]] %s6336_s25  ;;  %s6218_s7 = smov 14  }
   0xd   :  { %s6346_s3 = sld [smem:[%s7659_s0 + %s6211_s30]]   ;;  %s6220_s22 = smov 16  }
   0xe   :  { %7684 = sst [smem:[#allocation68_spill]] %s6341_s29  ;;  %s6221_s28 = smov 17  }
   0xf   :  { %s6351_s8 = sld [smem:[%s7659_s0 + %s6212_s4]]  }
  0x10   :  { %s6356_s14 = sld [smem:[%s7659_s0 + %s6213_s10]]  }
  0x11   :  { %s6361_s19 = sld [smem:[%s7659_s0 + %s6214_s15]]   ;;  %s6219_s15 = smov 15  }
  0x12   :  { %s6366_s24 = sld [smem:[%s7659_s0 + %s6215_s20]]  }
  0x13   :  { %7685 = sst [smem:[#allocation69_spill]] %s6346_s3 }
  0x14   :  { %s6371_s30 = sld [smem:[%s7659_s0 + %s6216_s26]]  }
  0x15   :  { %7686 = sst [smem:[#allocation70_spill]] %s6351_s8 }
  0x16   :  { %s6376_s6 = sld [smem:[%s7659_s0 + %s6217_s1]]  }
  0x17   :  { %7687 = sst [smem:[#allocation71_spill]] %s6361_s19 }
  0x18   :  { %s6381_s12 = sld [smem:[%s7659_s0 + %s6218_s7]]   ;;  %s6222_s7 = smov 18  }
  0x19   :  { %s6386_s20 = sld [smem:[%s7659_s0 + %s6219_s15]]   ;;  %s6223_s15 = smov 19  }
  0x1a   :  { %7688 = sst [smem:[#allocation72_spill]] %s6371_s30 }
  0x1b   :  { %s6391_s27 = sld [smem:[%s7659_s0 + %s6220_s22]]   ;;  %s6224_s22 = smov 20  }
  0x1c   :  { %7689 = sst [smem:[#allocation73_spill]] %s6376_s6 }
  0x1d   :  { %s6396_s4 = sld [smem:[%s7659_s0 + %s6221_s28]]   ;;  %s6225_s28 = smov 21  }
  0x1e   :  { %7690 = sst [smem:[#allocation74_spill]] %s6381_s12 }
  0x1f   :  { %s6401_s29 = sld [smem:[%s7659_s0 + %s6222_s7]]   ;;  %s6226_s7 = smov 22  }
  0x20   :  { %s6406_s5 = sld [smem:[%s7659_s0 + %s6223_s15]]   ;;  %s6227_s15 = smov 23  }
  0x21   :  { %7691 = sst [smem:[#allocation75_spill]] %s6391_s27 }
  0x22   :  { %s6411_s27 = sld [smem:[%s7659_s0 + %s6224_s22]]   ;;  %s6228_s22 = smov 24  }
  0x23   :  { %7692 = sst [smem:[#allocation76_spill]] %s6396_s4 }
  0x24   :  { %s6416_s12 = sld [smem:[%s7659_s0 + %s6225_s28]]   ;;  %s6229_s28 = smov 25  }
  0x25   :  { %7693 = sst [smem:[#allocation77_spill]] %s6401_s29 }
  0x26   :  { %7694 = sst [smem:[#allocation78_spill]] %s6406_s5 }
  0x27   :  { %s6421_s29 = sld [smem:[%s7659_s0 + %s6226_s7]]   ;;  %s6230_s7 = smov 26  }
  0x28   :  { %7695 = sst [smem:[#allocation79_spill]] %s6411_s27 }
  0x29   :  { %s6426_s30 = sld [smem:[%s7659_s0 + %s6227_s15]]   ;;  %s6231_s15 = smov 27  }
  0x2a   :  { %s6431_s27 = sld [smem:[%s7659_s0 + %s6228_s22]]   ;;  %s6232_s22 = smov 28  }
  0x2b   :  { %s6436_s19 = sld [smem:[%s7659_s0 + %s6229_s28]]   ;;  %s6233_s28 = smov 29  }
  0x2c   :  { %s6446_s8 = sld [smem:[%s7659_s0 + %s6231_s15]]   ;;  %s6235_s15 = smov 31  }
  0x2d   :  { %7696 = sst [smem:[#allocation80_spill]] %s6421_s29 }
  0x2e   :  { %s6441_s29 = sld [smem:[%s7659_s0 + %s6230_s7]]   ;;  %s6234_s7 = smov 30  }
  0x2f   :  { %s6456_s25 = sld [smem:[%s7659_s0 + %s6233_s28]]   ;;  %s6237_s28 = smov 33  }
  0x30   :  { %7697 = sst [smem:[#allocation81_spill]] %s6431_s27 }
  0x31   :  { %s6451_s27 = sld [smem:[%s7659_s0 + %s6232_s22]]   ;;  %s6236_s22 = smov 32  }
  0x32   :  { %7699 = sst [smem:[#allocation83_spill]] %s6446_s8 }
  0x33   :  { %s6466_s17 = sld [smem:[%s7659_s0 + %s6235_s15]]   ;;  %s6239_s15 = smov 35  }
  0x34   :  { %7698 = sst [smem:[#allocation82_spill]] %s6441_s29 }
  0x35   :  { %7701 = sst [smem:[#allocation85_spill]] %s6456_s25 }
  0x36   :  { %s6461_s29 = sld [smem:[%s7659_s0 + %s6234_s7]]   ;;  %s6238_s7 = smov 34  }
  0x37   :  { %7700 = sst [smem:[#allocation84_spill]] %s6451_s27 }
  0x38   :  { %s6471_s27 = sld [smem:[%s7659_s0 + %s6236_s22]]  }
  0x39   :  { %7703 = sst [smem:[#allocation87_spill]] %s6466_s17 }
  0x3a   :  { %s6476_s25 = sld [smem:[%s7659_s0 + %s6237_s28]]  }
  0x3b   :  { %s6486_s17 = sld [smem:[%s7659_s0 + %s6239_s15]]  }
  0x3c   :  { %7702 = sst [smem:[#allocation86_spill]] %s6461_s29 }
  0x3d   :  { %s6481_s29 = sld [smem:[%s7659_s0 + %s6238_s7]]  }
  0x3e   :  { %76 = vsyncpa [#allocation3], 0 }
  0x3f   :  { %77 = vsyncpa [#allocation6], 0 }
  0x40   :  { %78 = vsyncpa [#allocation9], 0 }
  0x41   :  { %79 = vsyncpa [#allocation12], 0 }
  0x42   :  { %80 = vsyncpa [#allocation15], 0 }
  0x43   :  { %81 = vsyncpa [#allocation18], 0 }
  0x44   :  { %82 = vsyncpa [#allocation21], 0 }
  0x45   :  { %83 = vsyncpa [#allocation24], 0 }
  0x46   :  { %84 = vsyncpa [#allocation27], 0 }
  0x47   :  { %85 = vsyncpa [#allocation30], 0 }
  0x48   :  { %86 = vsyncpa [#allocation33], 0 }
  0x49   :  { %87 = vsyncpa [#allocation36], 0 }
  0x4a   :  { %88 = vsyncpa [#allocation39], 0 }
  0x4b   :  { %89 = vsyncpa [#allocation42], 0 }
  0x4c   :  { %90 = vsyncpa [#allocation45], 0 }
  0x4d   :  { %91 = vsyncpa [#allocation4], 0 }
  0x4e   :  { %93 = vsyncpa [#allocation4 + $0x1], 0  ;;  %s6488_s22 = smov 0   ;;  %s6490_s0 = smov 0  }
  0x4f   :  { %s6492_s23 = smov 0   ;;  %s6494_s26 = smov 0  }
  0x50 LB: > { %7704 = sst [smem:[#allocation88_spill]] %s6191_s22  ;;  %s6509_s28 = sadd.s32 4294967295, %s6203_s26   ;;  %s6203_s26 = sphi %s6494_s26, %s7793_s26   ;;  %s6199_s23 = sphi %s6492_s23, %s7795_s23   ;;  %s6195_s0 = sphi %s6490_s0, %s7797_s0   ;;  %s6191_s22 = sphi %s6488_s22, %s7796_s22  }
  0x51   : > { %7705 = sst [smem:[#allocation89_spill]] %s6199_s23  ;;  %s4335_s1 = sadd.s32 4294967294, %s6203_s26  }
  0x52   : > { %7706 = sst [smem:[#allocation90_spill]] %s6203_s26  ;;  %s6513_s2 = sadd.s32 1, %s6203_s26  }
  0x53   : > { %7707 = sst [smem:[#allocation91_spill]] %s6513_s2  ;;  %s846_s7 = sadd.s32 1, %s6199_s23 }
  0x54   : > { %s843_s10 = ssub.s32 %s6203_s26, %s6513_s2  ;;  %p856_p0 = scmp.ne.s32.totalorder %s6199_s23, %s6195_s0 }
  0x55   : > { %p844_p1 = scmp.eq.s32.totalorder %s843_s10, 0  ;;  %p857_p2 = scmp.eq.s32.totalorder %s6509_s28, 1 }
  0x56   : > { %p862_p3 = scmp.ne.s32.totalorder %s6195_s0, %s6191_s22  ;;  %p863_p4 = scmp.eq.s32.totalorder %s4335_s1, 1 }
  0x57   : > { %s6524_s11 = scalar_select %p844_p1, %s6199_s23, %s846_s7  }
  0x58   : > { %p6526_p5 = por %p857_p2, %p856_p0  ;;  %p6530_p6 = por %p863_p4, %p862_p3 }
  0x59   : > { %7708 = sst [smem:[#allocation92_spill]] %s6524_s11  ;;  %p4336_p7 = scmp.ge.s32.totalorder %s6203_s26, 1 }
  0x5a   : > { %s7709_s15 = scalar_select %p6526_p5, 1, 0 }
  0x5b   : > { %s7710_s16 = scalar_select %p6530_p6, 1, 0 }
  0x5c   : > { %p870_p8 = scmp.lt.s32.totalorder %s6203_s26, 3  ;;  %p7667_p9 = scmp.eq.s32.totalorder %s6509_s28, 0 }
  0x5d   : > { %7711 = sst [smem:[#allocation93_spill]] %s7710_s16  ;;  %s6240_s10 = smov [#allocation5]  }
  0x5e   : > { %p6537_p10 = pnand %p4336_p7, %p870_p8  ;;  %s894_s1 = sshll.u32 %s6240_s10, 4  ;;  %s895_s1 = int_to_ptr.vmem [resolvable:$true] %s894_s1 }
  0x5f   : > { %s6241_s7 = smov [#allocation8]   ;;  %s6242_s2 = smov [#allocation11]  }
  0x60   : > { %s7712_s18 = scalar_select %p6537_p10, 1, 0 }
  0x61   : > { %p4899_p11 = pneg %p6537_p10  ;;  %s916_s11 = sshll.u32 %s6241_s7, 4  ;;  %s917_s11 = int_to_ptr.vmem [resolvable:$true] %s916_s11 }
  0x62   : > { %s942_s16 = sshll.u32 %s6242_s2, 4  ;;  %s5366_s10 = scalar_lea.vmem %s895_s1, 128  ;;  %s6549_s16 = int_to_ptr.vmem [resolvable:$true] %s942_s16 }
  0x63   : > { %p6545_p12 = pnand %p7667_p9, %p4899_p11  ;;  %p5367_p0 = scmp.ne.s32.totalorder %s895_s1, %s5366_s10 }
  0x64   : > { %p5374_p3 = scmp.lt.s32.totalorder %s895_s1, %s895_s1  ;;  %p5375_p4 = scmp.lt.s32.totalorder %s5366_s10, %s5366_s10 }
  0x65   : > { %p6553_p13 = pneg %p6545_p12 }
  0x66   : > { %p5376_p7 = por %p5375_p4, %p5374_p3 }
  0x67   : > { %p5369_p1 = pnand %p5367_p0, %p6553_p13 }
  0x69   : > { %p5370_p2 = pneg %p5369_p1 }
  0x6b   : > { %p5377_p8 = pnand %p5376_p7, %p5370_p2 }
  0x6d   : > { %5380 = shalt.err (!%p5377_p8)
}
  0x6e   : > { %s7715_s13 = sld [smem:[#allocation64_spill]]  ;;  %s5392_s2 = scalar_lea.vmem %s917_s11, 128 }
  0x6f   : > { %p5393_p11 = scmp.ne.s32.totalorder %s917_s11, %s5392_s2  ;;  %p5400_p5 = scmp.lt.s32.totalorder %s917_s11, %s917_s11 }
  0x70   : > { %p5401_p10 = scmp.lt.s32.totalorder %s5392_s2, %s5392_s2 }
  0x71   : > { %p5395_p9 = pnand %p5393_p11, %p6553_p13 }
  0x72   : > { %p5402_p0 = por %p5401_p10, %p5400_p5 }
  0x73   : > { %p5396_p6 = pneg %p5395_p9 }
  0x74   : > { %4905 = dma.hbm_to_vmem [thread:$0]  (!%p6545_p12), %s7715_s13, 128, %s895_s1, [#allocation6]  }
  0x75   : > { %p5403_p1 = pnand %p5402_p0, %p5396_p6 }
  0x77   : > { %5406 = shalt.err (!%p5403_p1)
}
  0x78   : > { %s7716_s21 = sld [smem:[#allocation66_spill]]  ;;  %s5418_s7 = scalar_lea.vmem %s6549_s16, 128 }
  0x79   : > { %p5419_p2 = scmp.ne.s32.totalorder %s6549_s16, %s5418_s7  ;;  %p5426_p9 = scmp.lt.s32.totalorder %s6549_s16, %s6549_s16 }
  0x7a   : > { %p5427_p7 = scmp.lt.s32.totalorder %s5418_s7, %s5418_s7 }
  0x7b   : > { %p5421_p3 = pnand %p5419_p2, %p6553_p13 }
  0x7c   : > { %p5428_p8 = por %p5427_p7, %p5426_p9 }
  0x7d   : > { %p5422_p4 = pneg %p5421_p3 }
  0x7e   : > { %4911 = dma.hbm_to_vmem [thread:$0]  (!%p6545_p12), %s7716_s21, 128, %s917_s11, [#allocation9]  }
  0x7f   : > { %p5429_p5 = pnand %p5428_p8, %p5422_p4 }
  0x81   : > { %5432 = shalt.err (!%p5429_p5)
}
  0x82   : > { %s7671_s1 = smov 64   ;;  %s7717_s3 = sld [smem:[#allocation69_spill]] }
  0x83   : > { %s7673_s10 = smov 4   ;;  %s6245_s11 = smov [#allocation14]  }
  0x84   : > { %s968_s2 = sshll.u32 %s6245_s11, 4  ;;  %s6246_s13 = smov [#allocation17]   ;;  %s969_s2 = int_to_ptr.vmem [resolvable:$true] %s968_s2 }
  0x85   : > { %s994_s21 = sshll.u32 %s6246_s13, 4  ;;  %s5444_s7 = scalar_lea.vmem %s969_s2, 256  ;;  %s995_s21 = int_to_ptr.vmem [resolvable:$true] %s994_s21 }
  0x86   : > { %p5445_p6 = scmp.ne.s32.totalorder %s969_s2, %s5444_s7  ;;  %p5452_p0 = scmp.lt.s32.totalorder %s969_s2, %s969_s2 }
  0x87   : > { %p5453_p1 = scmp.lt.s32.totalorder %s5444_s7, %s5444_s7 }
  0x88   : > { %4917 = dma.hbm_to_vmem [thread:$0]  (!%p6545_p12), %s7717_s3, 128, %s6549_s16, [#allocation12], %s7671_s1, %s7671_s1, %s7673_s10  }
  0x89   : > { %p5447_p10 = pnand %p5445_p6, %p6553_p13  ;;  %p5454_p2 = por %p5453_p1, %p5452_p0 }
  0x8b   : > { %p5448_p11 = pneg %p5447_p10 }
  0x8d   : > { %p5455_p3 = pnand %p5454_p2, %p5448_p11 }
  0x8f   : > { %5458 = shalt.err (!%p5455_p3)
}
  0x90   : > { %s7675_s26 = smov 128   ;;  %s7677_s16 = smov 8  }
  0x91   : > { %4923 = dma.hbm_to_vmem [thread:$0]  (!%p6545_p12), %s6356_s14, 256, %s969_s2, [#allocation15], %s7675_s26, %s7675_s26, %s7677_s16  }
  0x92   : > { %s5470_s13 = scalar_lea.vmem %s995_s21, 256  ;;  %p5478_p8 = scmp.lt.s32.totalorder %s995_s21, %s995_s21 }
  0x93   : > { %p5471_p4 = scmp.ne.s32.totalorder %s995_s21, %s5470_s13  ;;  %p5479_p5 = scmp.lt.s32.totalorder %s5470_s13, %s5470_s13 }
  0x95   : > { %p5473_p9 = pnand %p5471_p4, %p6553_p13  ;;  %p5480_p6 = por %p5479_p5, %p5478_p8 }
  0x97   : > { %p5474_p7 = pneg %p5473_p9 }
  0x99   : > { %p5481_p10 = pnand %p5480_p6, %p5474_p7 }
  0x9b   : > { %5484 = shalt.err (!%p5481_p10)
}
  0x9c   : > { %4929 = dma.hbm_to_vmem [thread:$0]  (!%p6545_p12), %s6366_s24, 256, %s995_s21, [#allocation18], %s7675_s26, %s7675_s26, %s7677_s16  }
  0x9d   : > { %s6249_s11 = smov [#allocation20]   ;;  %s6250_s7 = smov [#allocation23]  }
  0x9e   : > { %s1020_s2 = sshll.u32 %s6249_s11, 4  ;;  %s1046_s1 = sshll.u32 %s6250_s7, 4  ;;  %s1021_s2 = int_to_ptr.vmem [resolvable:$true] %s1020_s2  ;;  %s1047_s1 = int_to_ptr.vmem [resolvable:$true] %s1046_s1 }
  0x9f   : > { %s5496_s10 = scalar_lea.vmem %s1021_s2, 256  ;;  %p5504_p2 = scmp.lt.s32.totalorder %s1021_s2, %s1021_s2 }
  0xa0   : > { %p5497_p11 = scmp.ne.s32.totalorder %s1021_s2, %s5496_s10  ;;  %p5505_p3 = scmp.lt.s32.totalorder %s5496_s10, %s5496_s10 }
  0xa2   : > { %p5499_p0 = pnand %p5497_p11, %p6553_p13  ;;  %p5506_p4 = por %p5505_p3, %p5504_p2 }
  0xa4   : > { %p5500_p1 = pneg %p5499_p0 }
  0xa6   : > { %p5507_p9 = pnand %p5506_p4, %p5500_p1 }
  0xa8   : > { %5510 = shalt.err (!%p5507_p9)
}
  0xa9   : > { %s7718_s6 = sld [smem:[#allocation73_spill]]  ;;  %s5522_s21 = scalar_lea.vmem %s1047_s1, 256 }
  0xaa   : > { %p5523_p7 = scmp.ne.s32.totalorder %s1047_s1, %s5522_s21  ;;  %p5530_p6 = scmp.lt.s32.totalorder %s1047_s1, %s1047_s1 }
  0xab   : > { %p5531_p10 = scmp.lt.s32.totalorder %s5522_s21, %s5522_s21 }
  0xac   : > { %p5525_p8 = pnand %p5523_p7, %p6553_p13 }
  0xad   : > { %p5532_p11 = por %p5531_p10, %p5530_p6 }
  0xae   : > { %p5526_p5 = pneg %p5525_p8 }
  0xaf   : > { %4935 = dma.hbm_to_vmem [thread:$0]  (!%p6545_p12), %s7718_s6, 256, %s1021_s2, [#allocation21], %s7675_s26, %s7675_s26, %s7677_s16  }
  0xb0   : > { %p5533_p0 = pnand %p5532_p11, %p5526_p5 }
  0xb2   : > { %5536 = shalt.err (!%p5533_p0)
}
  0xb3   : > { %4941 = dma.hbm_to_vmem [thread:$0]  (!%p6545_p12), %s6386_s20, 256, %s1047_s1, [#allocation24], %s7675_s26, %s7675_s26, %s7677_s16  }
  0xb4   : > { %s6251_s10 = smov [#allocation26]   ;;  %s6252_s11 = smov [#allocation29]  }
  0xb5   : > { %s1072_s13 = sshll.u32 %s6251_s10, 4  ;;  %s1098_s2 = sshll.u32 %s6252_s11, 4  ;;  %s1073_s13 = int_to_ptr.vmem [resolvable:$true] %s1072_s13  ;;  %s1099_s2 = int_to_ptr.vmem [resolvable:$true] %s1098_s2 }
  0xb6   : > { %s5548_s7 = scalar_lea.vmem %s1073_s13, 256  ;;  %p5556_p4 = scmp.lt.s32.totalorder %s1073_s13, %s1073_s13 }
  0xb7   : > { %p5549_p1 = scmp.ne.s32.totalorder %s1073_s13, %s5548_s7  ;;  %p5557_p9 = scmp.lt.s32.totalorder %s5548_s7, %s5548_s7 }
  0xb9   : > { %p5551_p2 = pnand %p5549_p1, %p6553_p13  ;;  %p5558_p7 = por %p5557_p9, %p5556_p4 }
  0xbb   : > { %p5552_p3 = pneg %p5551_p2 }
  0xbd   : > { %p5559_p8 = pnand %p5558_p7, %p5552_p3 }
  0xbf   : > { %5562 = shalt.err (!%p5559_p8)
}
  0xc0   : > { %s7719_s4 = sld [smem:[#allocation76_spill]]  ;;  %s5574_s1 = scalar_lea.vmem %s1099_s2, 512 }
  0xc1   : > { %p5575_p5 = scmp.ne.s32.totalorder %s1099_s2, %s5574_s1  ;;  %p5582_p11 = scmp.lt.s32.totalorder %s1099_s2, %s1099_s2 }
  0xc2   : > { %p5583_p0 = scmp.lt.s32.totalorder %s5574_s1, %s5574_s1 }
  0xc3   : > { %p5577_p6 = pnand %p5575_p5, %p6553_p13 }
  0xc4   : > { %p5584_p1 = por %p5583_p0, %p5582_p11 }
  0xc5   : > { %p5578_p10 = pneg %p5577_p6 }
  0xc6   : > { %4947 = dma.hbm_to_vmem [thread:$0]  (!%p6545_p12), %s7719_s4, 256, %s1073_s13, [#allocation27], %s7675_s26, %s7675_s26, %s7677_s16  }
  0xc7   : > { %p5585_p2 = pnand %p5584_p1, %p5578_p10 }
  0xc9   : > { %5588 = shalt.err (!%p5585_p2)
}
  0xca   : > { %s7720_s5 = sld [smem:[#allocation78_spill]]  ;;  %s6253_s21 = smov [#allocation32]  }
  0xcb   : > { %s1124_s10 = sshll.u32 %s6253_s21, 4  ;;  %s1125_s10 = int_to_ptr.vmem [resolvable:$true] %s1124_s10 }
  0xcc   : > { %s5600_s13 = scalar_lea.vmem %s1125_s10, 768  ;;  %p5608_p7 = scmp.lt.s32.totalorder %s1125_s10, %s1125_s10 }
  0xcd   : > { %p5601_p3 = scmp.ne.s32.totalorder %s1125_s10, %s5600_s13  ;;  %p5609_p8 = scmp.lt.s32.totalorder %s5600_s13, %s5600_s13 }
  0xcf   : > { %p5603_p4 = pnand %p5601_p3, %p6553_p13  ;;  %p5610_p5 = por %p5609_p8, %p5608_p7 }
  0xd0   : > { %4953 = dma.hbm_to_vmem [thread:$0]  (!%p6545_p12), %s7720_s5, 512, %s1099_s2, [#allocation30], %s7675_s26, %s7675_s26, %s7677_s16  }
  0xd1   : > { %p5604_p9 = pneg %p5603_p4 }
  0xd3   : > { %p5611_p6 = pnand %p5610_p5, %p5604_p9 }
  0xd5   : > { %5614 = shalt.err (!%p5611_p6)
}
  0xd6   : > { %s6254_s11 = smov 192   ;;  %s6255_s7 = smov 12  }
  0xd7   : > { %4959 = dma.hbm_to_vmem [thread:$0]  (!%p6545_p12), %s6416_s12, 768, %s1125_s10, [#allocation33], %s6254_s11, %s6254_s11, %s6255_s7  }
  0xd8   : > { %s6256_s2 = smov [#allocation35]   ;;  %s6257_s21 = smov [#allocation38]  }
  0xd9   : > { %s1150_s1 = sshll.u32 %s6256_s2, 4  ;;  %s1174_s26 = sshll.u32 %s6257_s21, 4  ;;  %s1151_s1 = int_to_ptr.vmem [resolvable:$true] %s1150_s1  ;;  %s1175_s26 = int_to_ptr.vmem [resolvable:$true] %s1174_s26 }
  0xda   : > { %s5626_s16 = scalar_lea.vmem %s1151_s1, 256  ;;  %p5634_p1 = scmp.lt.s32.totalorder %s1151_s1, %s1151_s1 }
  0xdb   : > { %p5627_p10 = scmp.ne.s32.totalorder %s1151_s1, %s5626_s16  ;;  %p5635_p2 = scmp.lt.s32.totalorder %s5626_s16, %s5626_s16 }
  0xdd   : > { %p5629_p11 = pnand %p5627_p10, %p6553_p13  ;;  %p5636_p3 = por %p5635_p2, %p5634_p1 }
  0xdf   : > { %p5630_p0 = pneg %p5629_p11 }
  0xe1   : > { %p5637_p4 = pnand %p5636_p3, %p5630_p0 }
  0xe3   : > { %5640 = shalt.err (!%p5637_p4)
}
  0xe4   : > { %s7721_s13 = smov 8   ;;  %s7722_s10 = smov 128  }
  0xe5   : > { %4965 = dma.hbm_to_vmem [thread:$0]  (!%p6545_p12), %s6426_s30, 256, %s1151_s1, [#allocation36], %s7722_s10, %s7722_s10, %s7721_s13  }
  0xe6   : > { %s5652_s11 = scalar_lea.vmem %s1175_s26, 512  ;;  %p5660_p5 = scmp.lt.s32.totalorder %s1175_s26, %s1175_s26 }
  0xe7   : > { %p5653_p9 = scmp.ne.s32.totalorder %s1175_s26, %s5652_s11  ;;  %p5661_p6 = scmp.lt.s32.totalorder %s5652_s11, %s5652_s11 }
  0xe9   : > { %p5655_p7 = pnand %p5653_p9, %p6553_p13  ;;  %p5662_p10 = por %p5661_p6, %p5660_p5 }
  0xeb   : > { %p5656_p8 = pneg %p5655_p7 }
  0xed   : > { %p5663_p11 = pnand %p5662_p10, %p5656_p8 }
  0xef   : > { %5666 = shalt.err (!%p5663_p11)
}
  0xf0   : > { %s7723_s16 = smov 4   ;;  %s7724_s7 = smov 64  }
  0xf1   : > { %4971 = dma.hbm_to_vmem [thread:$0]  (!%p6545_p12), %s6436_s19, 512, %s1175_s26, [#allocation39], %s7724_s7, %s7724_s7, %s7723_s16  }
  0xf2   : > { %s6258_s2 = smov [#allocation41]   ;;  %s6259_s21 = smov [#allocation2]  }
  0xf3   : > { %s1200_s1 = sshll.u32 %s6258_s2, 4  ;;  %s883_s3 = sshll.u32 %s6259_s21, 4  ;;  %s1201_s1 = int_to_ptr.vmem [resolvable:$true] %s1200_s1  ;;  %s884_s3 = int_to_ptr.vmem [resolvable:$true] %s883_s3 }
  0xf4   : > { %s5678_s4 = scalar_lea.vmem %s1201_s1, 512  ;;  %p5686_p3 = scmp.lt.s32.totalorder %s1201_s1, %s1201_s1 }
  0xf5   : > { %p5679_p0 = scmp.ne.s32.totalorder %s1201_s1, %s5678_s4  ;;  %p5687_p4 = scmp.lt.s32.totalorder %s5678_s4, %s5678_s4 }
  0xf7   : > { %p5681_p1 = pnand %p5679_p0, %p6553_p13  ;;  %p5688_p9 = por %p5687_p4, %p5686_p3 }
  0xf9   : > { %p5682_p2 = pneg %p5681_p1 }
  0xfb   : > { %p5689_p7 = pnand %p5688_p9, %p5682_p2 }
  0xfd   : > { %5692 = shalt.err (!%p5689_p7)
}
  0xfe   : > { %s7725_s8 = sld [smem:[#allocation83_spill]]  ;;  %s5704_s26 = scalar_lea.vmem %s884_s3, 64 }
  0xff   : > { %p5705_p8 = scmp.ne.s32.totalorder %s884_s3, %s5704_s26  ;;  %p5712_p10 = scmp.lt.s32.totalorder %s884_s3, %s884_s3 }
 0x100   : > { %p5713_p11 = scmp.lt.s32.totalorder %s5704_s26, %s5704_s26 }
 0x101   : > { %p5707_p5 = pnand %p5705_p8, %p6553_p13 }
 0x102   : > { %p5714_p0 = por %p5713_p11, %p5712_p10 }
 0x103   : > { %p5708_p6 = pneg %p5707_p5 }
 0x104   : > { %4977 = dma.hbm_to_vmem [thread:$0]  (!%p6545_p12), %s7725_s8, 512, %s1201_s1, [#allocation42], %s7724_s7, %s7724_s7, %s7723_s16  }
 0x105   : > { %p5715_p1 = pnand %p5714_p0, %p5708_p6 }
 0x107   : > { %5718 = shalt.err (!%p5715_p1)
}
 0x108   : > { %4902 = dma.hbm_to_vmem [thread:$0]  (!%p6545_p12), %s6316_s9, 64, %s884_s3, [#allocation3]  }
 0x109   : > { %s6260_s4 = smov [#allocation7]   ;;  %s6261_s2 = smov [#allocation10]  }
 0x10a   : > { %s905_s11 = sshll.u32 %s6260_s4, 4  ;;  %s926_s21 = sshll.u32 %s6261_s2, 4  ;;  %s906_s11 = int_to_ptr.vmem [resolvable:$true] %s905_s11  ;;  %s927_s21 = int_to_ptr.vmem [resolvable:$true] %s926_s21 }
 0x10b   : > { %s5730_s1 = scalar_lea.vmem %s906_s11, 64  ;;  %p5738_p9 = scmp.lt.s32.totalorder %s906_s11, %s906_s11 }
 0x10c   : > { %p5731_p2 = scmp.ne.s32.totalorder %s906_s11, %s5730_s1  ;;  %p5739_p7 = scmp.lt.s32.totalorder %s5730_s1, %s5730_s1 }
 0x10e   : > { %p5733_p3 = pnand %p5731_p2, %p6553_p13  ;;  %p5740_p8 = por %p5739_p7, %p5738_p9 }
 0x110   : > { %p5734_p4 = pneg %p5733_p3 }
 0x112   : > { %p5741_p5 = pnand %p5740_p8, %p5734_p4 }
 0x114   : > { %5744 = shalt.err (!%p5741_p5)
}
 0x115   : > { %s7726_s26 = sld [smem:[#allocation65_spill]]  ;;  %s5756_s3 = scalar_lea.vmem %s927_s21, 512 }
 0x116   : > { %p5757_p6 = scmp.ne.s32.totalorder %s927_s21, %s5756_s3  ;;  %p5764_p0 = scmp.lt.s32.totalorder %s927_s21, %s927_s21 }
 0x117   : > { %p5765_p1 = scmp.lt.s32.totalorder %s5756_s3, %s5756_s3 }
 0x118   : > { %p5759_p10 = pnand %p5757_p6, %p6553_p13 }
 0x119   : > { %p5766_p2 = por %p5765_p1, %p5764_p0 }
 0x11a   : > { %p5760_p11 = pneg %p5759_p10 }
 0x11b   : > { %4908 = dma.hbm_to_vmem [thread:$0]  (!%p6545_p12), %s7726_s26, 64, %s906_s11, [#allocation6]  }
 0x11c   : > { %p5767_p3 = pnand %p5766_p2, %p5760_p11 }
 0x11e   : > { %5770 = shalt.err (!%p5767_p3)
}
 0x11f   : > { %s6262_s4 = smov 256   ;;  %s7727_s2 = sld [smem:[#allocation67_spill]] }
 0x120   : > { %s6263_s1 = smov 16   ;;  %s6264_s5 = smov [#allocation13]  }
 0x121   : > { %s955_s6 = sshll.u32 %s6264_s5, 4  ;;  %s6265_s11 = smov [#allocation16]   ;;  %s956_s6 = int_to_ptr.vmem [resolvable:$true] %s955_s6 }
 0x122   : > { %s981_s26 = sshll.u32 %s6265_s11, 4  ;;  %s5782_s8 = scalar_lea.vmem %s956_s6, 256  ;;  %s982_s26 = int_to_ptr.vmem [resolvable:$true] %s981_s26 }
 0x123   : > { %p5783_p4 = scmp.ne.s32.totalorder %s956_s6, %s5782_s8  ;;  %p5790_p8 = scmp.lt.s32.totalorder %s956_s6, %s956_s6 }
 0x124   : > { %p5791_p5 = scmp.lt.s32.totalorder %s5782_s8, %s5782_s8 }
 0x125   : > { %4914 = dma.hbm_to_vmem [thread:$0]  (!%p6545_p12), %s7727_s2, 512, %s927_s21, [#allocation9], %s6262_s4, %s6262_s4, %s6263_s1  }
 0x126   : > { %p5785_p9 = pnand %p5783_p4, %p6553_p13  ;;  %p5792_p6 = por %p5791_p5, %p5790_p8 }
 0x128   : > { %p5786_p7 = pneg %p5785_p9 }
 0x12a   : > { %p5793_p10 = pnand %p5792_p6, %p5786_p7 }
 0x12c   : > { %5796 = shalt.err (!%p5793_p10)
}
 0x12d   : > { %s7728_s5 = sld [smem:[#allocation70_spill]]  ;;  %s5808_s21 = scalar_lea.vmem %s982_s26, 256 }
 0x12e   : > { %p5809_p11 = scmp.ne.s32.totalorder %s982_s26, %s5808_s21  ;;  %p5816_p2 = scmp.lt.s32.totalorder %s982_s26, %s982_s26 }
 0x12f   : > { %p5817_p3 = scmp.lt.s32.totalorder %s5808_s21, %s5808_s21 }
 0x130   : > { %p5811_p0 = pnand %p5809_p11, %p6553_p13 }
 0x131   : > { %p5818_p4 = por %p5817_p3, %p5816_p2 }
 0x132   : > { %p5812_p1 = pneg %p5811_p0 }
 0x133   : > { %4920 = dma.hbm_to_vmem [thread:$0]  (!%p6545_p12), %s7728_s5, 256, %s956_s6, [#allocation12], %s7722_s10, %s7722_s10, %s7721_s13  }
 0x134   : > { %p5819_p9 = pnand %p5818_p4, %p5812_p1 }
 0x136   : > { %5822 = shalt.err (!%p5819_p9)
}
 0x137   : > { %s7729_s8 = sld [smem:[#allocation71_spill]]  ;;  %s6266_s3 = smov [#allocation19]  }
 0x138   : > { %s1007_s6 = sshll.u32 %s6266_s3, 4  ;;  %s6267_s4 = smov [#allocation22]   ;;  %s1008_s6 = int_to_ptr.vmem [resolvable:$true] %s1007_s6 }
 0x139   : > { %s1033_s2 = sshll.u32 %s6267_s4, 4  ;;  %s5834_s1 = scalar_lea.vmem %s1008_s6, 512  ;;  %s1034_s2 = int_to_ptr.vmem [resolvable:$true] %s1033_s2 }
 0x13a   : > { %p5835_p7 = scmp.ne.s32.totalorder %s1008_s6, %s5834_s1  ;;  %p5842_p6 = scmp.lt.s32.totalorder %s1008_s6, %s1008_s6 }
 0x13b   : > { %p5843_p10 = scmp.lt.s32.totalorder %s5834_s1, %s5834_s1 }
 0x13c   : > { %p5837_p8 = pnand %p5835_p7, %p6553_p13 }
 0x13d   : > { %4926 = dma.hbm_to_vmem [thread:$0]  (!%p6545_p12), %s7729_s8, 256, %s982_s26, [#allocation15], %s7722_s10, %s7722_s10, %s7721_s13  }
 0x13e   : > { %p5838_p5 = pneg %p5837_p8  ;;  %p5844_p11 = por %p5843_p10, %p5842_p6 }
 0x140   : > { %p5845_p0 = pnand %p5844_p11, %p5838_p5 }
 0x142   : > { %5848 = shalt.err (!%p5845_p0)
}
 0x143   : > { %s7730_s11 = sld [smem:[#allocation72_spill]]  ;;  %s5860_s26 = scalar_lea.vmem %s1034_s2, 256 }
 0x144   : > { %p5861_p1 = scmp.ne.s32.totalorder %s1034_s2, %s5860_s26  ;;  %p5868_p4 = scmp.lt.s32.totalorder %s1034_s2, %s1034_s2 }
 0x145   : > { %p5869_p9 = scmp.lt.s32.totalorder %s5860_s26, %s5860_s26 }
 0x146   : > { %p5863_p2 = pnand %p5861_p1, %p6553_p13 }
 0x147   : > { %p5870_p7 = por %p5869_p9, %p5868_p4 }
 0x148   : > { %p5864_p3 = pneg %p5863_p2 }
 0x149   : > { %4932 = dma.hbm_to_vmem [thread:$0]  (!%p6545_p12), %s7730_s11, 512, %s1008_s6, [#allocation18], %s7724_s7, %s7724_s7, %s7723_s16  }
 0x14a   : > { %p5871_p8 = pnand %p5870_p7, %p5864_p3 }
 0x14c   : > { %5874 = shalt.err (!%p5871_p8)
}
 0x14d   : > { %s7731_s5 = sld [smem:[#allocation74_spill]]  ;;  %s6268_s21 = smov [#allocation25]  }
 0x14e   : > { %s1059_s8 = sshll.u32 %s6268_s21, 4  ;;  %s6269_s3 = smov [#allocation28]   ;;  %s1060_s8 = int_to_ptr.vmem [resolvable:$true] %s1059_s8 }
 0x14f   : > { %s1085_s6 = sshll.u32 %s6269_s3, 4  ;;  %s5886_s4 = scalar_lea.vmem %s1060_s8, 256  ;;  %s1086_s6 = int_to_ptr.vmem [resolvable:$true] %s1085_s6 }
 0x150   : > { %p5887_p5 = scmp.ne.s32.totalorder %s1060_s8, %s5886_s4  ;;  %p5894_p11 = scmp.lt.s32.totalorder %s1060_s8, %s1060_s8 }
 0x151   : > { %p5895_p0 = scmp.lt.s32.totalorder %s5886_s4, %s5886_s4 }
 0x152   : > { %p5889_p6 = pnand %p5887_p5, %p6553_p13 }
 0x153   : > { %4938 = dma.hbm_to_vmem [thread:$0]  (!%p6545_p12), %s7731_s5, 256, %s1034_s2, [#allocation21], %s7722_s10, %s7722_s10, %s7721_s13  }
 0x154   : > { %p5890_p10 = pneg %p5889_p6  ;;  %p5896_p1 = por %p5895_p0, %p5894_p11 }
 0x156   : > { %p5897_p2 = pnand %p5896_p1, %p5890_p10 }
 0x158   : > { %5900 = shalt.err (!%p5897_p2)
}
 0x159   : > { %s7732_s2 = sld [smem:[#allocation75_spill]]  ;;  %s5912_s1 = scalar_lea.vmem %s1086_s6, 128 }
 0x15a   : > { %p5913_p3 = scmp.ne.s32.totalorder %s1086_s6, %s5912_s1  ;;  %p5920_p7 = scmp.lt.s32.totalorder %s1086_s6, %s1086_s6 }
 0x15b   : > { %p5921_p8 = scmp.lt.s32.totalorder %s5912_s1, %s5912_s1 }
 0x15c   : > { %p5915_p4 = pnand %p5913_p3, %p6553_p13 }
 0x15d   : > { %p5922_p5 = por %p5921_p8, %p5920_p7 }
 0x15e   : > { %p5916_p9 = pneg %p5915_p4 }
 0x15f   : > { %4944 = dma.hbm_to_vmem [thread:$0]  (!%p6545_p12), %s7732_s2, 256, %s1060_s8, [#allocation24], %s7722_s10, %s7722_s10, %s7721_s13  }
 0x160   : > { %p5923_p6 = pnand %p5922_p5, %p5916_p9 }
 0x162   : > { %5926 = shalt.err (!%p5923_p6)
}
 0x163   : > { %s7733_s11 = sld [smem:[#allocation77_spill]]  ;;  %s6270_s26 = smov [#allocation31]  }
 0x164   : > { %s1111_s5 = sshll.u32 %s6270_s26, 4  ;;  %s6271_s21 = smov [#allocation34]   ;;  %s1112_s5 = int_to_ptr.vmem [resolvable:$true] %s1111_s5 }
 0x165   : > { %s1137_s8 = sshll.u32 %s6271_s21, 4  ;;  %s5938_s3 = scalar_lea.vmem %s1112_s5, 512  ;;  %s1138_s8 = int_to_ptr.vmem [resolvable:$true] %s1137_s8 }
 0x166   : > { %p5939_p10 = scmp.ne.s32.totalorder %s1112_s5, %s5938_s3  ;;  %p5946_p1 = scmp.lt.s32.totalorder %s1112_s5, %s1112_s5 }
 0x167   : > { %p5947_p2 = scmp.lt.s32.totalorder %s5938_s3, %s5938_s3 }
 0x168   : > { %p5941_p11 = pnand %p5939_p10, %p6553_p13 }
 0x169   : > { %4950 = dma.hbm_to_vmem [thread:$0]  (!%p6545_p12), %s7733_s11, 128, %s1086_s6, [#allocation27], %s7724_s7, %s7724_s7, %s7723_s16  }
 0x16a   : > { %p5942_p0 = pneg %p5941_p11  ;;  %p5948_p3 = por %p5947_p2, %p5946_p1 }
 0x16c   : > { %p5949_p4 = pnand %p5948_p3, %p5942_p0 }
 0x16e   : > { %5952 = shalt.err (!%p5949_p4)
}
 0x16f   : > { %s7734_s6 = sld [smem:[#allocation79_spill]]  ;;  %s5964_s4 = scalar_lea.vmem %s1138_s8, 512 }
 0x170   : > { %p5965_p9 = scmp.ne.s32.totalorder %s1138_s8, %s5964_s4  ;;  %p5972_p5 = scmp.lt.s32.totalorder %s1138_s8, %s1138_s8 }
 0x171   : > { %p5973_p6 = scmp.lt.s32.totalorder %s5964_s4, %s5964_s4 }
 0x172   : > { %p5967_p7 = pnand %p5965_p9, %p6553_p13 }
 0x173   : > { %p5974_p10 = por %p5973_p6, %p5972_p5 }
 0x174   : > { %p5968_p8 = pneg %p5967_p7 }
 0x175   : > { %4956 = dma.hbm_to_vmem [thread:$0]  (!%p6545_p12), %s7734_s6, 512, %s1112_s5, [#allocation30], %s7722_s10, %s7722_s10, %s7721_s13  }
 0x176   : > { %p5975_p11 = pnand %p5974_p10, %p5968_p8 }
 0x178   : > { %5978 = shalt.err (!%p5975_p11)
}
 0x179   : > { %s7735_s2 = sld [smem:[#allocation80_spill]]  ;;  %s6272_s1 = smov [#allocation37]  }
 0x17a   : > { %s1164_s11 = sshll.u32 %s6272_s1, 4  ;;  %s6273_s26 = smov [#allocation40]   ;;  %s1165_s11 = int_to_ptr.vmem [resolvable:$true] %s1164_s11 }
 0x17b   : > { %s1187_s5 = sshll.u32 %s6273_s26, 4  ;;  %s5990_s21 = scalar_lea.vmem %s1165_s11, 32  ;;  %s1188_s5 = int_to_ptr.vmem [resolvable:$true] %s1187_s5 }
 0x17c   : > { %p5991_p0 = scmp.ne.s32.totalorder %s1165_s11, %s5990_s21  ;;  %p5998_p3 = scmp.lt.s32.totalorder %s1165_s11, %s1165_s11 }
 0x17d   : > { %p5999_p4 = scmp.lt.s32.totalorder %s5990_s21, %s5990_s21 }
 0x17e   : > { %p5993_p1 = pnand %p5991_p0, %p6553_p13 }
 0x17f   : > { %4962 = dma.hbm_to_vmem [thread:$0]  (!%p6545_p12), %s7735_s2, 512, %s1138_s8, [#allocation33], %s7722_s10, %s7722_s10, %s7721_s13  }
 0x180   : > { %p5994_p2 = pneg %p5993_p1  ;;  %p6000_p9 = por %p5999_p4, %p5998_p3 }
 0x182   : > { %p6001_p7 = pnand %p6000_p9, %p5994_p2 }
 0x184   : > { %6004 = shalt.err (!%p6001_p7)
}
 0x185   : > { %s7736_s3 = sld [smem:[#allocation81_spill]]  ;;  %s6016_s8 = scalar_lea.vmem %s1188_s5, 1024 }
 0x186   : > { %p6017_p8 = scmp.ne.s32.totalorder %s1188_s5, %s6016_s8  ;;  %p6024_p10 = scmp.lt.s32.totalorder %s1188_s5, %s1188_s5 }
 0x187   : > { %p6025_p11 = scmp.lt.s32.totalorder %s6016_s8, %s6016_s8 }
 0x188   : > { %p6019_p5 = pnand %p6017_p8, %p6553_p13 }
 0x189   : > { %p6026_p0 = por %p6025_p11, %p6024_p10 }
 0x18a   : > { %p6020_p6 = pneg %p6019_p5 }
 0x18b   : > { %4968 = dma.hbm_to_vmem [thread:$0]  (!%p6545_p12), %s7736_s3, 32, %s1165_s11, [#allocation36]  }
 0x18c   : > { %p6027_p1 = pnand %p6026_p0, %p6020_p6 }
 0x18e   : > { %6030 = shalt.err (!%p6027_p1)
}
 0x18f   : > { %s7737_s6 = sld [smem:[#allocation82_spill]]  ;;  %s6274_s4 = smov [#allocation43]  }
 0x190   : > { %s1213_s2 = sshll.u32 %s6274_s4, 4  ;;  %s6275_s1 = smov [#allocation44]   ;;  %s1214_s2 = int_to_ptr.vmem [resolvable:$true] %s1213_s2 }
 0x191   : > { %s1226_s11 = sshll.u32 %s6275_s1, 4  ;;  %s6042_s26 = scalar_lea.vmem %s1214_s2, 1024  ;;  %s1227_s11 = int_to_ptr.vmem [resolvable:$true] %s1226_s11 }
 0x192   : > { %p6043_p2 = scmp.ne.s32.totalorder %s1214_s2, %s6042_s26  ;;  %p6050_p9 = scmp.lt.s32.totalorder %s1214_s2, %s1214_s2 }
 0x193   : > { %p6051_p7 = scmp.lt.s32.totalorder %s6042_s26, %s6042_s26 }
 0x194   : > { %p6045_p3 = pnand %p6043_p2, %p6553_p13 }
 0x195   : > { %4974 = dma.hbm_to_vmem [thread:$0]  (!%p6545_p12), %s7737_s6, 1024, %s1188_s5, [#allocation39], %s7722_s10, %s7722_s10, %s7721_s13  }
 0x196   : > { %p6046_p4 = pneg %p6045_p3  ;;  %p6052_p8 = por %p6051_p7, %p6050_p9 }
 0x198   : > { %p6053_p5 = pnand %p6052_p8, %p6046_p4 }
 0x19a   : > { %6056 = shalt.err (!%p6053_p5)
}
 0x19b   : > { %s7738_s5 = sld [smem:[#allocation84_spill]]  ;;  %s6068_s21 = scalar_lea.vmem %s1227_s11, 512 }
 0x19c   : > { %p6069_p6 = scmp.ne.s32.totalorder %s1227_s11, %s6068_s21  ;;  %p6076_p0 = scmp.lt.s32.totalorder %s1227_s11, %s1227_s11 }
 0x19d   : > { %p6077_p1 = scmp.lt.s32.totalorder %s6068_s21, %s6068_s21 }
 0x19e   : > { %p6071_p10 = pnand %p6069_p6, %p6553_p13 }
 0x19f   : > { %p6078_p2 = por %p6077_p1, %p6076_p0 }
 0x1a0   : > { %p6072_p11 = pneg %p6071_p10 }
 0x1a1   : > { %4980 = dma.hbm_to_vmem [thread:$0]  (!%p6545_p12), %s7738_s5, 1024, %s1214_s2, [#allocation42], %s7722_s10, %s7722_s10, %s7721_s13  }
 0x1a2   : > { %p6079_p3 = pnand %p6078_p2, %p6072_p11 }
 0x1a4   : > { %6082 = shalt.err (!%p6079_p3)
}
 0x1a5   : > { %s7739_s3 = sld [smem:[#allocation85_spill]]  ;;  %p7740_p4 = scmp.ne.s32.totalorder %s7712_s18, 0 }
 0x1a6   : > { %p7741_p9 = scmp.eq.s32.totalorder (!%p7740_p4), %s6509_s28, 0 }
 0x1a7   : > { %1265 = sbr.rel (%p7740_p4) target bundleno = 6219 (0x184b), region = 160 }
 0x1ab   : > { %4983 = dma.hbm_to_vmem [thread:$0]  (!%p6545_p12), %s7739_s3, 512, %s1227_s11, [#allocation45], %s7724_s7, %s7724_s7, %s7723_s16  }
 0x1ac   : > { %6126 = dma.done.wait (%p7741_p9), [#allocation3], 64   ;;  %p7742_p13 = pmov %p7741_p9 }
 0x1ad   : > { %p7743_p7 = pmov %p7741_p9 }
 0x1ae   : > { %6128 = vsyncadd (%p7742_p13), [#allocation3], 4294967232 }
 0x1af   : > { %6130 = dma.done.wait (%p7743_p7), [#allocation6], 192   ;;  %p7744_p8 = pmov %p7743_p7 }
 0x1b0   : > { %p7745_p5 = pmov %p7743_p7 }
 0x1b1   : > { %6132 = vsyncadd (%p7744_p8), [#allocation6], 4294967104 }
 0x1b2   : > { %6134 = dma.done.wait (%p7745_p5), [#allocation9], 640   ;;  %p7746_p12 = pmov %p7745_p5 }
 0x1b3   : > { %p7747_p6 = pmov %p7745_p5 }
 0x1b4   : > { %6136 = vsyncadd (%p7746_p12), [#allocation9], 4294966656 }
 0x1b5   : > { %6138 = dma.done.wait (%p7747_p6), [#allocation12], 384   ;;  %p7748_p10 = pmov %p7745_p5 }
 0x1b6   : > { %p7749_p11 = pmov %p7745_p5 }
 0x1b7   : > { %6140 = vsyncadd (%p7748_p10), [#allocation12], 4294966912 }
 0x1b8   : > { %6142 = dma.done.wait (%p7749_p11), [#allocation15], 512   ;;  %p7750_p0 = pmov %p7745_p5 }
 0x1ba   : > { %6144 = vsyncadd (%p7750_p0), [#allocation15], 4294966784  ;;  %p7751_p1 = pmov %p7750_p0 }
 0x1bb   : > { %p7752_p2 = pmov %p7750_p0 }
 0x1bc   : > { %6146 = dma.done.wait (%p7751_p1), [#allocation18], 768  }
 0x1bd   : > { %6148 = vsyncadd (%p7752_p2), [#allocation18], 4294966528  ;;  %p7753_p3 = pmov %p7750_p0 }
 0x1be   : > { %p7754_p4 = pmov %p7750_p0 }
 0x1bf   : > { %6150 = dma.done.wait (%p7753_p3), [#allocation21], 512  }
 0x1c0   : > { %6152 = vsyncadd (%p7754_p4), [#allocation21], 4294966784  ;;  %p7755_p9 = pmov %p7750_p0 }
 0x1c1   : > { %p7756_p13 = pmov %p7750_p0 }
 0x1c2   : > { %6154 = dma.done.wait (%p7755_p9), [#allocation24], 512  }
 0x1c3   : > { %6156 = vsyncadd (%p7756_p13), [#allocation24], 4294966784  ;;  %p7757_p7 = pmov %p7750_p0 }
 0x1c4   : > { %p7758_p8 = pmov %p7750_p0 }
 0x1c5   : > { %6158 = dma.done.wait (%p7757_p7), [#allocation27], 384  }
 0x1c6   : > { %6160 = vsyncadd (%p7758_p8), [#allocation27], 4294966912  ;;  %p7759_p5 = pmov %p7750_p0 }
 0x1c7   : > { %p7760_p12 = pmov %p7750_p0 }
 0x1c8   : > { %6162 = dma.done.wait (%p7759_p5), [#allocation30], 1024  }
 0x1c9   : > { %6164 = vsyncadd (%p7760_p12), [#allocation30], 4294966272  ;;  %p7761_p6 = pmov %p7750_p0 }
 0x1ca   : > { %p7762_p10 = pmov %p7750_p0 }
 0x1cb   : > { %6166 = dma.done.wait (%p7761_p6), [#allocation33], 1280  }
 0x1cc   : > { %6168 = vsyncadd (%p7762_p10), [#allocation33], 4294966016  ;;  %p7763_p11 = pmov %p7750_p0 }
 0x1ce   : > { %6170 = dma.done.wait (%p7763_p11), [#allocation36], 288  }
 0x1cf   : > { %6172 = vsyncadd (%p7750_p0), [#allocation36], 4294967008  ;;  %p7764_p1 = pmov %p7750_p0 }
 0x1d0   : > { %p7765_p2 = pmov %p7750_p0 }
 0x1d1   : > { %6174 = dma.done.wait (%p7764_p1), [#allocation39], 1536  }
 0x1d2   : > { %6176 = vsyncadd (%p7765_p2), [#allocation39], 4294965760  ;;  %p7766_p3 = pmov %p7750_p0 }
 0x1d3   : > { %p7767_p4 = pmov %p7750_p0 }
 0x1d4   : > { %6178 = dma.done.wait (%p7766_p3), [#allocation42], 1536  }
 0x1d5   : > { %6180 = vsyncadd (%p7767_p4), [#allocation42], 4294965760  ;;  %p7768_p9 = pmov %p7750_p0 }
 0x1d6   : > { %p7769_p13 = pmov %p7750_p0 }
 0x1d7   : > { %6182 = dma.done.wait (%p7768_p9), [#allocation45], 512  }
 0x1d8   : > { %6184 = vsyncadd (%p7769_p13), [#allocation45], 4294966784  ;;  %s7770_s22 = sld [smem:[#allocation63_spill]]  ;;  %p1460_p7 = scmp.lt.s32.totalorder %s6509_s28, 1  ;;  %v6282_v3 = vmov 0   ;;  %v1469_v4 = vld [vmem:[#allocation5] sm:$0xff]  ;;  %v1519_v5 = vlaneseq }
 0x1d9   : > { %s6276_s10 = smov 113   ;;  %s6277_s16 = smov 111   ;;  %1700 = vmatprep.mubr.bf16.mxu0 %v6282_v3  ;;  %5184 = vset.pattern.permute.xlu0 %v6282_v3  ;;  %v6871_v10 = vld [vmem:[#allocation10 + $0x8] sm:$0xff]  ;;  %v6873_v11 = vld [vmem:[#allocation10] sm:$0xff]  ;;  %vm1627_vm0 = vcmask 908288   ;;  %vm1599_vm1 = vcmask 924672  }
 0x1da   : > { %s1461_s23 = scalar_select %p1460_p7, %s6509_s28, 1  ;;  %1843 = vmatprep.mubr.bf16.mxu1 %v6282_v3  ;;  %5205 = vset.pattern.permute.xlu1 %v6282_v3  ;;  %v6866_v6 = vshrl.u32 %v1519_v5, 7  ;;  %v6878_v13 = vld [vmem:[#allocation10 + $0x18] ss:$0 sm:$0xff]  ;;  %v6880_v14 = vld [vmem:[#allocation10 + $0x10] ss:$0 sm:$0xff] }
 0x1db   : > { %s6278_s7 = smov 127   ;;  %s6279_s8 = smov 112   ;;  %vm1580_vm2 = vcmask 1039360   ;;  %vm1661_vm3 = vcmask 1043456   ;;  %vm1618_vm4 = vcmask 916480   ;;  %vm6285_vm5 = vmmov 1  }
 0x1dc   : > { %s4562_s18 = sshll.u32 %s1461_s23, 4  ;;  %s6280_s6 = smov 15   ;;  %v6869_v9 = vsub.s32 6, %v6866_v6  ;;  %v6876_v12 = vsub.s32 5, %v6866_v6  ;;  %vm6912_vm6 = vmpackc.low %vm1618_vm4, %vm6285_vm5  ;;  %v6921_v45 = vsub.s32 3, %v6866_v6  ;;  %v6926_v48 = vsub.s32 2, %v6866_v6 }
 0x1dd   : > { %s6281_s4 = smov 1   ;;  %s6283_s2 = smov 17   ;;  %vm1561_vm7 = vcmask 7168   ;;  %vm1542_vm8 = vcmask 121856   ;;  %v6948_v58 = vsub.s32 0, %v6866_v6  ;;  %vm1514_vm9 = vcmask 138240  }
 0x1de   : > { %s1464_s13 = scalar_lea.vmem %s7770_s22, %s4562_s18  ;;  %s6284_s1 = smov 16   ;;  %v6884_v17 = vrot.slane %v6871_v10, %v6869_v9  ;;  %v6888_v18 = vrot.slane %v6873_v11, %v6869_v9  ;;  %v6895_v22 = vrot.slane %v6871_v10, %v6876_v12  ;;  %v6908_v37 = vrot.slane %v6873_v11, %v6876_v12 }
 0x1df   : > { %v6830_v0 = vld [vmem:[%s1464_s13 + $0x8] sm:$0xff]  ;;  %v6832_v1 = vld [vmem:[%s1464_s13] sm:$0xff]  ;;  %v6931_v52 = vrot.slane %v6873_v11, %v6921_v45  ;;  %v6936_v54 = vrot.slane %v6871_v10, %v6926_v48  ;;  %v6940_v55 = vrot.slane %v6871_v10, %v6921_v45  ;;  %v6944_v56 = vrot.slane %v6873_v11, %v6926_v48  ;;  %s7775_s11 = sld [smem:[#allocation68_spill]]  ;;  %s6287_s26 = smov 121  }
 0x1e0   : > { %1597 = vrot.lane.b32.xlu1 %v6830_v0, %s6276_s10  ;;  %1623 = vrot.lane.b32.xlu0 %v6832_v1, %s6277_s16  ;;  %v5174_v2 = vpack.i.bf16 %v6830_v0, %v6832_v1  ;;  %v6962_v5 = vrot.slane %v6873_v11, %v6948_v58  ;;  %vm1533_vm10 = vcmask 130048   ;;  %vm1657_vm13 = vcmask 588800   ;;  %s6288_s5 = smov 119   ;;  %s6289_s21 = smov 120  }
 0x1e1   : > { %vm4403_vm11 = vmneg %vm1533_vm10  ;;  %s6290_s3 = smov 7   ;;  %vm6291_vm14 = vmmov 0   ;;  %s6292_s22 = smov 8   ;;  %vm2095_vm15 = vcmask 449536  }
 0x1e2   : > { %vm6971_vm12 = vmpackc.low %vm4403_vm11, %vm6285_vm5  ;;  %s6293_s23 = smov 9   ;;  %s6294_s18 = smov 125  }
 0x1e3   : > { %s6295_s13 = smov 124   ;;  %p7788_p5 = scmp.ne.s32.totalorder %s7709_s15, 0 }
 0x1e4   : > { %1595 = vrot.lane.b32.xlu1 %v6832_v1, %s6276_s10  ;;  %1625 = vrot.lane.b32.xlu0 %v6830_v0, %s6277_s16 }
 0x1e8   : > { %1578 = vrot.lane.b32.xlu1 %v6830_v0, %s6278_s7  ;;  %5175 = vrot.lane.b32.xlu0 %v5174_v2, %s6279_s8 }
 0x1ec   : > { %1538 = vrot.lane.b32.xlu1 %v6832_v1, %s6280_s6  ;;  %1576 = vrot.lane.b32.xlu0 %v6832_v1, %s6278_s7 }
 0x1f0   : > { %1557 = vrot.lane.b32.xlu1 %v6832_v1, %s6281_s4  ;;  %1540 = vrot.lane.b32.xlu0 %v6830_v0, %s6280_s6 }
 0x1f4   : > { %1510 = vrot.lane.b32.xlu1 %v6832_v1, %s6283_s2  ;;  %1559 = vrot.lane.b32.xlu0 %v6830_v0, %s6281_s4 }
 0x1f8   : > { %5180 = vrot.lane.b32.xlu1 %v5174_v2, %s6284_s1  ;;  %1512 = vrot.lane.b32.xlu0 %v6830_v0, %s6283_s2  ;;  %v6957_v2 = vrot.slane %v6871_v10, %v6948_v58 }
 0x1fc   : > { %1654 = vperm.xlu0 %5184, %v1469_v4  }
 0x252   : > { %v1598_v7 = vpop.permute.xlu1 %1597  ;;  %v1624_v8 = vpop.permute.xlu0 %1623 }
 0x253   : > { %v1603_v21 = vsel %vm1599_vm1, %v1598_v7, 0.0 }
 0x254   : > { %v1613_v30 = vmul.f32 %v6884_v17, %v1603_v21 }
 0x256   : > { %v1596_v15 = vpop.permute.xlu1 %1595  ;;  %v1626_v16 = vpop.permute.xlu0 %1625 }
 0x257   : > { %v1628_v19 = vsel %vm1627_vm0, %v1624_v8, %v1626_v16  ;;  %v1631_v20 = vsel %vm1627_vm0, %v1626_v16, 0.0  ;;  %v1600_v25 = vsel %vm1599_vm1, %v1596_v15, %v1598_v7 }
 0x258   : > { %v1641_v23 = vmul.f32 %v6878_v13, %v1631_v20  ;;  %v1640_v24 = vmul.f32 %v6880_v14, %v1628_v19  ;;  %v1612_v34 = vmul.f32 %v6888_v18, %v1600_v25  ;;  %v5289_v25 = vld [vmem:[%s7775_s11 + $0x30] sm:$0xff]  }
 0x25a   : > { %v1579_v26 = vpop.permute.xlu1 %1578  ;;  %v5176_v27 = vpop.permute.xlu0 %5175  ;;  %v1651_v28 = vpack.c.bf16 %v1641_v23, %v1641_v23  ;;  %v1650_v29 = vpack.c.bf16 %v1640_v24, %v1640_v24 }
 0x25b   : > { %v1584_v31 = vsel %vm1580_vm2, %v1579_v26, 0.0  ;;  %v5178_v32 = vunpack.i.h.bf16 %v5176_v27  ;;  %v5177_v33 = vunpack.i.l.bf16 %v5176_v27  ;;  %v1468_v27 = vld [vmem:[#allocation2] sm:$0xf] }
 0x25c   : > { %v1594_v35 = vmul.f32 %v6895_v22, %v1584_v31  ;;  %4399 = vmatprep.subr.msk.bf16.mxu0 %vm1661_vm3, %v1651_v28  ;;  %v1663_v36 = vsel %vm1661_vm3, %v1650_v29, 0 }
 0x25d   : > { %v4401_v39 = vpack.c.bf16 %v5178_v32, %v1613_v30  ;;  %1675 = vmatpush1.bf16.msra.mxu0 %v1663_v36  ;;  %v1619_v40 = vsel %vm1618_vm4, %v5177_v33, %v5178_v32  ;;  %v1471_v36 = vld [vmem:[#allocation8] sm:$0xff] }
 0x25e   : > { %v1539_v41 = vpop.permute.xlu1 %1538  ;;  %v1577_v42 = vpop.permute.xlu0 %1576  ;;  %v1648_v43 = vpack.c.bf16 %v1619_v40, %v1612_v34  ;;  %v1647_v47 = vpack.c.bf16 %v1594_v35, %v6830_v0 }
 0x25f   : > { %v1581_v44 = vsel %vm1580_vm2, %v1577_v42, %v1579_v26  ;;  %4402 = vmatprep.subr.msk.bf16.mxu0 %vm6912_vm6, %v4401_v39  ;;  %v1546_v59 = vsel %vm1542_vm8, 0.0, %v1539_v41 }
 0x260   : > { %v1593_v46 = vmul.f32 %v6908_v37, %v1581_v44  ;;  %v1555_v4 = vmul.f32 %v6944_v56, %v1546_v59 }
 0x261   : > { %1677 = vmatpush1.bf16.msra.mxu0 %v1648_v43 }
 0x262   : > { %v1558_v49 = vpop.permute.xlu1 %1557  ;;  %v1541_v50 = vpop.permute.xlu0 %1540  ;;  %1678 = vmatprep.subr.bf16.mxu0 %v1647_v47  ;;  %v1646_v51 = vpack.c.bf16 %v1593_v46, %v6832_v1 }
 0x263   : > { %v1565_v53 = vsel %vm1561_vm7, 0.0, %v1558_v49  ;;  %v1543_v57 = vsel %vm1542_vm8, %v1539_v41, %v1541_v50 }
 0x264   : > { %v1574_v62 = vmul.f32 %v6931_v52, %v1565_v53  ;;  %v1556_v0 = vmul.f32 %v6936_v54, %v1543_v57 }
 0x265   : > { %1679 = vmatpush1.bf16.msra.mxu0 %v1646_v51 }
 0x266   : > { %v1511_v60 = vpop.permute.xlu1 %1510  ;;  %v1560_v61 = vpop.permute.xlu0 %1559  ;;  %v1644_v21 = vpack.c.bf16 %v1574_v62, %v1555_v4 }
 0x267   : > { %v1562_v63 = vsel %vm1561_vm7, %v1558_v49, %v1560_v61  ;;  %v1518_v6 = vsel %vm1514_vm9, 0.0, %v1511_v60 }
 0x268   : > { %v1575_v1 = vmul.f32 %v6940_v55, %v1562_v63  ;;  %v1527_v23 = vmul.f32 %v6962_v5, %v1518_v6 }
 0x26a   : > { %v5181_v7 = vpop.permute.xlu1 %5180  ;;  %v1513_v8 = vpop.permute.xlu0 %1512  ;;  %v1645_v15 = vpack.c.bf16 %v1575_v1, %v1556_v0 }
 0x26b   : > { %v5183_v16 = vunpack.i.h.bf16 %v5181_v7  ;;  %v5182_v19 = vunpack.i.l.bf16 %v5181_v7  ;;  %v1515_v20 = vsel %vm1514_vm9, %v1511_v60, %v1513_v8 }
 0x26c   : > { %v1528_v10 = vmul.f32 %v6957_v2, %v1515_v20  ;;  %1680 = vmatprep.subr.bf16.mxu0 %v1645_v15 }
 0x26d   : > { %1681 = vmatpush1.bf16.msra.mxu0 %v1644_v21  ;;  %v1534_v11 = vsel %vm1533_vm10, %v5182_v19, %v5183_v16  ;;  %v4405_v26 = vpack.c.bf16 %v5182_v19, %v1527_v23 }
 0x26e   : > { %v1643_v24 = vpack.c.bf16 %v1534_v11, %v1528_v10 }
 0x270   : > { %1682 = vmatprep.subr.bf16.mxu0 %v1643_v24 }
 0x271   : > { %4406 = vmatpush1.bf16.msk.msra.mxu0 %vm6971_vm12, %v4405_v26 }
 0x274   : > { %4407 = vmatmul.mubr.msk.bf16.vlgmr.msra.gmra.mxu0 %vm1657_vm13, %v1468_v27 }
 0x277   : > { %v1655_v28 = vpop.permute.xlu0 %1654 }
 0x334   : > { %v1702_v29 = vpop.f32.mrf.mxu0 }
 0x335   : > { %v6978_v30 = vadd.f32 %v1702_v29, %v1655_v28 }
 0x336   : > { %v1704_v31 = vpop.f32.mrf.mxu0 }
 0x337   : > { %1749 = vrot.lane.b32.xlu0 %v6978_v30, %s6278_s7  ;;  %1777 = vrot.lane.b32.xlu1 %v6978_v30, %s6277_s16  ;;  %v1705_v33 = vadd.f32 %v1704_v31, %v1655_v28 }
 0x338   : > { %v1706_v32 = vpop.f32.mrf.mxu0 }
 0x339   : > { %v5185_v35 = vpack.i.bf16 %v1705_v33, %v6978_v30 }
 0x33a   : > { %v1707_v34 = vpop.f32.mrf.mxu0 }
 0x33b   : > { %1761 = vrot.lane.b32.xlu0 %v1705_v33, %s6276_s10  ;;  %1759 = vrot.lane.b32.xlu1 %v6978_v30, %s6276_s10  ;;  %s6296_s10 = smov 3  }
 0x33f   : > { %5186 = vrot.lane.b32.xlu0 %v5185_v35, %s6279_s8  ;;  %1779 = vrot.lane.b32.xlu1 %v1705_v33, %s6277_s16  ;;  %s6297_s16 = smov 4  }
 0x343   : > { %1731 = vrot.lane.b32.xlu0 %v1705_v33, %s6280_s6  ;;  %1729 = vrot.lane.b32.xlu1 %v6978_v30, %s6280_s6  ;;  %s6299_s6 = smov 123  }
 0x347   : > { %1741 = vrot.lane.b32.xlu0 %v1705_v33, %s6281_s4  ;;  %1751 = vrot.lane.b32.xlu1 %v1705_v33, %s6278_s7 }
 0x34b   : > { %1713 = vrot.lane.b32.xlu0 %v1705_v33, %s6283_s2  ;;  %1739 = vrot.lane.b32.xlu1 %v6978_v30, %s6281_s4 }
 0x34f   : > { %1799 = vperm.xlu0 %5184, %v1471_v36   ;;  %1711 = vrot.lane.b32.xlu1 %v6978_v30, %s6283_s2  ;;  %s6300_s2 = smov 126  }
 0x353   : > { %5191 = vrot.lane.b32.xlu1 %v5185_v35, %s6284_s1  ;;  %s6301_s1 = smov 2  }
 0x3a9   : > { %v1750_v39 = vpop.permute.xlu0 %1749  ;;  %v1778_v40 = vpop.permute.xlu1 %1777 }
 0x3ad   : > { %v1762_v41 = vpop.permute.xlu0 %1761  ;;  %v1760_v42 = vpop.permute.xlu1 %1759 }
 0x3ae   : > { %v1766_v46 = vsel %vm1599_vm1, %v1762_v41, 0.0  ;;  %v1763_v60 = vsel %vm1599_vm1, %v1760_v42, %v1762_v41  ;;  %v5286_v41 = vld [vmem:[%s7775_s11 + $0x78] sm:$0xff]   ;;  %vm2070_vm1 = vcmask 515072  }
 0x3af   : > { %v1768_v59 = vmul.f32 %v1766_v46, %v6884_v17  ;;  %v1767_v7 = vmul.f32 %v1763_v60, %v6888_v18  ;;  %v5287_v42 = vld [vmem:[%s7775_s11 + $0x38] sm:$0xff]   ;;  %4563 = vmatprep.subr.bf16.mxu0 %v5286_v41 }
 0x3b0   : > { %4564 = vmatpush3.bf16.msra.mxu0 %v5287_v42  ;;  %v5294_v60 = vld [vmem:[%s7775_s11 + $0x58] sm:$0xff]  }
 0x3b1   : > { %v5187_v43 = vpop.permute.xlu0 %5186  ;;  %v1780_v44 = vpop.permute.xlu1 %1779 }
 0x3b2   : > { %v1781_v47 = vsel %vm1627_vm0, %v1778_v40, %v1780_v44  ;;  %v1784_v49 = vsel %vm1627_vm0, %v1780_v44, 0.0  ;;  %v5189_v50 = vunpack.i.h.bf16 %v5187_v43  ;;  %v5188_v51 = vunpack.i.l.bf16 %v5187_v43 }
 0x3b3   : > { %v1786_v53 = vmul.f32 %v6878_v13, %v1784_v49  ;;  %v1785_v57 = vmul.f32 %v6880_v14, %v1781_v47  ;;  %vm2080_vm0 = vcmask 465920  }
 0x3b4   : > { %v4410_v0 = vpack.c.bf16 %v5189_v50, %v1768_v59  ;;  %v1773_v6 = vsel %vm1618_vm4, %v5188_v51, %v5189_v50  ;;  %v5290_v50 = vld [vmem:[%s7775_s11 + $0x68] sm:$0xff]   ;;  %v5293_v59 = vld [vmem:[%s7775_s11 + $0x20] sm:$0xff]  }
 0x3b5   : > { %v1730_v61 = vpop.permute.xlu1 %1729  ;;  %v1796_v62 = vpack.c.bf16 %v1786_v53, %v1786_v53  ;;  %v1795_v63 = vpack.c.bf16 %v1785_v57, %v1785_v57  ;;  %v1732_v1 = vpop.permute.xlu0 %1731  ;;  %v1793_v8 = vpack.c.bf16 %v1773_v6, %v1767_v7  ;;  %v5291_v53 = vld [vmem:[%s7775_s11 + $0x28] sm:$0xff]   ;;  %v5292_v57 = vld [vmem:[%s7775_s11 + $0x60] sm:$0xff]  }
 0x3b6   : > { %v1733_v19 = vsel %vm1542_vm8, %v1730_v61, %v1732_v1  ;;  %v1736_v20 = vsel %vm1542_vm8, 0.0, %v1730_v61  ;;  %v5295_v61 = vld [vmem:[%s7775_s11 + $0x18] sm:$0xff]   ;;  %v5299_v1 = vld [vmem:[%s7775_s11 + $0x8] sm:$0xff]   ;;  %v5301_v6 = vld [vmem:[%s7775_s11] sm:$0xff]  }
 0x3b7   : > { %4408 = vmatprep.subr.msk.bf16.mxu1 %vm1661_vm3, %v1796_v62  ;;  %v1806_v4 = vsel %vm1661_vm3, %v1795_v63, 0  ;;  %v1737_v24 = vmul.f32 %v1736_v20, %v6944_v56  ;;  %v5296_v62 = vld [vmem:[%s7775_s11 + $0x50] sm:$0xff]  }
 0x3b8   : > { %1818 = vmatpush1.bf16.msra.mxu1 %v1806_v4  ;;  %v5297_v63 = vld [vmem:[%s7775_s11 + $0x10] sm:$0xff]   ;;  %v5300_v4 = vld [vmem:[%s7775_s11 + $0x40] sm:$0xff]  }
 0x3b9   : > { %4411 = vmatprep.subr.msk.bf16.mxu1 %vm6912_vm6, %v4410_v0  ;;  %v1752_v13 = vpop.permute.xlu1 %1751  ;;  %v1742_v18 = vpop.permute.xlu0 %1741  ;;  %v5298_v0 = vld [vmem:[%s7775_s11 + $0x48] sm:$0xff]  }
 0x3ba   : > { %v1753_v14 = vsel %vm1580_vm2, %v1750_v39, %v1752_v13  ;;  %v1756_v17 = vsel %vm1580_vm2, %v1752_v13, 0.0  ;;  %v1470_v39 = vld [vmem:[#allocation7] sm:$0xf] }
 0x3bb   : > { %v1757_v15 = vmul.f32 %v1753_v14, %v6908_v37  ;;  %v1758_v16 = vmul.f32 %v1756_v17, %v6895_v22  ;;  %v1738_v37 = vmul.f32 %v1733_v19, %v6936_v54 }
 0x3bc   : > { %1820 = vmatpush1.bf16.msra.mxu1 %v1793_v8 }
 0x3bd   : > { %v1740_v21 = vpop.permute.xlu1 %1739  ;;  %v1792_v10 = vpack.c.bf16 %v1758_v16, %v1705_v33  ;;  %v1791_v38 = vpack.c.bf16 %v1757_v15, %v6978_v30  ;;  %v1714_v31 = vpop.permute.xlu0 %1713 }
 0x3be   : > { %v1743_v23 = vsel %vm1561_vm7, %v1740_v21, %v1742_v18  ;;  %v1746_v11 = vsel %vm1561_vm7, 0.0, %v1740_v21 }
 0x3bf   : > { %v1747_v22 = vmul.f32 %v1746_v11, %v6931_v52  ;;  %v1748_v26 = vmul.f32 %v1743_v23, %v6940_v55  ;;  %1821 = vmatprep.subr.bf16.mxu1 %v1792_v10 }
 0x3c0   : > { %1822 = vmatpush1.bf16.msra.mxu1 %v1791_v38 }
 0x3c1   : > { %v1712_v27 = vpop.permute.xlu1 %1711  ;;  %v1790_v28 = vpack.c.bf16 %v1748_v26, %v1738_v37  ;;  %v1789_v29 = vpack.c.bf16 %v1747_v22, %v1737_v24  ;;  %v6286_v22 = vmov 0.0  }
 0x3c2   : > { %v1715_v30 = vsel %vm1514_vm9, %v1712_v27, %v1714_v31  ;;  %v1718_v56 = vsel %vm1514_vm9, 0.0, %v1712_v27  ;;  %vm2046_vm9 = vcmask 64512  }
 0x3c3   : > { %1823 = vmatprep.subr.bf16.mxu1 %v1790_v28  ;;  %v1720_v55 = vmul.f32 %v1715_v30, %v6957_v2  ;;  %v1719_v33 = vmul.f32 %v1718_v56, %v6962_v5  ;;  %v5288_v2 = vld [vmem:[%s7775_s11 + $0x70] sm:$0xff]   ;;  %v2017_v30 = vld [vmem:[#allocation13 + $0x8] sm:$0xff]  ;;  %v2016_v56 = vld [vmem:[#allocation13] sm:$0xff] }
 0x3c4   : > { %1824 = vmatpush1.bf16.msra.mxu1 %v1789_v29  ;;  %4565 = vmatprep.subr.bf16.mxu0 %v5288_v2  ;;  %vm7117_vm11 = vmneg %vm2046_vm9 }
 0x3c5   : > { %v5192_v54 = vpop.permute.xlu1 %5191  ;;  %4566 = vmatpush3.bf16.msra.mxu0 %v5289_v25 }
 0x3c6   : > { %v5194_v32 = vunpack.i.h.bf16 %v5192_v54  ;;  %v5193_v52 = vunpack.i.l.bf16 %v5192_v54  ;;  %4567 = vmatprep.subr.bf16.mxu0 %v5290_v50  ;;  %v2022_v54 = vld [vmem:[#allocation17] sm:$0xff] }
 0x3c7   : > { %v7091_v2 = vrot.slane %v2022_v54, %v6876_v12  ;;  %v7103_v50 = vrot.slane %v2022_v54, %v6926_v48 }
 0x3c8   : > { %v1725_v34 = vsel %vm1533_vm10, %v5193_v52, %v5194_v32  ;;  %v4414_v36 = vpack.c.bf16 %v5193_v52, %v1719_v33  ;;  %v7081_v32 = vld [vmem:[#allocation17 + $0x8] ss:$0 sm:$0xff]  ;;  %v7084_v33 = vrot.slane %v2022_v54, %v6869_v9 }
 0x3c9   : > { %v1788_v35 = vpack.c.bf16 %v1725_v34, %v1720_v55  ;;  %4568 = vmatpush3.bf16.msra.mxu0 %v5291_v53 }
 0x3ca   : > { %v1800_v43 = vpop.permute.xlu0 %1799  ;;  %4569 = vmatprep.subr.bf16.mxu0 %v5292_v57 }
 0x3cb   : > { %1825 = vmatprep.subr.bf16.mxu1 %v1788_v35 }
 0x3cc   : > { %4415 = vmatpush1.bf16.msk.msra.mxu1 %vm6971_vm12, %v4414_v36  ;;  %vm4439_vm12 = vmpackc.low %vm7117_vm11, %vm6285_vm5 }
 0x3cd   : > { %4570 = vmatpush3.bf16.msra.mxu0 %v5293_v59  ;;  %4666 = vmatprep.subr.bf16.mxu1 %v6286_v22 }
 0x3ce   : > { %4571 = vmatprep.subr.bf16.mxu0 %v5294_v60 }
 0x3cf   : > { %4416 = vmatmul.mubr.msk.bf16.vlgmr.msra.gmra.mxu1 %vm1657_vm13, %v1470_v39 }
 0x3d0   : > { %4676 = vmatprep.mubr.msk.bf16.mxu1 %vm6291_vm14, %v6286_v22 }
 0x3d1   : > { %4572 = vmatpush3.bf16.msra.mxu0 %v5295_v61 }
 0x3d2   : > { %4573 = vmatprep.subr.bf16.mxu0 %v5296_v62  ;;  %v7112_v62 = vrot.slane %v2022_v54, %v6948_v58 }
 0x3d5   : > { %4574 = vmatpush3.bf16.msra.mxu0 %v5297_v63 }
 0x3d6   : > { %4575 = vmatprep.subr.bf16.mxu0 %v5298_v0 }
 0x3d9   : > { %4576 = vmatpush3.bf16.msra.mxu0 %v5299_v1 }
 0x3da   : > { %4577 = vmatprep.subr.bf16.mxu0 %v5300_v4 }
 0x3dd   : > { %4578 = vmatpush3.bf16.msra.mxu0 %v5301_v6 }
 0x3de   : > { %4680 = vmatprep.subr.bf16.mxu0 %v6286_v22 }
 0x48f   : > { %v1845_v40 = vpop.f32.mrf.mxu1 }
 0x490   : > { %v1846_v44 = vadd.f32 %v1845_v40, %v1800_v43 }
 0x491   : > { %v1847_v5 = vpop.f32.mrf.mxu1 }
 0x492   : > { %v1848_v46 = vadd.f32 %v1847_v5, %v1800_v43 }
 0x493   : > { %v1849_v47 = vpop.f32.mrf.mxu1 }
 0x494   : > { %v5195_v49 = vpack.i.bf16 %v1846_v44, %v1848_v46 }
 0x495   : > { %v1850_v51 = vpop.f32.mrf.mxu1 }
 0x496   : > { %5196 = vrot.lane.b32.xlu1 %v5195_v49, %s6278_s7  ;;  %v7100_v49 = vrot.slane %v2022_v54, %v6921_v45 }
 0x508   : > { %v5197_v7 = vpop.permute.xlu1 %5196 }
 0x509   : > { %v5199_v13 = vunpack.i.h.bf16 %v5197_v7  ;;  %v5198_v14 = vunpack.i.l.bf16 %v5197_v7 }
 0x50b   : > { %v1861_v17 = vsel %vm1580_vm2, %v5198_v14, 0.0  ;;  %v1858_v8 = vsel %vm1580_vm2, %v5199_v13, %v5198_v14  ;;  %vm2090_vm2 = vcmask 457728   ;;  %v5302_v13 = vld [vmem:[#allocation11] sm:$0xff]  }
 0x50c   : > { %v1862_v15 = vmax.f32 %v1846_v44, %v1858_v8  ;;  %v1863_v16 = vmax.f32 %v1848_v46, %v1861_v17  ;;  %vm4435_vm6 = vmpackc.low %vm2090_vm2, %vm6285_vm5 }
 0x50d   : > { %vm4445_vm5 = vmpackc.low %vm2090_vm2, %vm2090_vm2 }
 0x50e   : > { %v5200_v19 = vpack.i.bf16 %v1862_v15, %v1863_v16 }
 0x510   : > { %5201 = vrot.lane.b32.xlu0 %v5200_v19, %s6279_s8  ;;  %s6298_s8 = smov 5  }
 0x582   : > { %v5202_v20 = vpop.permute.xlu0 %5201 }
 0x583   : > { %v5204_v18 = vunpack.i.h.bf16 %v5202_v20  ;;  %v5203_v21 = vunpack.i.l.bf16 %v5202_v20 }
 0x585   : > { %v1870_v10 = vsel %vm1618_vm4, %v5204_v18, %v5203_v21  ;;  %v1873_v38 = vsel %vm1618_vm4, %v5203_v21, 0.0  ;;  %vm2051_vm4 = vcmask 56320  }
 0x586   : > { %v1875_v23 = vmax.f32 %v1863_v16, %v1873_v38  ;;  %v1874_v11 = vmax.f32 %v1862_v15, %v1870_v10  ;;  %v2021_v38 = vld [vmem:[#allocation16 + $0x8] sm:$0xff] }
 0x588   : > { %v1877_v24 = vpack.c.bf16 %v1875_v23, %v1875_v23  ;;  %v1876_v37 = vpack.c.bf16 %v1874_v11, %v1874_v11  ;;  %v5303_v23 = vld [vmem:[#allocation14 + $0x4] ss:$8 sps:$4 sm:$0xff]   ;;  %v2020_v11 = vld [vmem:[#allocation16] sm:$0xff] }
 0x58a   : > { %2006 = vmatprep.mubr.bf16.mxu0 %v1877_v24 }
 0x58b   : > { %2007 = vmatmul.mubr.bf16.vlgmr.msra.gmra.mxu0 %v1876_v37 }
 0x58c   : > { %4688 = vmatprep.mubr.msk.bf16.mxu0 %vm6291_vm14, %v6286_v22 }
 0x64b   : > { %v4579_v26 = vpop.f32.mrf.mxu0 }
 0x64d   : > { %v4580_v27 = vpop.f32.mrf.mxu0 }
 0x64e   : > { %v7059_v28 = vadd.f32 %v4580_v27, %v4579_v26 }
 0x64f   : > { %v4582_v29 = vpop.f32.mrf.mxu0 }
 0x650   : > { %2077 = vrot.lane.b32.xlu0 %v7059_v28, %s6287_s26  ;;  %2092 = vrot.lane.b32.xlu1 %v7059_v28, %s6288_s5 }
 0x651   : > { %v4583_v31 = vpop.f32.mrf.mxu0 }
 0x654   : > { %2067 = vrot.lane.b32.xlu0 %v7059_v28, %s6278_s7  ;;  %2087 = vrot.lane.b32.xlu1 %v7059_v28, %s6289_s21 }
 0x658   : > { %2058 = vrot.lane.b32.xlu0 %v7059_v28, %s6281_s4  ;;  %2048 = vrot.lane.b32.xlu1 %v7059_v28, %s6290_s3 }
 0x65c   : > { %2043 = vrot.lane.b32.xlu0 %v7059_v28, %s6292_s22  ;;  %2033 = vrot.lane.b32.xlu1 %v7059_v28, %s6293_s23 }
 0x660   : > { %2114 = vperm.xlu0 %5184, %v2017_v30   ;;  %2109 = vperm.xlu1 %5205, %v2016_v56  }
 0x6c2   : > { %v2078_v52 = vpop.permute.xlu0 %2077  ;;  %v2093_v55 = vpop.permute.xlu1 %2092 }
 0x6c3   : > { %v2096_v34 = vsel %vm2095_vm15, %v2093_v55, 0.0  ;;  %v2081_v35 = vsel %vm2080_vm0, %v2078_v52, 0.0 }
 0x6c4   : > { %v2101_v36 = vmul.f32 %v7081_v32, %v2096_v34  ;;  %v2086_v42 = vmul.f32 %v7084_v33, %v2081_v35 }
 0x6c6   : > { %v2106_v39 = vpack.c.bf16 %v2101_v36, %v2101_v36  ;;  %v2068_v40 = vpop.permute.xlu0 %2067  ;;  %v2088_v41 = vpop.permute.xlu1 %2087 }
 0x6c7   : > { %v2071_v43 = vsel %vm2070_vm1, %v2068_v40, 0.0  ;;  %v4436_v25 = vpack.c.bf16 %v2088_v41, %v2086_v42 }
 0x6c8   : > { %v2126_v5 = vsel %vm1661_vm3, %v2106_v39, 0  ;;  %v2076_v47 = vmul.f32 %v7091_v2, %v2071_v43  ;;  %vm2036_vm3 = vcmask 72704  }
 0x6c9   : > { %4667 = vmatpush3.bf16.msra.mxu1 %v2126_v5 }
 0x6ca   : > { %v2059_v44 = vpop.permute.xlu0 %2058  ;;  %v2049_v46 = vpop.permute.xlu1 %2048  ;;  %4668 = vmatprep.subr.bf16.mxu1 %v6286_v22  ;;  %v2104_v59 = vpack.c.bf16 %v2076_v47, %v7059_v28 }
 0x6cb   : > { %v2061_v51 = vsel %vm1561_vm7, 0.0, %v2059_v44  ;;  %v2052_v53 = vsel %vm2051_vm4, 0.0, %v2049_v46 }
 0x6cc   : > { %v2066_v60 = vmul.f32 %v7100_v49, %v2061_v51  ;;  %v2057_v61 = vmul.f32 %v7103_v50, %v2052_v53 }
 0x6cd   : > { %4669 = vmatpush3.bf16.msk.msra.mxu1 %vm4435_vm6, %v4436_v25  ;;  %vm2448_vm6 = vcmask 31744  }
 0x6ce   : > { %v2034_v57 = vpop.permute.xlu1 %2033  ;;  %4670 = vmatprep.subr.bf16.mxu1 %v6286_v22  ;;  %v2103_v0 = vpack.c.bf16 %v2066_v60, %v2057_v61  ;;  %v2044_v6 = vpop.permute.xlu0 %2043  ;;  %vm7281_vm9 = vmneg %vm2448_vm6 }
 0x6cf   : > { %v2037_v63 = vsel %vm2036_vm3, 0.0, %v2034_v57 }
 0x6d0   : > { %v2042_v1 = vmul.f32 %v7112_v62, %v2037_v63 }
 0x6d1   : > { %4671 = vmatpush3.bf16.msra.mxu1 %v2104_v59 }
 0x6d2   : > { %4672 = vmatprep.subr.bf16.mxu1 %v6286_v22  ;;  %v4440_v7 = vpack.c.bf16 %v2044_v6, %v2042_v1 }
 0x6d5   : > { %4673 = vmatpush3.bf16.msra.mxu1 %v2103_v0 }
 0x6d6   : > { %4674 = vmatprep.subr.bf16.mxu1 %v6286_v22 }
 0x6d9   : > { %4675 = vmatpush3.bf16.msk.msra.mxu1 %vm4439_vm12, %v4440_v7  ;;  %vm2524_vm12 = vcmask 89088  }
 0x6da   : > { %2278 = vmatprep.subr.bf16.mxu1 %v6282_v3 }
 0x6db   : > { %v2110_v14 = vpop.permute.xlu1 %2109  ;;  %v2115_v16 = vpop.permute.xlu0 %2114 }
 0x6dc   : > { %4677 = vmatmul.mubr.msk.bf16.vlgmr.msra.gmra.mxu1 %vm1657_vm13, %v5302_v13  ;;  %vm4450_vm13 = vmpackc.low %vm7117_vm11, %vm7117_vm11 }
 0x6dd   : > { %4453 = vmatprep.mubr.msk.bf16.mxu1 %vm1533_vm10, %v5303_v23  ;;  %v5306_v23 = vld [vmem:[#allocation19 + $0x18] sm:$0xff]   ;;  %vm4467_vm11 = vmpackc.low %vm7281_vm9, %vm7281_vm9 }
 0x6de   : > { %4681 = vmatpush3.bf16.msra.mxu0 %v5306_v23 }
 0x6df   : > { %4682 = vmatprep.subr.bf16.mxu0 %v6286_v22 }
 0x79c   : > { %v2162_v17 = vpop.f32.mrf.mxu1 }
 0x79d   : > { %v7127_v8 = vadd.f32 %v2162_v17, %v2110_v14 }
 0x79e   : > { %v4678_v15 = vpop.f32.mrf.mxu1 }
 0x79f   : > { %2219 = vrot.lane.b32.xlu0 %v7127_v8, %s6287_s26 }
 0x7a0   : > { %v2165_v19 = vpop.f32.mrf.mxu1 }
 0x7a1   : > { %v2166_v20 = vadd.f32 %v2165_v19, %v2115_v16 }
 0x7a2   : > { %v4679_v18 = vpop.f32.mrf.mxu1 }
 0x7a3   : > { %2209 = vrot.lane.b32.xlu0 %v7127_v8, %s6278_s7  ;;  %v5206_v21 = vpack.i.bf16 %v2166_v20, %v7127_v8  ;;  %v2251_v10 = vpack.c.bf16 %v2166_v20, %v7127_v8 }
 0x7a5   : > { %5207 = vrot.lane.b32.xlu1 %v5206_v21, %s6289_s21 }
 0x7a7   : > { %2199 = vrot.lane.b32.xlu0 %v7127_v8, %s6281_s4 }
 0x7a9   : > { %2221 = vrot.lane.b32.xlu1 %v2166_v20, %s6287_s26  ;;  %s1458_s26 = sand.u32 1, %s6195_s0  }
 0x7ab   : > { %2189 = vrot.lane.b32.xlu0 %v7127_v8, %s6290_s3 }
 0x7ad   : > { %2211 = vrot.lane.b32.xlu1 %v2166_v20, %s6278_s7 }
 0x7af   : > { %5212 = vrot.lane.b32.xlu0 %v5206_v21, %s6292_s22  ;;  %v5305_v21 = vld [vmem:[#allocation14] ss:$8 sps:$4 sm:$0xff]  }
 0x7b1   : > { %2201 = vrot.lane.b32.xlu1 %v2166_v20, %s6281_s4 }
 0x7b3   : > { %2173 = vrot.lane.b32.xlu0 %v2166_v20, %s6293_s23 }
 0x7b5   : > { %2191 = vrot.lane.b32.xlu1 %v2166_v20, %s6290_s3 }
 0x7b7   : > { %2239 = vrot.lane.b32.xlu0 %v2166_v20, %s6288_s5 }
 0x7b9   : > { %2171 = vrot.lane.b32.xlu1 %v7127_v8, %s6293_s23  ;;  %s3964_s23 = scalar_lea.sflag [#allocation4], %s1458_s26 }
 0x7bb   : > { %2263 = vperm.xlu0 %5184, %v2021_v38  }
 0x7bd   : > { %2237 = vrot.lane.b32.xlu1 %v7127_v8, %s6288_s5  ;;  %s4559_s5 = sshll.u32 %s6509_s28, 4  ;;  %s6302_s28 = smov [#allocation46]  }
 0x7be   : > { %s7622_s22 = scalar_lea.hbm %s6486_s17, %s4559_s5 }
 0x7c1   : > { %2258 = vperm.xlu1 %5205, %v2020_v11  }
 0x811   : > { %v2220_v24 = vpop.permute.xlu0 %2219 }
 0x812   : > { %v2225_v29 = vsel %vm2080_vm0, %v2220_v24, 0.0 }
 0x813   : > { %v2227_v52 = vmul.f32 %v2225_v29, %v7084_v33  ;;  %v5308_v29 = vld [vmem:[#allocation19 + $0x8] sm:$0xff]  }
 0x815   : > { %v2210_v37 = vpop.permute.xlu0 %2209 }
 0x816   : > { %v2215_v34 = vsel %vm2070_vm1, %v2210_v37, 0.0 }
 0x817   : > { %v5208_v26 = vpop.permute.xlu1 %5207  ;;  %v2217_v40 = vmul.f32 %v2215_v34, %v7091_v2 }
 0x818   : > { %v5210_v27 = vunpack.i.h.bf16 %v5208_v26  ;;  %v5209_v28 = vunpack.i.l.bf16 %v5208_v26 }
 0x819   : > { %v2200_v30 = vpop.permute.xlu0 %2199 }
 0x81a   : > { %v4446_v31 = vpack.c.bf16 %v5210_v27, %v5209_v28  ;;  %v2205_v44 = vsel %vm1561_vm7, 0.0, %v2200_v30  ;;  %v5307_v27 = vld [vmem:[#allocation19 + $0x10] sm:$0xff]  }
 0x81b   : > { %v2222_v56 = vpop.permute.xlu1 %2221  ;;  %4683 = vmatpush3.bf16.msra.mxu0 %v5307_v27 }
 0x81c   : > { %v2226_v54 = vsel %vm2080_vm0, %v2222_v56, 0.0  ;;  %4447 = vmatpush1.bf16.msk.msra.mxu1 %vm4445_vm5, %v4446_v31  ;;  %4684 = vmatprep.subr.bf16.mxu0 %v6286_v22  ;;  %v5309_v31 = vld [vmem:[#allocation19] sm:$0xff]   ;;  %vm2515_vm0 = vcmask 97280  }
 0x81d   : > { %v2228_v55 = vmul.f32 %v2226_v54, %v7084_v33  ;;  %2280 = vmatprep.subr.bf16.mxu1 %v6282_v3  ;;  %v2190_v41 = vpop.permute.xlu0 %2189 }
 0x81e   : > { %v2195_v53 = vsel %vm2051_vm4, 0.0, %v2190_v41 }
 0x81f   : > { %v2253_v35 = vpack.c.bf16 %v2228_v55, %v2227_v52  ;;  %v2212_v36 = vpop.permute.xlu1 %2211  ;;  %v2197_v61 = vmul.f32 %v2195_v53, %v7103_v50  ;;  %4685 = vmatpush3.bf16.msra.mxu0 %v5308_v29 }
 0x820   : > { %v2216_v39 = vsel %vm2070_vm1, %v2212_v36, 0.0  ;;  %4686 = vmatprep.subr.bf16.mxu0 %v6286_v22 }
 0x821   : > { %v2218_v42 = vmul.f32 %v2216_v39, %v7091_v2  ;;  %2281 = vmatpush1.bf16.msra.mxu1 %v2253_v35  ;;  %v5213_v46 = vpop.permute.xlu0 %5212  ;;  %v2207_v2 = vmul.f32 %v2205_v44, %v7100_v49 }
 0x822   : > { %2282 = vmatprep.subr.bf16.mxu1 %v6282_v3  ;;  %v5215_v0 = vunpack.i.h.bf16 %v5213_v46  ;;  %v5214_v1 = vunpack.i.l.bf16 %v5213_v46 }
 0x823   : > { %v2252_v43 = vpack.c.bf16 %v2218_v42, %v2217_v40  ;;  %v2202_v5 = vpop.permute.xlu1 %2201  ;;  %4687 = vmatpush3.bf16.msra.mxu0 %v5309_v31 }
 0x824   : > { %v2206_v33 = vsel %vm1561_vm7, 0.0, %v2202_v5  ;;  %2564 = vmatprep.subr.bf16.mxu0 %v6282_v3 }
 0x825   : > { %2283 = vmatpush1.bf16.msra.mxu1 %v2252_v43  ;;  %v2208_v47 = vmul.f32 %v2206_v33, %v7100_v49  ;;  %v2174_v63 = vpop.permute.xlu0 %2173 }
 0x826   : > { %2284 = vmatprep.subr.bf16.mxu1 %v6282_v3  ;;  %v2178_v13 = vsel %vm2036_vm3, 0.0, %v2174_v63 }
 0x827   : > { %v2192_v25 = vpop.permute.xlu1 %2191  ;;  %v2250_v57 = vpack.c.bf16 %v2208_v47, %v2207_v2  ;;  %v2180_v15 = vmul.f32 %v2178_v13, %v7112_v62 }
 0x828   : > { %v2196_v51 = vsel %vm2051_vm4, 0.0, %v2192_v25  ;;  %vm2457_vm4 = vcmask 23552  }
 0x829   : > { %2285 = vmatpush1.bf16.msra.mxu1 %v2251_v10  ;;  %v2198_v59 = vmul.f32 %v2196_v51, %v7103_v50  ;;  %v4451_v50 = vpack.c.bf16 %v5215_v0, %v5214_v1  ;;  %v2240_v14 = vpop.permute.xlu0 %2239  ;;  %v2421_v0 = vld [vmem:[#allocation26] sm:$0xff] }
 0x82a   : > { %2286 = vmatprep.subr.bf16.mxu1 %v6282_v3  ;;  %v2244_v16 = vsel %vm2095_vm15, %v2240_v14, 0.0 }
 0x82b   : > { %v2172_v60 = vpop.permute.xlu1 %2171  ;;  %v2249_v6 = vpack.c.bf16 %v2198_v59, %v2197_v61  ;;  %v2246_v4 = vmul.f32 %v7081_v32, %v2244_v16  ;;  %v5310_v59 = vld [vmem:[#allocation20 + $0x4] ss:$8 sps:$4 sm:$0xff]  }
 0x82c   : > { %v2177_v49 = vsel %vm2036_vm3, 0.0, %v2172_v60  ;;  %v2415_v60 = vld [vmem:[#allocation22] sm:$0xff]  ;;  %vm2433_vm3 = vcmask 39936  }
 0x82d   : > { %2287 = vmatpush1.bf16.msra.mxu1 %v2250_v57  ;;  %v2179_v17 = vmul.f32 %v2177_v49, %v7112_v62  ;;  %v2416_v57 = vld [vmem:[#allocation22 + $0x8] sm:$0xff] }
 0x82e   : > { %2288 = vmatprep.subr.bf16.mxu1 %v6282_v3 }
 0x82f   : > { %v2238_v7 = vpop.permute.xlu1 %2237  ;;  %v2247_v19 = vpack.c.bf16 %v2180_v15, %v2179_v17 }
 0x830   : > { %v2243_v8 = vsel %vm2095_vm15, %v2238_v7, 0.0  ;;  %vm2368_vm15 = vcmask 523264   ;;  %v7237_v7 = vrot.slane %v2421_v0, %v6869_v9 }
 0x831   : > { %2289 = vmatpush1.bf16.msra.mxu1 %v2249_v6  ;;  %v2245_v20 = vmul.f32 %v7081_v32, %v2243_v8 }
 0x832   : > { %2290 = vmatprep.subr.bf16.mxu1 %v6282_v3 }
 0x833   : > { %v2255_v18 = vpack.c.bf16 %v2246_v4, %v2245_v20 }
 0x835   : > { %4452 = vmatpush1.bf16.msk.msra.mxu1 %vm4450_vm13, %v4451_v50 }
 0x836   : > { %2292 = vmatprep.subr.bf16.mxu1 %v6282_v3  ;;  %v2264_v38 = vpop.permute.xlu0 %2263 }
 0x839   : > { %2293 = vmatpush1.bf16.msra.mxu1 %v2247_v19  ;;  %v7251_v19 = vrot.slane %v2421_v0, %v6876_v12 }
 0x83a   : > { %2308 = vmatprep.subr.bf16.mxu1 %v6282_v3 }
 0x83c   : > { %v2259_v11 = vpop.permute.xlu1 %2258 }
 0x83d   : > { %2309 = vmatpush2.bf16.msra.mxu1 %v2255_v18 }
 0x83e   : > { %2714 = vmatprep.subr.bf16.mxu1 %v6282_v3 }
 0x840   : > { %2311 = vmatmul.mubr.bf16.vlgmr.msra.gmra.mxu1 %v5305_v21 }
 0x900   : > { %v2312_v62 = vpop.f32.mrf.mxu1 }
 0x901   : > { %v2313_v37 = vadd.f32 %v2312_v62, %v2259_v11 }
 0x902   : > { %v2314_v10 = vpop.f32.mrf.mxu1 }
 0x904   : > { %v2315_v24 = vpop.f32.mrf.mxu1 }
 0x905   : > { %v2316_v26 = vadd.f32 %v2315_v24, %v2264_v38 }
 0x906   : > { %v2317_v32 = vpop.f32.mrf.mxu1 }
 0x907   : > { %v5216_v28 = vpack.i.bf16 %v2316_v26, %v2313_v37 }
 0x909   : > { %5217 = vrot.lane.b32.xlu1 %v5216_v28, %s6278_s7 }
 0x97b   : > { %v5218_v30 = vpop.permute.xlu1 %5217 }
 0x97c   : > { %v5220_v56 = vunpack.i.h.bf16 %v5218_v30  ;;  %v5219_v54 = vunpack.i.l.bf16 %v5218_v30 }
 0x97e   : > { %v2328_v52 = vsel %vm2070_vm1, %v5220_v56, 0.0  ;;  %v2327_v55 = vsel %vm2070_vm1, %v5219_v54, 0.0  ;;  %vm2500_vm1 = vcmask 105472   ;;  %v7270_v56 = vrot.slane %v2421_v0, %v6926_v48 }
 0x97f   : > { %v2330_v34 = vmax.f32 %v2316_v26, %v2328_v52  ;;  %v2329_v35 = vmax.f32 %v2313_v37, %v2327_v55  ;;  %v7262_v26 = vrot.slane %v2421_v0, %v6921_v45 }
 0x981   : > { %v5221_v36 = vpack.i.bf16 %v2330_v34, %v2329_v35 }
 0x983   : > { %5222 = vrot.lane.b32.xlu0 %v5221_v36, %s6289_s21  ;;  %s1459_s21 = scalar_lea.vmem [#allocation46], %s1458_s26 }
 0x984   : > { %s3976_s3 = sshll.u32 %s1459_s21, 4  ;;  %s7624_s3 = int_to_ptr.vmem [resolvable:$true] %s3976_s3 }
 0x9f5   : > { %v5223_v39 = vpop.permute.xlu0 %5222 }
 0x9f6   : > { %v5225_v40 = vunpack.i.h.bf16 %v5223_v39  ;;  %v5224_v41 = vunpack.i.l.bf16 %v5223_v39 }
 0x9f8   : > { %v2340_v42 = vsel %vm2090_vm2, %v5225_v40, 0.0  ;;  %v2339_v43 = vsel %vm2090_vm2, %v5224_v41, 0.0  ;;  %vm7241_vm2 = vmpackc.low %vm2515_vm0, %vm2515_vm0 }
 0x9f9   : > { %v2342_v5 = vmax.f32 %v2330_v34, %v2340_v42  ;;  %v2341_v33 = vmax.f32 %v2329_v35, %v2339_v43 }
 0x9fb   : > { %v2343_v44 = vpack.c.bf16 %v2342_v5, %v2341_v33  ;;  %v7287_v5 = vrot.slane %v2421_v0, %v6948_v58  ;;  %v5312_v0 = vld [vmem:[#allocation20] ss:$8 sps:$4 sm:$0xff]  }
 0x9fd   : > { %4689 = vmatmul.mubr.msk.bf16.vlgmr.msra.gmra.mxu0 %vm2368_vm15, %v2343_v44 }
 0x9fe   : > { %4470 = vmatprep.mubr.msk.bf16.mxu0 %vm1533_vm10, %v5310_v59 }
 0xabd   : > { %v7201_v46 = vpop.f32.mrf.mxu0 }
 0xabe   : > { %2494 = vrot.lane.b32.xlu0 %v7201_v46, %s6294_s18 }
 0xabf   : > { %v4690_v47 = vpop.f32.mrf.mxu0 }
 0xac1   : > { %v7205_v25 = vpop.f32.mrf.mxu0 }
 0xac2   : > { %2480 = vrot.lane.b32.xlu0 %v7201_v46, %s6278_s7  ;;  %v5226_v51 = vpack.i.bf16 %v7205_v25, %v7201_v46  ;;  %v2537_v2 = vpack.c.bf16 %v7205_v25, %v7201_v46 }
 0xac3   : > { %v4691_v53 = vpop.f32.mrf.mxu0 }
 0xac4   : > { %5227 = vrot.lane.b32.xlu1 %v5226_v51, %s6295_s13  ;;  %v7302_v53 = vld [vmem:[#allocation26 + $0x8] ss:$0 sm:$0xff] }
 0xac6   : > { %2466 = vrot.lane.b32.xlu0 %v7201_v46, %s6281_s4 }
 0xac8   : > { %2496 = vrot.lane.b32.xlu1 %v7205_v25, %s6294_s18 }
 0xaca   : > { %2451 = vrot.lane.b32.xlu0 %v7201_v46, %s6296_s10 }
 0xacc   : > { %2482 = vrot.lane.b32.xlu1 %v7205_v25, %s6278_s7 }
 0xace   : > { %5232 = vrot.lane.b32.xlu0 %v5226_v51, %s6297_s16 }
 0xad0   : > { %2468 = vrot.lane.b32.xlu1 %v7205_v25, %s6281_s4 }
 0xad2   : > { %2429 = vrot.lane.b32.xlu0 %v7205_v25, %s6298_s8 }
 0xad4   : > { %2453 = vrot.lane.b32.xlu1 %v7205_v25, %s6296_s10 }
 0xad6   : > { %2520 = vrot.lane.b32.xlu0 %v7205_v25, %s6299_s6 }
 0xad8   : > { %2427 = vrot.lane.b32.xlu1 %v7201_v46, %s6298_s8 }
 0xada   : > { %2549 = vperm.xlu0 %5184, %v2416_v57  }
 0xadc   : > { %2518 = vrot.lane.b32.xlu1 %v7201_v46, %s6299_s6 }
 0xae0   : > { %2544 = vperm.xlu1 %5205, %v2415_v60  }
 0xb30   : > { %v2495_v61 = vpop.permute.xlu0 %2494 }
 0xb31   : > { %v2501_v50 = vsel %vm2500_vm1, %v2495_v61, 0.0 }
 0xb32   : > { %v2507_v16 = vmul.f32 %v7237_v7, %v2501_v50 }
 0xb34   : > { %v2481_v63 = vpop.permute.xlu0 %2480 }
 0xb35   : > { %v2486_v4 = vsel %vm1542_vm8, %v2481_v63, 0.0 }
 0xb36   : > { %v5228_v1 = vpop.permute.xlu1 %5227  ;;  %v2492_v10 = vmul.f32 %v7251_v19, %v2486_v4  ;;  %v2420_v4 = vld [vmem:[#allocation25 + $0x8] sm:$0xff] }
 0xb37   : > { %v5230_v6 = vunpack.i.h.bf16 %v5228_v1  ;;  %v5229_v49 = vunpack.i.l.bf16 %v5228_v1 }
 0xb38   : > { %v2467_v17 = vpop.permute.xlu0 %2466 }
 0xb39   : > { %v4463_v14 = vpack.c.bf16 %v5230_v6, %v5229_v49  ;;  %v2472_v27 = vsel %vm1561_vm7, 0.0, %v2467_v17 }
 0xb3a   : > { %v2497_v8 = vpop.permute.xlu1 %2496  ;;  %v2478_v30 = vmul.f32 %v7262_v26, %v2472_v27 }
 0xb3b   : > { %v2502_v15 = vsel %vm2500_vm1, %v2497_v8, 0.0  ;;  %4464 = vmatpush1.bf16.msk.msra.mxu0 %vm7241_vm2, %v4463_v14 }
 0xb3c   : > { %v2508_v20 = vmul.f32 %v7237_v7, %v2502_v15  ;;  %2566 = vmatprep.subr.bf16.mxu0 %v6282_v3  ;;  %v2452_v38 = vpop.permute.xlu0 %2451 }
 0xb3d   : > { %v2458_v54 = vsel %vm2457_vm4, 0.0, %v2452_v38 }
 0xb3e   : > { %v2539_v18 = vpack.c.bf16 %v2508_v20, %v2507_v16  ;;  %v2483_v21 = vpop.permute.xlu1 %2482  ;;  %v2464_v35 = vmul.f32 %v7270_v56, %v2458_v54 }
 0xb3f   : > { %v2487_v62 = vsel %vm1542_vm8, %v2483_v21, 0.0  ;;  %v2419_v21 = vld [vmem:[#allocation25] sm:$0xff] }
 0xb40   : > { %v2493_v23 = vmul.f32 %v7251_v19, %v2487_v62  ;;  %2567 = vmatpush1.bf16.msra.mxu0 %v2539_v18  ;;  %v5233_v32 = vpop.permute.xlu0 %5232  ;;  %v5313_v18 = vld [vmem:[#allocation23 + $0x4] ss:$8 sps:$4 sm:$0xff]  }
 0xb41   : > { %2568 = vmatprep.subr.bf16.mxu0 %v6282_v3  ;;  %v5235_v39 = vunpack.i.h.bf16 %v5233_v32  ;;  %v5234_v40 = vunpack.i.l.bf16 %v5233_v32  ;;  %4481 = vmatprep.mubr.msk.bf16.mxu1 %vm1533_vm10, %v5313_v18 }
 0xb42   : > { %v2538_v11 = vpack.c.bf16 %v2493_v23, %v2492_v10  ;;  %v2469_v24 = vpop.permute.xlu1 %2468 }
 0xb43   : > { %v2473_v37 = vsel %vm1561_vm7, 0.0, %v2469_v24  ;;  %v4468_v46 = vpack.c.bf16 %v5235_v39, %v5234_v40 }
 0xb44   : > { %2569 = vmatpush1.bf16.msra.mxu0 %v2538_v11  ;;  %v2479_v28 = vmul.f32 %v7262_v26, %v2473_v37  ;;  %v2430_v36 = vpop.permute.xlu0 %2429 }
 0xb45   : > { %2570 = vmatprep.subr.bf16.mxu0 %v6282_v3  ;;  %v2435_v44 = vsel %vm2433_vm3, 0.0, %v2430_v36 }
 0xb46   : > { %v2454_v29 = vpop.permute.xlu1 %2453  ;;  %v2536_v52 = vpack.c.bf16 %v2479_v28, %v2478_v30 }
 0xb47   : > { %v2459_v31 = vsel %vm2457_vm4, 0.0, %v2454_v29 }
 0xb48   : > { %2571 = vmatpush1.bf16.msra.mxu0 %v2537_v2  ;;  %v2465_v55 = vmul.f32 %v7270_v56, %v2459_v31  ;;  %v2521_v47 = vpop.permute.xlu0 %2520  ;;  %v2441_v2 = vmul.f32 %v7287_v5, %v2435_v44 }
 0xb49   : > { %2572 = vmatprep.subr.bf16.mxu0 %v6282_v3  ;;  %v2526_v57 = vsel %vm2524_vm12, %v2521_v47, 0.0 }
 0xb4a   : > { %v2428_v34 = vpop.permute.xlu1 %2427  ;;  %v2535_v41 = vpack.c.bf16 %v2465_v55, %v2464_v35  ;;  %v2532_v61 = vmul.f32 %v7302_v53, %v2526_v57 }
 0xb4b   : > { %v2434_v43 = vsel %vm2433_vm3, 0.0, %v2428_v34 }
 0xb4c   : > { %2573 = vmatpush1.bf16.msra.mxu0 %v2536_v52  ;;  %v2440_v25 = vmul.f32 %v7287_v5, %v2434_v43 }
 0xb4d   : > { %2574 = vmatprep.subr.bf16.mxu0 %v6282_v3 }
 0xb4e   : > { %v2519_v33 = vpop.permute.xlu1 %2518  ;;  %v2533_v59 = vpack.c.bf16 %v2441_v2, %v2440_v25 }
 0xb4f   : > { %v2525_v51 = vsel %vm2524_vm12, %v2519_v33, 0.0 }
 0xb50   : > { %2575 = vmatpush1.bf16.msra.mxu0 %v2535_v41  ;;  %v2531_v60 = vmul.f32 %v7302_v53, %v2525_v51 }
 0xb51   : > { %2576 = vmatprep.subr.bf16.mxu0 %v6282_v3 }
 0xb52   : > { %v2541_v63 = vpack.c.bf16 %v2532_v61, %v2531_v60 }
 0xb54   : > { %4469 = vmatpush1.bf16.msk.msra.mxu0 %vm4467_vm11, %v4468_v46 }
 0xb55   : > { %2578 = vmatprep.subr.bf16.mxu0 %v6282_v3  ;;  %v2550_v14 = vpop.permute.xlu0 %2549 }
 0xb58   : > { %2579 = vmatpush1.bf16.msra.mxu0 %v2533_v59 }
 0xb59   : > { %2594 = vmatprep.subr.bf16.mxu0 %v6282_v3 }
 0xb5b   : > { %v2545_v1 = vpop.permute.xlu1 %2544 }
 0xb5c   : > { %2595 = vmatpush2.bf16.msra.mxu0 %v2541_v63 }
 0xb5d   : > { %4692 = vmatprep.subr.bf16.mxu0 %v6286_v22 }
 0xb5f   : > { %2597 = vmatmul.mubr.bf16.vlgmr.msra.gmra.mxu0 %v5312_v0 }
 0xb60   : > { %4694 = vmatprep.mubr.msk.bf16.mxu0 %vm6291_vm14, %v6286_v22 }
 0xc1f   : > { %v2598_v6 = vpop.f32.mrf.mxu0 }
 0xc20   : > { %v2599_v49 = vadd.f32 %v2598_v6, %v2545_v1 }
 0xc21   : > { %v2600_v50 = vpop.f32.mrf.mxu0 }
 0xc22   : > { %2655 = vrot.lane.b32.xlu0 %v2599_v49, %s6294_s18 }
 0xc23   : > { %v2601_v17 = vpop.f32.mrf.mxu0 }
 0xc24   : > { %v2602_v8 = vadd.f32 %v2601_v17, %v2550_v14 }
 0xc25   : > { %v2603_v15 = vpop.f32.mrf.mxu0 }
 0xc26   : > { %2645 = vrot.lane.b32.xlu0 %v2599_v49, %s6278_s7  ;;  %v5236_v16 = vpack.i.bf16 %v2602_v8, %v2599_v49  ;;  %v2687_v20 = vpack.c.bf16 %v2602_v8, %v2599_v49 }
 0xc28   : > { %5237 = vrot.lane.b32.xlu1 %v5236_v16, %s6295_s13 }
 0xc2a   : > { %2635 = vrot.lane.b32.xlu0 %v2599_v49, %s6281_s4 }
 0xc2c   : > { %2657 = vrot.lane.b32.xlu1 %v2602_v8, %s6294_s18 }
 0xc2e   : > { %2625 = vrot.lane.b32.xlu0 %v2599_v49, %s6296_s10 }
 0xc30   : > { %2647 = vrot.lane.b32.xlu1 %v2602_v8, %s6278_s7 }
 0xc32   : > { %5242 = vrot.lane.b32.xlu0 %v5236_v16, %s6297_s16 }
 0xc34   : > { %2637 = vrot.lane.b32.xlu1 %v2602_v8, %s6281_s4 }
 0xc36   : > { %2609 = vrot.lane.b32.xlu0 %v2602_v8, %s6298_s8 }
 0xc38   : > { %2627 = vrot.lane.b32.xlu1 %v2602_v8, %s6296_s10 }
 0xc3a   : > { %2675 = vrot.lane.b32.xlu0 %v2602_v8, %s6299_s6 }
 0xc3c   : > { %2607 = vrot.lane.b32.xlu1 %v2599_v49, %s6298_s8 }
 0xc3e   : > { %2699 = vperm.xlu0 %5184, %v2420_v4  }
 0xc40   : > { %2673 = vrot.lane.b32.xlu1 %v2599_v49, %s6299_s6 }
 0xc44   : > { %2694 = vperm.xlu1 %5205, %v2419_v21  }
 0xc94   : > { %v2656_v62 = vpop.permute.xlu0 %2655 }
 0xc95   : > { %v2661_v24 = vsel %vm2500_vm1, %v2656_v62, 0.0 }
 0xc96   : > { %v2663_v29 = vmul.f32 %v2661_v24, %v7237_v7 }
 0xc98   : > { %v2646_v10 = vpop.permute.xlu0 %2645 }
 0xc99   : > { %v2651_v30 = vsel %vm1542_vm8, %v2646_v10, 0.0 }
 0xc9a   : > { %v5238_v38 = vpop.permute.xlu1 %5237  ;;  %v2653_v34 = vmul.f32 %v2651_v30, %v7251_v19 }
 0xc9b   : > { %v5240_v23 = vunpack.i.h.bf16 %v5238_v38  ;;  %v5239_v11 = vunpack.i.l.bf16 %v5238_v38 }
 0xc9c   : > { %v2636_v27 = vpop.permute.xlu0 %2635 }
 0xc9d   : > { %v4474_v37 = vpack.c.bf16 %v5240_v23, %v5239_v11  ;;  %v2641_v40 = vsel %vm1561_vm7, 0.0, %v2636_v27  ;;  %v5316_v11 = vld [vmem:[#allocation28] sm:$0xff]  }
 0xc9e   : > { %v2658_v32 = vpop.permute.xlu1 %2657  ;;  %4693 = vmatpush3.bf16.msra.mxu0 %v5316_v11 }
 0xc9f   : > { %v2662_v28 = vsel %vm2500_vm1, %v2658_v32, 0.0  ;;  %4475 = vmatpush1.bf16.msk.msra.mxu1 %vm7241_vm2, %v4474_v37  ;;  %2993 = vmatprep.subr.bf16.mxu0 %v6282_v3 }
 0xca0   : > { %v2664_v31 = vmul.f32 %v2662_v28, %v7237_v7  ;;  %2716 = vmatprep.subr.bf16.mxu1 %v6282_v3  ;;  %v2626_v35 = vpop.permute.xlu0 %2625 }
 0xca1   : > { %v2631_v46 = vsel %vm2457_vm4, 0.0, %v2626_v35 }
 0xca2   : > { %v2689_v54 = vpack.c.bf16 %v2664_v31, %v2663_v29  ;;  %v2648_v52 = vpop.permute.xlu1 %2647  ;;  %v2633_v2 = vmul.f32 %v2631_v46, %v7270_v56  ;;  %v2836_v46 = vld [vmem:[#allocation31 + $0x10] sm:$0xff] }
 0xca3   : > { %v2652_v55 = vsel %vm1542_vm8, %v2648_v52, 0.0 }
 0xca4   : > { %v2654_v36 = vmul.f32 %v2652_v55, %v7251_v19  ;;  %2717 = vmatpush1.bf16.msra.mxu1 %v2689_v54  ;;  %v5243_v41 = vpop.permute.xlu0 %5242  ;;  %v2643_v19 = vmul.f32 %v2641_v40, %v7262_v26 }
 0xca5   : > { %2718 = vmatprep.subr.bf16.mxu1 %v6282_v3  ;;  %v5245_v59 = vunpack.i.h.bf16 %v5243_v41  ;;  %v5244_v60 = vunpack.i.l.bf16 %v5243_v41 }
 0xca6   : > { %v2688_v13 = vpack.c.bf16 %v2654_v36, %v2653_v34  ;;  %v2638_v39 = vpop.permute.xlu1 %2637 }
 0xca7   : > { %v2642_v7 = vsel %vm1561_vm7, 0.0, %v2638_v39  ;;  %v4479_v1 = vpack.c.bf16 %v5245_v59, %v5244_v60 }
 0xca8   : > { %2719 = vmatpush1.bf16.msra.mxu1 %v2688_v13  ;;  %v2644_v43 = vmul.f32 %v2642_v7, %v7262_v26  ;;  %v2610_v57 = vpop.permute.xlu0 %2609 }
 0xca9   : > { %2720 = vmatprep.subr.bf16.mxu1 %v6282_v3  ;;  %v2614_v0 = vsel %vm2433_vm3, 0.0, %v2610_v57 }
 0xcaa   : > { %v2628_v33 = vpop.permute.xlu1 %2627  ;;  %v2686_v47 = vpack.c.bf16 %v2644_v43, %v2643_v19  ;;  %v2616_v50 = vmul.f32 %v2614_v0, %v7287_v5  ;;  %v2835_v19 = vld [vmem:[#allocation31 + $0x8] sm:$0xff] }
 0xcab   : > { %v2632_v44 = vsel %vm2457_vm4, 0.0, %v2628_v33 }
 0xcac   : > { %2721 = vmatpush1.bf16.msra.mxu1 %v2687_v20  ;;  %v2634_v25 = vmul.f32 %v2632_v44, %v7270_v56  ;;  %v2676_v6 = vpop.permute.xlu0 %2675  ;;  %v2837_v44 = vld [vmem:[#allocation31 + $0x18] sm:$0xff] }
 0xcad   : > { %2722 = vmatprep.subr.bf16.mxu1 %v6282_v3  ;;  %v2680_v14 = vsel %vm2524_vm12, %v2676_v6, 0.0 }
 0xcae   : > { %v2608_v51 = vpop.permute.xlu1 %2607  ;;  %v2685_v61 = vpack.c.bf16 %v2634_v25, %v2633_v2  ;;  %v2682_v15 = vmul.f32 %v7302_v53, %v2680_v14  ;;  %v5317_v25 = vld [vmem:[#allocation29 + $0x4] ss:$8 sps:$4 sm:$0xff]  }
 0xcaf   : > { %v2613_v26 = vsel %vm2433_vm3, 0.0, %v2608_v51  ;;  %v2850_v51 = vld [vmem:[#allocation35] sm:$0xff] }
 0xcb0   : > { %2723 = vmatpush1.bf16.msra.mxu1 %v2686_v47  ;;  %v2615_v49 = vmul.f32 %v2613_v26, %v7287_v5  ;;  %v5315_v5 = vld [vmem:[#allocation23] ss:$8 sps:$4 sm:$0xff]   ;;  %v2834_v47 = vld [vmem:[#allocation31] sm:$0xff] }
 0xcb1   : > { %2724 = vmatprep.subr.bf16.mxu1 %v6282_v3 }
 0xcb2   : > { %v2674_v63 = vpop.permute.xlu1 %2673  ;;  %v2683_v17 = vpack.c.bf16 %v2616_v50, %v2615_v49  ;;  %v7399_v49 = vrot.slane %v2850_v51, %v6876_v12 }
 0xcb3   : > { %v2679_v56 = vsel %vm2524_vm12, %v2674_v63, 0.0 }
 0xcb4   : > { %2725 = vmatpush1.bf16.msra.mxu1 %v2685_v61  ;;  %v2681_v8 = vmul.f32 %v7302_v53, %v2679_v56  ;;  %v7386_v61 = vrot.slane %v2850_v51, %v6869_v9 }
 0xcb5   : > { %2726 = vmatprep.subr.bf16.mxu1 %v6282_v3 }
 0xcb6   : > { %v2691_v16 = vpack.c.bf16 %v2682_v15, %v2681_v8 }
 0xcb8   : > { %4480 = vmatpush1.bf16.msk.msra.mxu1 %vm4467_vm11, %v4479_v1 }
 0xcb9   : > { %2728 = vmatprep.subr.bf16.mxu1 %v6282_v3  ;;  %v2700_v4 = vpop.permute.xlu0 %2699 }
 0xcbc   : > { %2729 = vmatpush1.bf16.msra.mxu1 %v2683_v17 }
 0xcbd   : > { %2744 = vmatprep.subr.bf16.mxu1 %v6282_v3 }
 0xcbf   : > { %v2695_v18 = vpop.permute.xlu1 %2694 }
 0xcc0   : > { %2745 = vmatpush2.bf16.msra.mxu1 %v2691_v16 }
 0xcc3   : > { %2747 = vmatmul.mubr.bf16.vlgmr.msra.gmra.mxu1 %v5315_v5  ;;  %v7409_v5 = vrot.slane %v2850_v51, %v6921_v45 }
 0xd83   : > { %v2748_v20 = vpop.f32.mrf.mxu1 }
 0xd84   : > { %v2749_v62 = vadd.f32 %v2748_v20, %v2695_v18  ;;  %v7415_v18 = vrot.slane %v2850_v51, %v6926_v48 }
 0xd85   : > { %v2750_v42 = vpop.f32.mrf.mxu1 }
 0xd87   : > { %v2751_v21 = vpop.f32.mrf.mxu1 }
 0xd88   : > { %v2752_v10 = vadd.f32 %v2751_v21, %v2700_v4 }
 0xd89   : > { %v2753_v38 = vpop.f32.mrf.mxu1 }
 0xd8a   : > { %v5246_v23 = vpack.i.bf16 %v2752_v10, %v2749_v62 }
 0xd8c   : > { %5247 = vrot.lane.b32.xlu1 %v5246_v23, %s6278_s7 }
 0xdfe   : > { %v5248_v53 = vpop.permute.xlu1 %5247 }
 0xdff   : > { %v5250_v24 = vunpack.i.h.bf16 %v5248_v53  ;;  %v5249_v37 = vunpack.i.l.bf16 %v5248_v53 }
 0xe01   : > { %v2764_v27 = vsel %vm1542_vm8, %v5250_v24, 0.0  ;;  %v2763_v32 = vsel %vm1542_vm8, %v5249_v37, 0.0  ;;  %vm2875_vm8 = vcmask 15360   ;;  %v7425_v37 = vrot.slane %v2850_v51, %v6948_v58  ;;  %v7438_v58 = vld [vmem:[#allocation35 + $0x8] ss:$0 sm:$0xff] }
 0xe02   : > { %v2766_v28 = vmax.f32 %v2752_v10, %v2764_v27  ;;  %v2765_v29 = vmax.f32 %v2749_v62, %v2763_v32  ;;  %vm7390_vm5 = vmpackc.low %vm2875_vm8, %vm2875_vm8 }
 0xe03   : > { %vm4492_vm13 = vmneg %vm2875_vm8 }
 0xe04   : > { %v5251_v31 = vpack.i.bf16 %v2766_v28, %v2765_v29 }
 0xe06   : > { %5252 = vrot.lane.b32.xlu0 %v5251_v31, %s6295_s13  ;;  %s6087_s13 = sshll.u32 %s6302_s28, 4  ;;  %s6088_s13 = int_to_ptr.vmem [resolvable:$false] %s6087_s13 }
 0xe07   : > { %p6090_p10 = scmp.lt.s32.totalorder %s7624_s3, %s6088_s13 }
 0xe78   : > { %v5253_v30 = vpop.permute.xlu0 %5252 }
 0xe79   : > { %v5255_v54 = vunpack.i.h.bf16 %v5253_v30  ;;  %v5254_v52 = vunpack.i.l.bf16 %v5253_v30 }
 0xe7b   : > { %v2776_v55 = vsel %vm2515_vm0, %v5255_v54, 0.0  ;;  %v2775_v34 = vsel %vm2515_vm0, %v5254_v52, 0.0  ;;  %vm7429_vm0 = vmpackc.low %vm4492_vm13, %vm4492_vm13 }
 0xe7c   : > { %v2778_v35 = vmax.f32 %v2766_v28, %v2776_v55  ;;  %v2777_v36 = vmax.f32 %v2765_v29, %v2775_v34 }
 0xe7e   : > { %v2779_v13 = vpack.c.bf16 %v2778_v35, %v2777_v36 }
 0xe80   : > { %4695 = vmatmul.mubr.msk.bf16.vlgmr.msra.gmra.mxu0 %vm1533_vm10, %v2779_v13 }
 0xe81   : > { %4497 = vmatprep.mubr.msk.bf16.mxu0 %vm1533_vm10, %v5317_v25 }
 0xf40   : > { %v2823_v39 = vpop.f32.mrf.mxu0 }
 0xf41   : > { %2898 = vrot.lane.b32.xlu0 %v2823_v39, %s6278_s7 }
 0xf42   : > { %v4696_v7 = vpop.f32.mrf.mxu0 }
 0xf43   : > { %v5320_v7 = vld [vmem:[#allocation29 + $0x14] ss:$8 sps:$4 sm:$0xff]  }
 0xf44   : > { %v2826_v40 = vpop.f32.mrf.mxu0 }
 0xf45   : > { %2878 = vrot.lane.b32.xlu0 %v2823_v39, %s6281_s4  ;;  %v5256_v41 = vpack.i.bf16 %v2826_v40, %v2823_v39  ;;  %v2944_v43 = vpack.c.bf16 %v2826_v40, %v2823_v39 }
 0xf46   : > { %v4697_v33 = vpop.f32.mrf.mxu0 }
 0xf47   : > { %5257 = vrot.lane.b32.xlu1 %v5256_v41, %s6300_s2 }
 0xf49   : > { %5262 = vrot.lane.b32.xlu0 %v5256_v41, %s6301_s1 }
 0xf4b   : > { %2900 = vrot.lane.b32.xlu1 %v2826_v40, %s6278_s7 }
 0xf4d   : > { %2857 = vrot.lane.b32.xlu0 %v2826_v40, %s6296_s10 }
 0xf4f   : > { %2880 = vrot.lane.b32.xlu1 %v2826_v40, %s6281_s4 }
 0xf51   : > { %2928 = vrot.lane.b32.xlu0 %v2826_v40, %s6294_s18  ;;  %v5322_v40 = vld [vmem:[#allocation29 + $0x10] ss:$8 sps:$4 sm:$0xff]  }
 0xf53   : > { %2855 = vrot.lane.b32.xlu1 %v2823_v39, %s6296_s10 }
 0xf55   : > { %2966 = vperm.xlu0 %5184, %v2837_v44  }
 0xf57   : > { %2926 = vrot.lane.b32.xlu1 %v2823_v39, %s6294_s18  ;;  %v5319_v39 = vld [vmem:[#allocation29] ss:$8 sps:$4 sm:$0xff]  }
 0xf59   : > { %2956 = vperm.xlu0 %5184, %v2835_v19  }
 0xf5b   : > { %2961 = vperm.xlu1 %5205, %v2836_v46  }
 0xf5f   : > { %2951 = vperm.xlu1 %5205, %v2834_v47  }
 0xfb3   : > { %v2899_v2 = vpop.permute.xlu0 %2898 }
 0xfb4   : > { %v2904_v63 = vsel %vm2457_vm4, %v2899_v2, 0.0 }
 0xfb5   : > { %v2916_v9 = vmul.f32 %v7386_v61, %v2904_v63  ;;  %v2910_v17 = vmul.f32 %v7399_v49, %v2904_v63 }
 0xfb7   : > { %v2879_v8 = vpop.permute.xlu0 %2878 }
 0xfb8   : > { %v2884_v20 = vsel %vm1561_vm7, 0.0, %v2879_v8  ;;  %v2846_v8 = vld [vmem:[#allocation34] sm:$0xff] }
 0xfb9   : > { %v5258_v57 = vpop.permute.xlu1 %5257  ;;  %v2896_v21 = vmul.f32 %v7409_v5, %v2884_v20  ;;  %v2890_v38 = vmul.f32 %v7415_v18, %v2884_v20 }
 0xfba   : > { %v5260_v59 = vunpack.i.h.bf16 %v5258_v57  ;;  %v5259_v60 = vunpack.i.l.bf16 %v5258_v57 }
 0xfbb   : > { %v5263_v42 = vpop.permute.xlu0 %5262 }
 0xfbc   : > { %v4490_v0 = vpack.c.bf16 %v5260_v59, %v5259_v60  ;;  %v5265_v11 = vunpack.i.h.bf16 %v5263_v42  ;;  %v5264_v53 = vunpack.i.l.bf16 %v5263_v42 }
 0xfbd   : > { %v2901_v1 = vpop.permute.xlu1 %2900 }
 0xfbe   : > { %v2905_v6 = vsel %vm2457_vm4, %v2901_v1, 0.0  ;;  %4491 = vmatpush1.bf16.msk.msra.mxu0 %vm7390_vm5, %v4490_v0  ;;  %v4495_v29 = vpack.c.bf16 %v5265_v11, %v5264_v53 }
 0xfbf   : > { %v2917_v56 = vmul.f32 %v7386_v61, %v2905_v6  ;;  %2995 = vmatprep.subr.bf16.mxu0 %v6282_v3  ;;  %v2911_v50 = vmul.f32 %v7399_v49, %v2905_v6  ;;  %v2858_v23 = vpop.permute.xlu0 %2857 }
 0xfc0   : > { %v2862_v32 = vsel %vm2457_vm4, 0.0, %v2858_v23 }
 0xfc1   : > { %v2946_v14 = vpack.c.bf16 %v2917_v56, %v2916_v9  ;;  %v2881_v15 = vpop.permute.xlu1 %2880  ;;  %v2945_v16 = vpack.c.bf16 %v2911_v50, %v2910_v17  ;;  %v2868_v52 = vmul.f32 %v7425_v37, %v2862_v32  ;;  %v5325_v50 = vld [vmem:[#allocation32 + $0x4] ss:$12 sps:$4 sm:$0xff]   ;;  %v2847_v17 = vld [vmem:[#allocation34 + $0x8] sm:$0xff] }
 0xfc2   : > { %v2885_v12 = vsel %vm1561_vm7, 0.0, %v2881_v15  ;;  %3273 = vmatprep.mubr.bf16.mxu1 %v5325_v50  ;;  %v2849_v15 = vld [vmem:[#allocation34 + $0x18] sm:$0xff] }
 0xfc3   : > { %2996 = vmatpush1.bf16.msra.mxu0 %v2946_v14  ;;  %v2897_v4 = vmul.f32 %v7409_v5, %v2885_v12  ;;  %v2891_v62 = vmul.f32 %v7415_v18, %v2885_v12  ;;  %v2929_v31 = vpop.permute.xlu0 %2928  ;;  %v5326_v14 = vld [vmem:[#allocation32 + $0x8] ss:$12 sps:$4 sm:$0xff]  }
 0xfc4   : > { %2997 = vmatprep.subr.bf16.mxu0 %v6282_v3  ;;  %v2933_v55 = vsel %vm1561_vm7, %v2929_v31, 0.0 }
 0xfc5   : > { %v2943_v45 = vpack.c.bf16 %v2897_v4, %v2896_v21  ;;  %v2856_v10 = vpop.permute.xlu1 %2855  ;;  %v2942_v24 = vpack.c.bf16 %v2891_v62, %v2890_v38  ;;  %v2939_v36 = vmul.f32 %v7438_v58, %v2933_v55 }
 0xfc6   : > { %v2861_v48 = vsel %vm2457_vm4, 0.0, %v2856_v10 }
 0xfc7   : > { %2998 = vmatpush1.bf16.msra.mxu0 %v2945_v16  ;;  %v2867_v30 = vmul.f32 %v7425_v37, %v2861_v48  ;;  %v2848_v16 = vld [vmem:[#allocation34 + $0x10] sm:$0xff] }
 0xfc8   : > { %2999 = vmatprep.subr.bf16.mxu0 %v6282_v3 }
 0xfc9   : > { %v2927_v27 = vpop.permute.xlu1 %2926  ;;  %v2940_v34 = vpack.c.bf16 %v2868_v52, %v2867_v30 }
 0xfca   : > { %v2932_v54 = vsel %vm1561_vm7, %v2927_v27, 0.0 }
 0xfcb   : > { %3000 = vmatpush1.bf16.msra.mxu0 %v2944_v43  ;;  %v2938_v35 = vmul.f32 %v7438_v58, %v2932_v54 }
 0xfcc   : > { %3001 = vmatprep.subr.bf16.mxu0 %v6282_v3 }
 0xfcd   : > { %v2948_v13 = vpack.c.bf16 %v2939_v36, %v2938_v35 }
 0xfcf   : > { %3002 = vmatpush1.bf16.msra.mxu0 %v2943_v45 }
 0xfd0   : > { %3003 = vmatprep.subr.bf16.mxu0 %v6282_v3  ;;  %v2967_v43 = vpop.permute.xlu0 %2966 }
 0xfd3   : > { %3004 = vmatpush1.bf16.msra.mxu0 %v2942_v24 }
 0xfd4   : > { %3005 = vmatprep.subr.bf16.mxu0 %v6282_v3 }
 0xfd6   : > { %v2962_v41 = vpop.permute.xlu1 %2961 }
 0xfd7   : > { %4496 = vmatpush1.bf16.msk.msra.mxu0 %vm7429_vm0, %v4495_v29 }
 0xfd8   : > { %3007 = vmatprep.subr.bf16.mxu0 %v6282_v3 }
 0xfda   : > { %v2952_v33 = vpop.permute.xlu1 %2951 }
 0xfdb   : > { %3008 = vmatpush1.bf16.msra.mxu0 %v2940_v34 }
 0xfdc   : > { %3023 = vmatprep.subr.bf16.mxu0 %v6282_v3  ;;  %v2957_v3 = vpop.permute.xlu0 %2956 }
 0xfdf   : > { %3024 = vmatpush2.bf16.msra.mxu0 %v2948_v13 }
 0xfe2   : > { %3026 = vmatmul.mubr.bf16.vlgmr.msra.gmra.mxu0 %v5319_v39 }
 0xfe3   : > { %4498 = vmatprep.mubr.msk.bf16.mxu0 %vm1533_vm10, %v5320_v7  ;;  %vm3234_vm10 = vcmask 261120  }
 0xfea   : > { %3034 = vmatmul.mubr.bf16.gmra.mxu0 %v5322_v40 }
 0xfeb   : > { %4702 = vmatprep.mubr.msk.bf16.mxu0 %vm3234_vm10, %v5326_v14 }
0x10a2   : > { %v3027_v44 = vpop.f32.mrf.mxu0 }
0x10a3   : > { %v7446_v19 = vadd.f32 %v3027_v44, %v2952_v33 }
0x10a4   : > { %v3029_v46 = vpop.f32.mrf.mxu0 }
0x10a5   : > { %3082 = vrot.lane.b32.xlu0 %v7446_v19, %s6281_s4 }
0x10a6   : > { %v3030_v47 = vpop.f32.mrf.mxu0 }
0x10a7   : > { %v7450_v25 = vadd.f32 %v3030_v47, %v2957_v3 }
0x10a8   : > { %v3032_v51 = vpop.f32.mrf.mxu0 }
0x10a9   : > { %v3174_v2 = vpack.c.bf16 %v7450_v25, %v7446_v19  ;;  %v5271_v56 = vpack.i.bf16 %v7450_v25, %v7446_v19 }
0x10aa   : > { %v3035_v57 = vpop.f32.mrf.mxu0 }
0x10ab   : > { %v7454_v59 = vadd.f32 %v3035_v57, %v2962_v41 }
0x10ac   : > { %v3037_v60 = vpop.f32.mrf.mxu0 }
0x10ad   : > { %3086 = vrot.lane.b32.xlu1 %v7454_v59, %s6281_s4 }
0x10ae   : > { %v3038_v63 = vpop.f32.mrf.mxu0 }
0x10af   : > { %v7458_v0 = vadd.f32 %v3038_v63, %v2967_v43 }
0x10b0   : > { %v3040_v1 = vpop.f32.mrf.mxu0 }
0x10b1   : > { %3088 = vrot.lane.b32.xlu0 %v7458_v0, %s6281_s4  ;;  %v5266_v6 = vpack.i.bf16 %v7458_v0, %v7454_v59  ;;  %v3175_v9 = vpack.c.bf16 %v7458_v0, %v7454_v59 }
0x10b3   : > { %5267 = vrot.lane.b32.xlu1 %v5266_v6, %s6300_s2 }
0x10b5   : > { %5272 = vrot.lane.b32.xlu0 %v5271_v56, %s6300_s2 }
0x10b7   : > { %3084 = vrot.lane.b32.xlu1 %v7450_v25, %s6281_s4  ;;  %s7787_s4 = sld [smem:[#allocation86_spill]] }
0x10b9   : > { %3112 = vrot.lane.b32.xlu0 %v7458_v0, %s6278_s7 }
0x10bb   : > { %3110 = vrot.lane.b32.xlu1 %v7454_v59, %s6278_s7 }
0x10bd   : > { %3108 = vrot.lane.b32.xlu0 %v7450_v25, %s6278_s7 }
0x10bf   : > { %3106 = vrot.lane.b32.xlu1 %v7446_v19, %s6278_s7 }
0x10c1   : > { %5282 = vrot.lane.b32.xlu0 %v5271_v56, %s6301_s1 }
0x10c3   : > { %5277 = vrot.lane.b32.xlu1 %v5266_v6, %s6301_s1 }
0x10c5   : > { %3052 = vrot.lane.b32.xlu0 %v7458_v0, %s6296_s10 }
0x10c7   : > { %3050 = vrot.lane.b32.xlu1 %v7454_v59, %s6296_s10 }
0x10c9   : > { %3048 = vrot.lane.b32.xlu0 %v7450_v25, %s6296_s10 }
0x10cb   : > { %3046 = vrot.lane.b32.xlu1 %v7446_v19, %s6296_s10  ;;  %s6089_s10 = scalar_lea.vmem %s6088_s13, 32 }
0x10cd   : > { %3152 = vrot.lane.b32.xlu0 %v7458_v0, %s6294_s18 }
0x10cf   : > { %3150 = vrot.lane.b32.xlu1 %v7454_v59, %s6294_s18 }
0x10d1   : > { %3148 = vrot.lane.b32.xlu0 %v7450_v25, %s6294_s18 }
0x10d3   : > { %3146 = vrot.lane.b32.xlu1 %v7446_v19, %s6294_s18  ;;  %v5330_v19 = vld [vmem:[#allocation32 + $0x18] ss:$12 sps:$4 sm:$0xff]   ;;  %s6083_s18 = scalar_lea.vmem %s7624_s3, 16 }
0x10d4   : > { %p6084_p8 = scmp.ne.s32.totalorder %s7624_s3, %s6083_s18  ;;  %p6091_p11 = scmp.lt.s32.totalorder %s6089_s10, %s6083_s18 }
0x10d5   : > { %3191 = vperm.xlu0 %5184, %v2847_v17  }
0x10d6   : > { %p6085_p12 = pnand %p6084_p8, %p7788_p5  ;;  %p6092_p0 = por %p6091_p11, %p6090_p10 }
0x10d7   : > { %3186 = vperm.xlu1 %5205, %v2846_v8  }
0x10d8   : > { %p6086_p6 = pneg %p6085_p12 }
0x10d9   : > { %3201 = vperm.xlu0 %5184, %v2849_v15  }
0x10da   : > { %p6093_p1 = pnand %p6092_p0, %p6086_p6 }
0x10db   : > { %3196 = vperm.xlu1 %5205, %v2848_v16  }
0x1117   : > { %v3083_v12 = vpop.permute.xlu0 %3082 }
0x1118   : > { %v3094_v53 = vsel %vm1561_vm7, 0.0, %v3083_v12 }
0x1119   : > { %v3102_v54 = vmul.f32 %v3094_v53, %v7409_v5  ;;  %v3098_v63 = vmul.f32 %v3094_v53, %v7415_v18 }
0x111f   : > { %v3087_v20 = vpop.permute.xlu1 %3086 }
0x1120   : > { %v3096_v4 = vsel %vm1561_vm7, 0.0, %v3087_v20 }
0x1121   : > { %v3104_v23 = vmul.f32 %v3096_v4, %v7409_v5 }
0x1123   : > { %v3089_v42 = vpop.permute.xlu0 %3088 }
0x1124   : > { %v3097_v21 = vsel %vm1561_vm7, 0.0, %v3089_v42 }
0x1125   : > { %v3105_v62 = vmul.f32 %v3097_v21, %v7409_v5  ;;  %v5268_v45 = vpop.permute.xlu1 %5267  ;;  %v3101_v13 = vmul.f32 %v3097_v21, %v7415_v18 }
0x1126   : > { %v5270_v10 = vunpack.i.h.bf16 %v5268_v45  ;;  %v5269_v38 = vunpack.i.l.bf16 %v5268_v45 }
0x1127   : > { %v5273_v11 = vpop.permute.xlu0 %5272  ;;  %v3173_v32 = vpack.c.bf16 %v3105_v62, %v3104_v23 }
0x1128   : > { %v4516_v24 = vpack.c.bf16 %v5270_v10, %v5269_v38  ;;  %v5275_v48 = vunpack.i.h.bf16 %v5273_v11  ;;  %v5274_v27 = vunpack.i.l.bf16 %v5273_v11 }
0x1129   : > { %v3085_v29 = vpop.permute.xlu1 %3084 }
0x112a   : > { %v4519_v31 = vpack.c.bf16 %v5275_v48, %v5274_v27  ;;  %v3095_v30 = vsel %vm1561_vm7, 0.0, %v3085_v29  ;;  %4598 = vmatprep.subr.msk.bf16.mxu1 %vm7390_vm5, %v4516_v24 }
0x112b   : > { %v3103_v52 = vmul.f32 %v3095_v30, %v7409_v5  ;;  %4599 = vmatpush3.bf16.msra.mxu1 %v3173_v32  ;;  %v3113_v55 = vpop.permute.xlu0 %3112  ;;  %v3100_v5 = vmul.f32 %v3096_v4, %v7415_v18  ;;  %v3099_v46 = vmul.f32 %v3095_v30, %v7415_v18 }
0x112c   : > { %v3121_v34 = vsel %vm2457_vm4, %v3113_v55, 0.0  ;;  %4600 = vmatprep.subr.msk.bf16.mxu1 %vm7390_vm5, %v4519_v31 }
0x112d   : > { %v3172_v35 = vpack.c.bf16 %v3103_v52, %v3102_v54  ;;  %v3111_v36 = vpop.permute.xlu1 %3110  ;;  %v3129_v7 = vmul.f32 %v3121_v34, %v7386_v61  ;;  %v3171_v26 = vpack.c.bf16 %v3101_v13, %v3100_v5  ;;  %v3125_v1 = vmul.f32 %v3121_v34, %v7399_v49  ;;  %v5323_v13 = vld [vmem:[#allocation32] ss:$12 sps:$4 sm:$0xff]  }
0x112e   : > { %v3120_v39 = vsel %vm2457_vm4, %v3111_v36, 0.0  ;;  %v3170_v50 = vpack.c.bf16 %v3099_v46, %v3098_v63 }
0x112f   : > { %v3128_v40 = vmul.f32 %v3120_v39, %v7386_v61  ;;  %v3109_v41 = vpop.permute.xlu0 %3108  ;;  %4601 = vmatpush3.bf16.msra.mxu1 %v3172_v35  ;;  %v3124_v47 = vmul.f32 %v3120_v39, %v7399_v49 }
0x1130   : > { %v3119_v43 = vsel %vm2457_vm4, %v3109_v41, 0.0 }
0x1131   : > { %v3179_v33 = vpack.c.bf16 %v3129_v7, %v3128_v40  ;;  %v3107_v44 = vpop.permute.xlu1 %3106  ;;  %v3127_v51 = vmul.f32 %v3119_v43, %v7386_v61  ;;  %v3177_v8 = vpack.c.bf16 %v3125_v1, %v3124_v47  ;;  %v5327_v7 = vld [vmem:[#allocation32 + $0x20] ss:$12 sps:$4 sm:$0xff]  }
0x1132   : > { %v3118_v3 = vsel %vm2457_vm4, %v3107_v44, 0.0 }
0x1133   : > { %v3126_v57 = vmul.f32 %v3118_v3, %v7386_v61  ;;  %v5283_v60 = vpop.permute.xlu0 %5282  ;;  %4602 = vmatprep.subr.bf16.mxu1 %v3179_v33  ;;  %v3122_v15 = vmul.f32 %v3118_v3, %v7399_v49  ;;  %v3123_v61 = vmul.f32 %v3119_v43, %v7399_v49 }
0x1134   : > { %4603 = vmatpush3.bf16.msra.mxu1 %v3171_v26  ;;  %v5285_v20 = vunpack.i.h.bf16 %v5283_v60  ;;  %v5284_v18 = vunpack.i.l.bf16 %v5283_v60 }
0x1135   : > { %v3178_v6 = vpack.c.bf16 %v3127_v51, %v3126_v57  ;;  %v5278_v56 = vpop.permute.xlu1 %5277  ;;  %v3176_v4 = vpack.c.bf16 %v3123_v61, %v3122_v15 }
0x1136   : > { %v5280_v14 = vunpack.i.h.bf16 %v5278_v56  ;;  %v5279_v17 = vunpack.i.l.bf16 %v5278_v56  ;;  %v4513_v38 = vpack.c.bf16 %v5285_v20, %v5284_v18 }
0x1137   : > { %v3053_v16 = vpop.permute.xlu0 %3052  ;;  %4604 = vmatprep.subr.bf16.mxu1 %v3178_v6 }
0x1138   : > { %4605 = vmatpush3.bf16.msra.mxu1 %v3170_v50  ;;  %v4508_v42 = vpack.c.bf16 %v5280_v14, %v5279_v17  ;;  %v3061_v45 = vsel %vm2457_vm4, 0.0, %v3053_v16 }
0x1139   : > { %v3051_v12 = vpop.permute.xlu1 %3050  ;;  %4606 = vmatprep.subr.bf16.mxu1 %v3177_v8  ;;  %v3065_v53 = vmul.f32 %v3061_v45, %v7425_v37 }
0x113a   : > { %v3060_v21 = vsel %vm2457_vm4, 0.0, %v3051_v12 }
0x113b   : > { %v3049_v62 = vpop.permute.xlu0 %3048  ;;  %v3064_v23 = vmul.f32 %v3060_v21, %v7425_v37 }
0x113c   : > { %4607 = vmatpush3.bf16.msk.msra.mxu1 %vm7429_vm0, %v4508_v42  ;;  %v3059_v48 = vsel %vm2457_vm4, 0.0, %v3049_v62 }
0x113d   : > { %v3047_v10 = vpop.permute.xlu1 %3046  ;;  %4608 = vmatprep.subr.bf16.mxu1 %v3176_v4  ;;  %v3167_v32 = vpack.c.bf16 %v3065_v53, %v3064_v23  ;;  %v3063_v28 = vmul.f32 %v3059_v48, %v7425_v37  ;;  %v2852_v4 = vld [vmem:[#allocation37] sm:$0x3] }
0x113e   : > { %v3058_v49 = vsel %vm2457_vm4, 0.0, %v3047_v10 }
0x113f   : > { %v3153_v11 = vpop.permute.xlu0 %3152  ;;  %v3062_v29 = vmul.f32 %v3058_v49, %v7425_v37  ;;  %v5328_v37 = vld [vmem:[#allocation32 + $0x1c] ss:$12 sps:$4 sm:$0xff]  }
0x1140   : > { %v3161_v24 = vsel %vm1561_vm7, %v3153_v11, 0.0  ;;  %4609 = vmatpush3.bf16.msk.msra.mxu1 %vm7429_vm0, %v4513_v38 }
0x1141   : > { %v3151_v27 = vpop.permute.xlu1 %3150  ;;  %4610 = vmatprep.subr.bf16.mxu1 %v3175_v9  ;;  %v3165_v30 = vmul.f32 %v7438_v58, %v3161_v24  ;;  %v3166_v59 = vpack.c.bf16 %v3063_v28, %v3062_v29 }
0x1142   : > { %v3160_v31 = vsel %vm1561_vm7, %v3151_v27, 0.0 }
0x1143   : > { %v3164_v54 = vmul.f32 %v7438_v58, %v3160_v31  ;;  %v3149_v52 = vpop.permute.xlu0 %3148 }
0x1144   : > { %v3159_v55 = vsel %vm1561_vm7, %v3149_v52, 0.0  ;;  %4611 = vmatpush3.bf16.msra.mxu1 %v3167_v32 }
0x1145   : > { %v3183_v34 = vpack.c.bf16 %v3165_v30, %v3164_v54  ;;  %v3147_v35 = vpop.permute.xlu1 %3146  ;;  %4612 = vmatprep.subr.bf16.mxu1 %v3174_v2  ;;  %v3163_v9 = vmul.f32 %v7438_v58, %v3159_v55 }
0x1146   : > { %v3158_v0 = vsel %vm1561_vm7, %v3147_v35, 0.0  ;;  %vm3395_vm7 = vcmask 1041408  }
0x1147   : > { %v3162_v36 = vmul.f32 %v7438_v58, %v3158_v0  ;;  %4698 = vmatprep.subr.bf16.mxu0 %v3183_v34  ;;  %v3397_v62 = vsel %vm3395_vm7, %v2852_v4, 0 }
0x1148   : > { %4613 = vmatpush3.bf16.msra.mxu1 %v3166_v59  ;;  %4699 = vmatpush3.bf16.msra.mxu0 %v3183_v34 }
0x1149   : > { %v3182_v39 = vpack.c.bf16 %v3163_v9, %v3162_v36  ;;  %v5331_v9 = vld [vmem:[#allocation38] sm:$0xff]  }
0x114b   : > { %3274 = vmatmul.mubr.bf16.vlgmr.msra.gmra.mxu1 %v5323_v13  ;;  %4700 = vmatprep.subr.bf16.mxu0 %v3182_v39 }
0x114c   : > { %4701 = vmatpush3.bf16.msra.mxu0 %v3182_v39  ;;  %3281 = vmatprep.mubr.bf16.mxu1 %v5328_v37 }
0x114d   : > { %4784 = vmatprep.subr.msk.bf16.mxu0 %vm3395_vm7, %v2852_v4 }
0x114f   : > { %4703 = vmatmul.mubr.msk.bf16.vlgmr.msra.gmra.mxu0 %vm3234_vm10, %v5327_v7 }
0x1150   : > { %v3192_v26 = vpop.permute.xlu0 %3191  ;;  %4707 = vmatpush3.bf16.msra.mxu0 %v3397_v62  ;;  %v5337_v62 = vld [vmem:[#allocation41 + $0x10] sm:$0xff]  }
0x1152   : > { %v3187_v40 = vpop.permute.xlu1 %3186 }
0x1153   : > { %3282 = vmatmul.mubr.bf16.gmra.mxu1 %v5330_v19 }
0x1154   : > { %v3202_v16 = vpop.permute.xlu0 %3201  ;;  %4716 = vmatprep.mubr.msk.bf16.mxu1 %vm3234_vm10, %v5331_v9  ;;  %v3476_v9 = vld [vmem:[#allocation43 + $0x20] sm:$0xff] }
0x1156   : > { %v3197_v56 = vpop.permute.xlu1 %3196 }
0x120b   : > { %v4614_v25 = vpop.f32.mrf.mxu1 }
0x120d   : > { %v4615_v2 = vpop.f32.mrf.mxu1 }
0x120e   : > { %v4616_v41 = vadd.f32 %v4615_v2, %v4614_v25  ;;  %v5332_v25 = vld [vmem:[#allocation38 + $0x8] sm:$0xff]   ;;  %v5333_v2 = vld [vmem:[#allocation38 + $0x10] sm:$0xff]  }
0x120f   : > { %v4617_v58 = vpop.f32.mrf.mxu1  ;;  %v4704_v5 = vpop.f32.mrf.mxu0 }
0x1210   : > { %v3276_v43 = vadd.f32 %v4616_v41, %v3187_v40  ;;  %v5334_v40 = vld [vmem:[#allocation38 + $0x18] sm:$0xff]   ;;  %v5335_v41 = vld [vmem:[#allocation41] sm:$0xff]  }
0x1211   : > { %v4618_v33 = vpop.f32.mrf.mxu1  ;;  %v3324_v44 = vpop.f32.mrf.mxu0 }
0x1212   : > { %v4619_v46 = vadd.f32 %v4618_v33, %v4617_v58  ;;  %v3325_v3 = vadd.f32 %v3324_v44, %v3276_v43 }
0x1213   : > { %v4620_v47 = vpop.f32.mrf.mxu1  ;;  %v4705_v51 = vpop.f32.mrf.mxu0 }
0x1214   : > { %3343 = vrot.lane.b32.xlu1 %v3325_v3, %s6278_s7  ;;  %v3279_v57 = vadd.f32 %v4619_v46, %v3192_v26  ;;  %v3462_v26 = vld [vmem:[#allocation40 + $0x30] sm:$0xff] }
0x1215   : > { %v4621_v60 = vpop.f32.mrf.mxu1  ;;  %v3327_v63 = vpop.f32.mrf.mxu0 }
0x1216   : > { %v4622_v1 = vadd.f32 %v4621_v60, %v4620_v47  ;;  %v3328_v6 = vadd.f32 %v3327_v63, %v3279_v57  ;;  %v3460_v47 = vld [vmem:[#allocation40 + $0x20] sm:$0xff]  ;;  %v3461_v57 = vld [vmem:[#allocation40 + $0x28] sm:$0xff] }
0x1217   : > { %v4623_v50 = vpop.f32.mrf.mxu1 }
0x1218   : > { %v3284_v14 = vadd.f32 %v4622_v1, %v3197_v56  ;;  %3345 = vrot.lane.b32.xlu0 %v3328_v6, %s6278_s7  ;;  %v3459_v1 = vld [vmem:[#allocation40 + $0x18] sm:$0xff] }
0x1219   : > { %v4624_v17 = vpop.f32.mrf.mxu1 }
0x121a   : > { %v3333_v8 = vadd.f32 %v4704_v5, %v3284_v14  ;;  %v4625_v15 = vadd.f32 %v4624_v17, %v4623_v50  ;;  %v3458_v17 = vld [vmem:[#allocation40 + $0x10] sm:$0xff] }
0x121c   : > { %v3287_v61 = vadd.f32 %v4625_v15, %v3202_v16  ;;  %3347 = vrot.lane.b32.xlu1 %v3333_v8, %s6278_s7  ;;  %v3457_v16 = vld [vmem:[#allocation40 + $0x8] sm:$0xff] }
0x121e   : > { %v3336_v12 = vadd.f32 %v4705_v51, %v3287_v61 }
0x1220   : > { %3349 = vrot.lane.b32.xlu0 %v3336_v12, %s6278_s7  ;;  %s7786_s7 = sld [smem:[#allocation87_spill]] }
0x1286   : > { %v3344_v20 = vpop.permute.xlu1 %3343 }
0x1287   : > { %v3355_v18 = vsel %vm2457_vm4, %v3344_v20, 0.0 }
0x1288   : > { %v3359_v42 = vadd.f32 %v3355_v18, %v3325_v3  ;;  %v3463_v3 = vld [vmem:[#allocation40 + $0x38] sm:$0xff] }
0x128a   : > { %v3346_v21 = vpop.permute.xlu0 %3345  ;;  %3367 = vrot.lane.b32.xlu1 %v3359_v42, %s6300_s2 }
0x128b   : > { %v3356_v45 = vsel %vm2457_vm4, %v3346_v21, 0.0  ;;  %v5336_v21 = vld [vmem:[#allocation41 + $0x8] sm:$0xff]  }
0x128c   : > { %v3360_v10 = vadd.f32 %v3356_v45, %v3328_v6  ;;  %v5338_v45 = vld [vmem:[#allocation41 + $0x18] sm:$0xff]  }
0x128e   : > { %3369 = vrot.lane.b32.xlu0 %v3360_v10, %s6300_s2  ;;  %v3348_v38 = vpop.permute.xlu1 %3347 }
0x128f   : > { %v3357_v23 = vsel %vm2457_vm4, %v3348_v38, 0.0  ;;  %v5340_v38 = vld [vmem:[#allocation44 + $0x10] sm:$0xff]  }
0x1290   : > { %v3361_v49 = vadd.f32 %v3357_v23, %v3333_v8  ;;  %v5341_v23 = vld [vmem:[#allocation44 + $0x8] sm:$0xff]  }
0x1292   : > { %v3350_v11 = vpop.permute.xlu0 %3349  ;;  %3371 = vrot.lane.b32.xlu1 %v3361_v49, %s6300_s2 }
0x1293   : > { %v3358_v53 = vsel %vm2457_vm4, %v3350_v11, 0.0  ;;  %v5343_v11 = vld [vmem:[%s7786_s7 + $0x18] sm:$0xff]  }
0x1294   : > { %v3362_v24 = vadd.f32 %v3358_v53, %v3336_v12  ;;  %v3456_v12 = vld [vmem:[#allocation40] sm:$0xff]  ;;  %v5344_v53 = vld [vmem:[%s7786_s7 + $0x10] sm:$0xff]  }
0x1296   : > { %3373 = vrot.lane.b32.xlu0 %v3362_v24, %s6300_s2 }
0x12fc   : > { %v3368_v48 = vpop.permute.xlu1 %3367 }
0x12fd   : > { %v3379_v27 = vsel %vm2875_vm8, %v3368_v48, 0.0 }
0x12fe   : > { %v3383_v31 = vadd.f32 %v3379_v27, %v3359_v42  ;;  %v3472_v27 = vld [vmem:[#allocation43] sm:$0xff] }
0x1300   : > { %v3370_v32 = vpop.permute.xlu0 %3369 }
0x1301   : > { %v3380_v29 = vsel %vm2875_vm8, %v3370_v32, 0.0 }
0x1302   : > { %v3384_v30 = vadd.f32 %v3380_v29, %v3360_v10  ;;  %v5339_v10 = vld [vmem:[#allocation44 + $0x18] sm:$0xff]   ;;  %v3473_v29 = vld [vmem:[#allocation43 + $0x8] sm:$0xff] }
0x1304   : > { %v3387_v54 = vpack.c.bf16 %v3384_v30, %v3383_v31  ;;  %v3372_v52 = vpop.permute.xlu1 %3371  ;;  %v3475_v31 = vld [vmem:[#allocation43 + $0x18] sm:$0xff] }
0x1305   : > { %v3381_v28 = vsel %vm2875_vm8, %v3372_v52, 0.0 }
0x1306   : > { %4708 = vmatprep.mubr.msk.bf16.mxu0 %vm2448_vm6, %v3387_v54  ;;  %v3385_v35 = vadd.f32 %v3381_v28, %v3361_v49  ;;  %v5342_v49 = vld [vmem:[#allocation44] sm:$0xff]   ;;  %v3474_v28 = vld [vmem:[#allocation43 + $0x10] sm:$0xff] }
0x1308   : > { %v3374_v55 = vpop.permute.xlu0 %3373 }
0x1309   : > { %v3382_v34 = vsel %vm2875_vm8, %v3374_v55, 0.0 }
0x130a   : > { %v3386_v59 = vadd.f32 %v3382_v34, %v3362_v24 }
0x130c   : > { %v3388_v0 = vpack.c.bf16 %v3386_v59, %v3385_v35 }
0x130e   : > { %4709 = vmatmul.mubr.msk.bf16.vlgmr.msra.gmra.mxu0 %vm2448_vm6, %v3388_v0 }
0x130f   : > { %4732 = vmatprep.mubr.msk.bf16.mxu0 %vm2368_vm15, %v5335_v41 }
0x13ce   : > { %v4710_v36 = vpop.f32.mrf.mxu0 }
0x13d0   : > { %v3433_v13 = vpop.f32.mrf.mxu0 }
0x13d2   : > { %v4711_v37 = vpop.f32.mrf.mxu0 }
0x13d3   : > { %v3481_v39 = vpack.c.bf16 %v4711_v37, %v4710_v36 }
0x13d4   : > { %v3436_v7 = vpop.f32.mrf.mxu0 }
0x13d5   : > { %v3480_v19 = vpack.c.bf16 %v3436_v7, %v3433_v13  ;;  %4712 = vmatprep.subr.bf16.mxu1 %v3481_v39  ;;  %v3477_v13 = vld [vmem:[#allocation43 + $0x28] sm:$0xff] }
0x13d6   : > { %4713 = vmatpush3.bf16.msra.mxu1 %v3481_v39  ;;  %v3479_v39 = vld [vmem:[#allocation43 + $0x38] sm:$0xff] }
0x13d7   : > { %4714 = vmatprep.subr.bf16.mxu1 %v3480_v19 }
0x13da   : > { %4715 = vmatpush3.bf16.msra.mxu1 %v3480_v19 }
0x13db   : > { %4740 = vmatprep.subr.bf16.mxu1 %v6286_v22 }
0x13dd   : > { %4717 = vmatmul.mubr.msk.bf16.vlgmr.msra.gmra.mxu1 %vm3234_vm10, %v5332_v25 }
0x13de   : > { %4720 = vmatprep.mubr.msk.bf16.mxu1 %vm3234_vm10, %v5333_v2  ;;  %4741 = vmatpush3.bf16.msra.mxu1 %v5339_v10  ;;  %v3478_v2 = vld [vmem:[#allocation43 + $0x30] sm:$0xff] }
0x13df   : > { %4742 = vmatprep.subr.bf16.mxu1 %v6286_v22 }
0x13e2   : > { %4743 = vmatpush3.bf16.msra.mxu1 %v5340_v38 }
0x13e3   : > { %4744 = vmatprep.subr.bf16.mxu1 %v6286_v22 }
0x13e5   : > { %4721 = vmatmul.mubr.msk.bf16.gmra.mxu1 %vm3234_vm10, %v5334_v40 }
0x13e6   : > { %4748 = vmatprep.mubr.msk.bf16.mxu1 %vm6291_vm14, %v6286_v22  ;;  %4745 = vmatpush3.bf16.msra.mxu1 %v5341_v23 }
0x13e7   : > { %4746 = vmatprep.subr.bf16.mxu1 %v6286_v22 }
0x13ea   : > { %4747 = vmatpush3.bf16.msra.mxu1 %v5342_v49 }
0x13eb   : > { %4764 = vmatprep.subr.bf16.mxu1 %v6286_v22 }
0x149d   : > { %v4718_v58 = vpop.f32.mrf.mxu1 }
0x149e   : > { %v3557_v61 = vadd.f32 %v4718_v58, %v3458_v17 }
0x149f   : > { %v3548_v5 = vpop.f32.mrf.mxu1 }
0x14a0   : > { %v3549_v42 = vadd.f32 %v3548_v5, %v3456_v12 }
0x14a1   : > { %v4719_v43 = vpop.f32.mrf.mxu1 }
0x14a2   : > { %v3560_v8 = vadd.f32 %v4719_v43, %v3459_v1 }
0x14a3   : > { %v3551_v33 = vpop.f32.mrf.mxu1 }
0x14a4   : > { %v3580_v20 = vpack.c.bf16 %v3560_v8, %v3557_v61  ;;  %v3552_v18 = vadd.f32 %v3551_v33, %v3457_v16  ;;  %v5345_v33 = vld [vmem:[%s7786_s7 + $0x8] sm:$0xff]   ;;  %v3697_v16 = vld [vmem:[%s6471_s27] sm:$0x1] }
0x14a5   : > { %v4722_v44 = vpop.f32.mrf.mxu1  ;;  %v5353_v8 = vld [vmem:[%s6476_s25 + $0x8] sm:$0xff]  }
0x14a6   : > { %v3573_v60 = vadd.f32 %v4722_v44, %v3462_v26  ;;  %v3579_v4 = vpack.c.bf16 %v3552_v18, %v3549_v42  ;;  %v5346_v44 = vld [vmem:[%s7786_s7] sm:$0xff]   ;;  %v5347_v26 = vld [vmem:[%s6476_s25 + $0x38] sm:$0xff]  }
0x14a7   : > { %v3564_v46 = vpop.f32.mrf.mxu1 }
0x14a8   : > { %v3565_v56 = vadd.f32 %v3564_v46, %v3460_v47  ;;  %v5348_v46 = vld [vmem:[%s6476_s25 + $0x30] sm:$0xff]   ;;  %v5350_v47 = vld [vmem:[%s6476_s25 + $0x20] sm:$0xff]  }
0x14a9   : > { %v4723_v51 = vpop.f32.mrf.mxu1 }
0x14aa   : > { %v3576_v63 = vadd.f32 %v4723_v51, %v3463_v3  ;;  %v5349_v3 = vld [vmem:[%s6476_s25 + $0x28] sm:$0xff]   ;;  %v5351_v51 = vld [vmem:[%s6476_s25 + $0x18] sm:$0xff]  }
0x14ab   : > { %v3567_v6 = vpop.f32.mrf.mxu1 }
0x14ac   : > { %v3582_v50 = vpack.c.bf16 %v3576_v63, %v3573_v60  ;;  %v3568_v14 = vadd.f32 %v3567_v6, %v3461_v57  ;;  %v5352_v57 = vld [vmem:[%s6476_s25 + $0x10] sm:$0xff]   ;;  %v3688_v60 = vld [vmem:[%s7787_s4] sm:$0x1] }
0x14ae   : > { %v3581_v15 = vpack.c.bf16 %v3568_v14, %v3565_v56  ;;  %4724 = vmatprep.subr.bf16.mxu0 %v3582_v50 }
0x14af   : > { %4725 = vmatpush3.bf16.msra.mxu0 %v3582_v50 }
0x14b0   : > { %4726 = vmatprep.subr.bf16.mxu0 %v3581_v15 }
0x14b3   : > { %4727 = vmatpush3.bf16.msra.mxu0 %v3581_v15  ;;  %v5354_v15 = vld [vmem:[%s6476_s25] sm:$0xff]  }
0x14b4   : > { %4728 = vmatprep.subr.bf16.mxu0 %v3580_v20 }
0x14b7   : > { %4729 = vmatpush3.bf16.msra.mxu0 %v3580_v20 }
0x14b8   : > { %4730 = vmatprep.subr.bf16.mxu0 %v3579_v4 }
0x14bb   : > { %4731 = vmatpush3.bf16.msra.mxu0 %v3579_v4 }
0x14bc   : > { %4752 = vmatprep.subr.bf16.mxu0 %v6286_v22 }
0x14be   : > { %4733 = vmatmul.mubr.msk.bf16.vlgmr.msra.gmra.mxu0 %vm2368_vm15, %v5336_v21 }
0x14bf   : > { %4736 = vmatprep.mubr.msk.bf16.mxu0 %vm2368_vm15, %v5337_v62  ;;  %4753 = vmatpush3.bf16.msra.mxu0 %v5343_v11  ;;  %v3714_v62 = vld [vmem:[%s6481_s29] sm:$0x1] }
0x14c0   : > { %4754 = vmatprep.subr.bf16.mxu0 %v6286_v22 }
0x14c3   : > { %4755 = vmatpush3.bf16.msra.mxu0 %v5344_v53 }
0x14c4   : > { %4756 = vmatprep.subr.bf16.mxu0 %v6286_v22 }
0x14c6   : > { %4737 = vmatmul.mubr.msk.bf16.gmra.mxu0 %vm2368_vm15, %v5338_v45 }
0x14c7   : > { %4760 = vmatprep.mubr.msk.bf16.mxu0 %vm6291_vm14, %v6286_v22  ;;  %4757 = vmatpush3.bf16.msra.mxu0 %v5345_v33 }
0x14c8   : > { %4758 = vmatprep.subr.bf16.mxu0 %v6286_v22 }
0x14cb   : > { %4759 = vmatpush3.bf16.msra.mxu0 %v5346_v44 }
0x157e   : > { %v4734_v24 = vpop.f32.mrf.mxu0 }
0x157f   : > { %v3658_v0 = vadd.f32 %v4734_v24, %v3474_v28 }
0x1580   : > { %v3649_v48 = vpop.f32.mrf.mxu0 }
0x1581   : > { %v3650_v54 = vadd.f32 %v3649_v48, %v3472_v27 }
0x1582   : > { %v4735_v32 = vpop.f32.mrf.mxu0 }
0x1583   : > { %v3661_v34 = vadd.f32 %v4735_v32, %v3475_v31 }
0x1584   : > { %v3652_v30 = vpop.f32.mrf.mxu0 }
0x1585   : > { %v3653_v52 = vadd.f32 %v3652_v30, %v3473_v29  ;;  %v3716_v37 = vpack.c.bf16 %v3661_v34, %v3658_v0 }
0x1586   : > { %v4738_v55 = vpop.f32.mrf.mxu0 }
0x1587   : > { %v3715_v35 = vpack.c.bf16 %v3653_v52, %v3650_v54  ;;  %v3674_v58 = vadd.f32 %v4738_v55, %v3478_v2 }
0x1588   : > { %v3665_v59 = vpop.f32.mrf.mxu0 }
0x1589   : > { %3719 = vxpose.xlu1.c.b16.start [1/4] (short) (narrow) %v3715_v35, 16  ;;  %v3666_v19 = vadd.f32 %v3665_v59, %v3476_v9 }
0x158a   : > { %v4739_v36 = vpop.f32.mrf.mxu0 }
0x158b   : > { %v3677_v40 = vadd.f32 %v4739_v36, %v3479_v39 }
0x158c   : > { %v3668_v7 = vpop.f32.mrf.mxu0 }
0x158d   : > { %v3669_v25 = vadd.f32 %v3668_v7, %v3477_v13  ;;  %3720 = vxpose.xlu1.c.b16.cont [2/4] (short) (narrow) %v3716_v37, 16  ;;  %v3718_v5 = vpack.c.bf16 %v3677_v40, %v3674_v58 }
0x158f   : > { %v3717_v41 = vpack.c.bf16 %v3669_v25, %v3666_v19 }
0x1591   : > { %3721 = vxpose.xlu1.c.b16.cont [3/4] (short) (narrow) %v3717_v41, 16 }
0x1595   : > { %3722 = vxpose.xlu1.c.b16.end [4/4] (short) (narrow) %v3718_v5, 16 }
0x15eb   : > { %v3727_v43 = vpop.trf.xlu1 }
0x15ec   : > { %4749 = vmatmul.mubr.msk.bf16.vlgmr.msra.gmra.mxu1 %vm2368_vm15, %v3727_v43 }
0x15ed   : > { %4780 = vmatprep.mubr.msk.bf16.mxu1 %vm6291_vm14, %v6286_v22  ;;  %4765 = vmatpush3.bf16.msra.mxu1 %v5347_v26  ;;  %vm3961_vm14 = vcmask 303104  }
0x15ee   : > { %4766 = vmatprep.subr.bf16.mxu1 %v6286_v22 }
0x15f1   : > { %4767 = vmatpush3.bf16.msra.mxu1 %v5348_v46 }
0x15f2   : > { %4768 = vmatprep.subr.bf16.mxu1 %v6286_v22 }
0x15f5   : > { %4769 = vmatpush3.bf16.msra.mxu1 %v5349_v3 }
0x15f6   : > { %4770 = vmatprep.subr.bf16.mxu1 %v6286_v22 }
0x15f9   : > { %4771 = vmatpush3.bf16.msra.mxu1 %v5350_v47 }
0x15fa   : > { %4772 = vmatprep.subr.bf16.mxu1 %v6286_v22 }
0x15fd   : > { %4773 = vmatpush3.bf16.msra.mxu1 %v5351_v51 }
0x15fe   : > { %4774 = vmatprep.subr.bf16.mxu1 %v6286_v22 }
0x1601   : > { %4775 = vmatpush3.bf16.msra.mxu1 %v5352_v57 }
0x1602   : > { %4776 = vmatprep.subr.bf16.mxu1 %v6286_v22 }
0x1605   : > { %4777 = vmatpush3.bf16.msra.mxu1 %v5353_v8 }
0x1606   : > { %4778 = vmatprep.subr.bf16.mxu1 %v6286_v22 }
0x1609   : > { %4779 = vmatpush3.bf16.msra.mxu1 %v5354_v15 }
0x16ac   : > { %v3796_v63 = vpop.f32.mrf.mxu1 }
0x16ad   : > { %v3797_v1 = vadd.f32 %v3796_v63, %v3688_v60 }
0x16ae   : > { %v4750_v6 = vpop.f32.mrf.mxu1 }
0x16af   : > { %v3802_v56 = vmax.f32 %v3797_v1, 0.0 }
0x16b0   : > { %v3799_v50 = vpop.f32.mrf.mxu1 }
0x16b1   : > { %v3803_v14 = vpack.c.bf16 %v3802_v56, %v3802_v56 }
0x16b2   : > { %v4751_v17 = vpop.f32.mrf.mxu1 }
0x16b3   : > { %4761 = vmatmul.mubr.msk.bf16.vlgmr.msra.gmra.mxu0 %vm2368_vm15, %v3803_v14 }
0x1773   : > { %v3865_v61 = vpop.f32.mrf.mxu0 }
0x1774   : > { %v3866_v12 = vadd.f32 %v3865_v61, %v3697_v16 }
0x1775   : > { %v4762_v20 = vpop.f32.mrf.mxu0 }
0x1776   : > { %v3871_v18 = vmax.f32 %v3866_v12, 0.0 }
0x1777   : > { %v3868_v42 = vpop.f32.mrf.mxu0 }
0x1778   : > { %v3872_v4 = vpack.c.bf16 %v3871_v18, %v3871_v18 }
0x1779   : > { %v4763_v21 = vpop.f32.mrf.mxu0 }
0x177a   : > { %4781 = vmatmul.mubr.bf16.vlgmr.msra.gmra.mxu1 %v3872_v4 }
0x183a   : > { %v3955_v45 = vpop.f32.mrf.mxu1 }
0x183b   : > { %v3956_v22 = vadd.f32 %v3955_v45, %v3714_v62 }
0x183c   : > { %v4782_v10 = vpop.f32.mrf.mxu1 }
0x183d   : > { %3962 = vst.msk [vmem:[%s1459_s21] sm:$0x1] %vm3961_vm14, %v3956_v22 }
0x183e   : > { %v3958_v38 = vpop.f32.mrf.mxu1 }
0x183f   : > { %6096 = shalt.err (!%p6093_p1)
}
0x1840   : > { %s6097_s16 = scalar_lea.hbm %s7622_s22, 16  ;;  %s6101_s8 = scalar_lea.hbm %s6486_s17, 32 }
0x1841   : > { %p6098_p2 = scmp.ne.s32.totalorder %s7622_s22, %s6097_s16  ;;  %p6102_p9 = scmp.lt.s32.totalorder %s7622_s22, %s6486_s17 }
0x1842   : > { %p6103_p13 = scmp.lt.s32.totalorder %s6101_s8, %s6097_s16 }
0x1843   : > { %p6099_p3 = pnand %p6098_p2, %p7788_p5 }
0x1844   : > { %p6104_p7 = por %p6103_p13, %p6102_p9 }
0x1845   : > { %p6100_p4 = pneg %p6099_p3 }
0x1847   : > { %p6105_p8 = pnand %p6104_p7, %p6100_p4 }
0x1849   : > { %6108 = shalt.err (!%p6105_p8)
}
0x184a   : > { %4897 = dma.vmem_to_hbm [thread:$0]  (%p7788_p5), %s7624_s3, 16, %s7622_s22, %s3964_s23   ;;  %v4783_v23 = vpop.f32.mrf.mxu1 }
0x184b PF: > { %s7789_s6 = sld [smem:[#allocation90_spill]] }
0x184c   : > { %s7790_s2 = sld [smem:[#allocation88_spill]] }
0x184d   : > { %s7791_s1 = sld [smem:[#allocation93_spill]] }
0x1851   : > { %p5044_p12 = scmp.ge.s32.totalorder %s7789_s6, 2 }
0x1852   : > { %s3988_s4 = sand.u32 1, %s7790_s2  }
0x1853   : > { %p7792_p6 = scmp.ne.s32.totalorder %s7791_s1, 0  ;;  %s3989_s26 = scalar_lea.sflag [#allocation4], %s3988_s4 }
0x1855   : > { %p4985_p10 = pnand %p5044_p12, %p7792_p6 }
0x1857   : > { %p4986_p11 = pneg %p4985_p10 }
0x1859   : > { %6186 = dma.done.wait (%p4986_p11), %s3989_s26, 16  }
0x185a   : > { %6188 = vsyncadd (%p4986_p11), %s3989_s26, 4294967280  ;;  %s7793_s26 = sld [smem:[#allocation91_spill]]  ;;  %s7796_s22 = smov %s6195_s0 }
0x185b   : > { %s7794_s5 = sld [smem:[#allocation89_spill]] }
0x185c   : > { %s7795_s23 = sld [smem:[#allocation92_spill]] }
0x1860   : > { %p96_p0 = scmp.ge.s32.totalorder %s7793_s26, 4  }
0x1861   : > { %s7797_s0 = smov %s7794_s5 }
0x1862   :  { %98 = sbr.rel (!%p96_p0) target bundleno = 80 (0x50), region = 343 }
0x1867   :  { %3993 = vsyncpa [#allocation3], 1 }
0x1868   :  { %3995 = vsyncpa [#allocation3 + $0x1], 1 }
0x1869   :  { %3996 = vsyncpa [#allocation6], 1 }
0x186a   :  { %3997 = vsyncpa [#allocation9], 1 }
0x186b   :  { %3998 = vsyncpa [#allocation12], 1 }
0x186c   :  { %3999 = vsyncpa [#allocation15], 1 }
0x186d   :  { %4000 = vsyncpa [#allocation18], 1 }
0x186e   :  { %4001 = vsyncpa [#allocation21], 1 }
0x186f   :  { %4002 = vsyncpa [#allocation24], 1 }
0x1870   :  { %4003 = vsyncpa [#allocation27], 1 }
0x1871   :  { %4004 = vsyncpa [#allocation30], 1 }
0x1872   :  { %4005 = vsyncpa [#allocation33], 1 }
0x1873   :  { %4006 = vsyncpa [#allocation36], 1 }
0x1874   :  { %4007 = vsyncpa [#allocation39], 1 }
0x1875   :  { %4008 = vsyncpa [#allocation42], 1 }
0x1876   :  { %4009 = vsyncpa [#allocation45], 1 }
0x1877   :  { %4010 = vsyncpa [#allocation4], 1 }
0x1878   :  { %4012 = vsyncpa [#allocation4 + $0x1], 1 }

</bundles_post_ra>
